<compile_context>
chip_gen: v6e
topology: v6e:2x2x1
jax: 0.10.0
libtpu: 0.0.40
codegen_flags: <defaults>
</compile_context>

<pallas_src>
import functools

import jax
import jax.numpy as jnp
from jax.experimental import pallas as pl
from jax.experimental.pallas import tpu as pltpu

LOG_STD_MIN = -5.0
LOG_STD_MAX = 2.0

_LANE = 128
_MIN_PALLAS_ELEMS = 64 * 1024   # below this, launch/reshape overhead > actual work


# --------------------------------------------------------------------------- #
# Kernel
# --------------------------------------------------------------------------- #
def _actor_kernel(x_ref, std_ref, mean_ref):
    # Compute in f32 regardless of input dtype (v5e has no bf16 VPU/EUP);
    # cast only on store.
    x = x_ref[...].astype(jnp.float32)
    t = jnp.tanh(x)
    log_std = LOG_STD_MIN + 0.5 * (LOG_STD_MAX - LOG_STD_MIN) * (t + 1.0)
    std_ref[...] = jnp.exp(log_std).astype(std_ref.dtype)
    mean_ref[...] = t.astype(mean_ref.dtype)   # SquashedNormal.mean = tanh(loc)


# --------------------------------------------------------------------------- #
# Helpers
# --------------------------------------------------------------------------- #
def _std_mean_jnp(mu):
    """Fused-XLA path for tiny or lane-ragged inputs (already HBM-roofline)."""
    t = jnp.tanh(mu.astype(jnp.float32))
    log_std = LOG_STD_MIN + 0.5 * (LOG_STD_MAX - LOG_STD_MIN) * (t + 1.0)
    return jnp.exp(log_std).astype(mu.dtype), t.astype(mu.dtype)


@functools.lru_cache(maxsize=None)
def _default_block_rows():
    """Per-chip block-row budget (rows of a 1024-lane f32 tile)."""
    try:
        kind = jax.devices()[0].device_kind.lower()
    except Exception:  # pragma: no cover - defensive
        return 512
    if "v7" in kind or "7x" in kind:
        return 1024       # ~4 MiB/array/step: amortize 0.35us step cost at 3.2 TB/s
    if "v6" in kind:
        return 512        # ~2 MiB/array/step: ~86-90% of v6e HBM roofline
    if "v5" in kind and ("lite" in kind or "5e" in kind):
        return 256        # stay under v5e's 16 MiB scoped-VMEM default
    return 512


def _sublane_multiple(dtype):
    itemsize = jnp.dtype(dtype).itemsize
    return max(8, 32 // max(itemsize, 1))   # 8 for f32, 16 for bf16, 32 for int8


def _round_up(x, m):
    return ((x + m - 1) // m) * m


def _pick_cols(n):
    """Largest lane-dense column count that divides n exactly (0 if none)."""
    for c in (1024, 512, 256, 128):
        if n % c == 0:
            return c
    return 0


# --------------------------------------------------------------------------- #
# Wrapper
# --------------------------------------------------------------------------- #
def diag_gaussian_actor_forward(mu):
    """Returns (loc, std, squashed_mean), each with the same shape as `mu`.

    loc is a bit-exact passthrough of `mu`; std and squashed_mean are produced
    by a single lane-dense Pallas pass (or a fused-XLA fallback for tiny /
    lane-ragged inputs, where any pad/slice copy would dominate the op).
    """
    orig_shape = mu.shape
    n = mu.size
    cols = _pick_cols(n)

    if n < _MIN_PALLAS_ELEMS or cols == 0:
        std, mean = _std_mean_jnp(mu)
        return mu, std, mean

    rows = n // cols                       # exact: no padding, no output slicing
    sub = _sublane_multiple(mu.dtype)

    # >=2 grid blocks whenever possible so v7x shards the parallel axis over
    # its 2 TensorCores; cap at the per-chip block-row budget.  block_rows is a
    # multiple of the (dtype-aware) sublane tile; the last block may be partial
    # (Pallas clips it: overshoot reads are never written back).
    block_rows = min(_default_block_rows(),
                     max(sub, _round_up(pl.cdiv(rows, 2), sub)))
    num_blocks = pl.cdiv(rows, block_rows)

    itemsize = jnp.dtype(mu.dtype).itemsize
    block_bytes = block_rows * cols * itemsize
    # 1 input + 2 outputs double-buffered, plus f32 elementwise temporaries,
    # plus headroom.  Never request below ~32 MiB (safe on all gens).
    vmem_limit = max(6 * block_bytes + 4 * block_rows * cols * 4 + (4 << 20),
                     32 << 20)

    x2d = mu.reshape(rows, cols)           # contiguous reshape: free bitcast
    spec = pl.BlockSpec((block_rows, cols), lambda i: (i, 0))

    std2d, mean2d = pl.pallas_call(
        _actor_kernel,
        out_shape=(
            jax.ShapeDtypeStruct((rows, cols), mu.dtype),
            jax.ShapeDtypeStruct((rows, cols), mu.dtype),
        ),
        grid_spec=pltpu.PrefetchScalarGridSpec(
            num_scalar_prefetch=0,
            grid=(num_blocks,),
            in_specs=[spec],
            out_specs=[spec, spec],
        ),
        compiler_params=pltpu.CompilerParams(
            dimension_semantics=("parallel",),
            vmem_limit_bytes=int(vmem_limit),
        ),
    )(x2d)

    return mu, std2d.reshape(orig_shape), mean2d.reshape(orig_shape)


def init_actor_params(key, hidden_dim=1280, act_dim=18):
    """Deterministic init matching DiagGaussianActor.__init__ parameter shapes.
    NOTE: these Linear layers are defined in __init__ but never used by the
    reference forward() (quirk of the original module); created only for shape
    fidelity."""
    k1, k2 = jax.random.split(key)
    w_mu = jax.nn.initializers.orthogonal()(k1, (act_dim, hidden_dim), jnp.float32)
    b_mu = jnp.zeros((act_dim,), jnp.float32)
    w_ls = jax.nn.initializers.orthogonal()(k2, (act_dim, hidden_dim), jnp.float32)
    b_ls = jnp.zeros((act_dim,), jnp.float32)
    return {"mu": (w_mu, b_mu), "log_std": (w_ls, b_ls)}


# --------------------------------------------------------------------------- #
# Self-test
# --------------------------------------------------------------------------- #
if __name__ == "__main__":
    key = jax.random.PRNGKey(0)
    k_params, k1, k2, k3, k4 = jax.random.split(key, 5)

    # Defined-but-unused layers, bug-faithful to the original module.
    _ = init_actor_params(k_params, hidden_dim=1280, act_dim=18)

    def reference(mu):
        t = jnp.tanh(mu.astype(jnp.float32))
        log_std = LOG_STD_MIN + 0.5 * (LOG_STD_MAX - LOG_STD_MIN) * (t + 1.0)
        return jnp.exp(log_std).astype(mu.dtype), t.astype(mu.dtype)

    def check(mu):
        loc, std, mean = diag_gaussian_actor_forward(mu)
        jax.block_until_ready((loc, std, mean))
        ref_std, ref_mean = reference(mu)
        assert loc.shape == std.shape == mean.shape == mu.shape
        assert bool(jnp.array_equal(loc, mu))                      # exact passthrough
        assert jnp.allclose(std, ref_std, atol=1e-5, rtol=1e-5)
        assert jnp.allclose(mean, ref_mean, atol=1e-6, rtol=1e-6)

    # 1) Module-consistent small shape (batch=2, seq=8, hidden=1280):
    #    tiny-input fused-XLA fallback path.
    check(jax.random.normal(k1, (2, 8, 1280), dtype=jnp.float32))

    # 2) Pallas path: cols=1024, multiple parallel grid blocks.
    check(jax.random.normal(k2, (8, 64, 1280), dtype=jnp.float32))

    # 3) Pallas path: cols=128 and a clipped partial last block (no padding).
    check(jax.random.normal(k3, (23, 3200), dtype=jnp.float32))

    # 4) Large lane-ragged shape: fused-XLA path (avoids pad/slice HBM copies).
    check(jax.random.normal(k4, (70, 1283), dtype=jnp.float32))

    print("KERNEL_OK")
</pallas_src>

<mosaic_0001>
module attributes {stable_mosaic.version = 11 : i64} {
  func.func @_actor_kernel(%arg0: i32, %arg1: memref<320x1024xf32, #tpu.memory_space<vmem>>, %arg2: memref<320x1024xf32, #tpu.memory_space<vmem>>, %arg3: memref<320x1024xf32, #tpu.memory_space<vmem>>) attributes {dimension_semantics = [#tpu.dimension_semantics<parallel>], iteration_bounds = array<i64: 2>, scalar_prefetch = 0 : i64, scratch_operands = 0 : i64, tpu.core_type = #tpu.core_type<tc>, window_params = [{transform_indices = @transform_0, window_bounds = array<i64: 320, 1024>}, {transform_indices = @transform_1, window_bounds = array<i64: 320, 1024>}, {transform_indices = @transform_2, window_bounds = array<i64: 320, 1024>}]} {
    %c0 = arith.constant 0 : index
    %c0_0 = arith.constant 0 : index
    %0 = vector.load %arg1[%c0, %c0_0] : memref<320x1024xf32, #tpu.memory_space<vmem>>, vector<320x1024xf32>
    %1 = math.tanh %0 : vector<320x1024xf32>
    %cst = arith.constant 1.000000e+00 : f32
    %2 = vector.broadcast %cst : f32 to vector<320x1024xf32>
    %3 = arith.addf %1, %2 : vector<320x1024xf32>
    %cst_1 = arith.constant 3.500000e+00 : f32
    %4 = vector.broadcast %cst_1 : f32 to vector<320x1024xf32>
    %5 = arith.mulf %4, %3 : vector<320x1024xf32>
    %cst_2 = arith.constant -5.000000e+00 : f32
    %6 = vector.broadcast %cst_2 : f32 to vector<320x1024xf32>
    %7 = arith.addf %6, %5 : vector<320x1024xf32>
    %8 = math.exp %7 : vector<320x1024xf32>
    %c0_3 = arith.constant 0 : index
    %c0_4 = arith.constant 0 : index
    %9 = vector.load %arg2[%c0_3, %c0_4] : memref<320x1024xf32, #tpu.memory_space<vmem>>, vector<320x1024xf32>
    tpu.vector_store %arg2[%c0_3, %c0_4], %8 {strides = array<i32>} : memref<320x1024xf32, #tpu.memory_space<vmem>>, vector<320x1024xf32>,
    %c0_5 = arith.constant 0 : index
    %c0_6 = arith.constant 0 : index
    %10 = vector.load %arg3[%c0_5, %c0_6] : memref<320x1024xf32, #tpu.memory_space<vmem>>, vector<320x1024xf32>
    tpu.vector_store %arg3[%c0_5, %c0_6], %1 {strides = array<i32>} : memref<320x1024xf32, #tpu.memory_space<vmem>>, vector<320x1024xf32>,
    return
  }
  func.func @transform_0(%arg0: i32) -> (i32, i32) {
    %c0_i32 = arith.constant 0 : i32
    %c0_i32_0 = arith.constant 0 : i32
    return %arg0, %c0_i32 : i32, i32
  }
  func.func @transform_1(%arg0: i32) -> (i32, i32) {
    %c0_i32 = arith.constant 0 : i32
    %c0_i32_0 = arith.constant 0 : i32
    return %arg0, %c0_i32 : i32, i32
  }
  func.func @transform_2(%arg0: i32) -> (i32, i32) {
    %c0_i32 = arith.constant 0 : i32
    %c0_i32_0 = arith.constant 0 : i32
    return %arg0, %c0_i32 : i32, i32
  }
}

</mosaic_0001>

<bundles_post_ra>
// kernel: tpu_custom_call.1
= control target key start
LH: loop header
LB: loop body
LE: loop exit
PB: predicated region body
PF: predicated region fallthrough
CT: control target
= control target key end

     0   :  { %8 = vsyncpa [#allocation3], 0  ;;  %s6944_s0 = inlined_call_operand.hbm [shape: f32[640,1024], index: 0, kind: input, shape index: {}]   ;;  %s6945_s1 = inlined_call_operand.hbm [shape: f32[640,1024], index: 1, kind: output, shape index: {0}]   ;;  %s6946_s2 = inlined_call_operand.hbm [shape: f32[640,1024], index: 2, kind: output, shape index: {1}]  }
   0x1   :  { %10 = vsyncpa [#allocation3 + $0x1], 0 }
   0x2   :  { %11 = vsyncpa [#allocation4], 0 }
   0x3   :  { %13 = vsyncpa [#allocation4 + $0x1], 0 }
   0x4   :  { %14 = vsyncpa [#allocation7], 0 }
   0x5   :  { %16 = vsyncpa [#allocation7 + $0x1], 0  ;;  %s4703_s9 = smov 0   ;;  %s4705_s10 = smov 0  }
   0x6   :  { %s4707_s11 = smov 0   ;;  %s4709_s12 = smov 0  }
   0x7 LB: > { %s4724_s13 = sadd.s32 4294967295, %s4679_s12   ;;  %s3199_s14 = sadd.s32 4294967294, %s4679_s12   ;;  %s4679_s12 = sphi %s4709_s12, %s7608_s12   ;;  %s4675_s11 = sphi %s4707_s11, %s7607_s11   ;;  %s4671_s10 = sphi %s4705_s10, %s7606_s10   ;;  %s4667_s9 = sphi %s4703_s9, %s7605_s9  }
   0x8   : > { %s4728_s15 = sadd.s32 1, %s4679_s12   ;;  %s29_s16 = sadd.s32 1, %s4675_s11 }
   0x9   : > { %s26_s17 = ssub.s32 %s4679_s12, %s4728_s15  ;;  %p36_p0 = scmp.ne.s32.totalorder %s4675_s11, %s4671_s10 }
   0xa   : > { %p27_p1 = scmp.eq.s32.totalorder %s26_s17, 0  ;;  %p37_p2 = scmp.eq.s32.totalorder %s4679_s12, 0 }
   0xb   : > { %p42_p3 = scmp.ne.s32.totalorder %s4671_s10, %s4667_s9  ;;  %p43_p4 = scmp.eq.s32.totalorder %s4724_s13, 0 }
   0xc   : > { %s4740_s18 = scalar_select %p27_p1, %s4675_s11, %s29_s16  }
   0xd   : > { %p38_p5 = por %p37_p2, %p36_p0  ;;  %p4742_p6 = por %p43_p4, %p42_p3 }
   0xe   : > { %p66_p7 = scmp.eq.s32.totalorder %s4724_s13, 1  ;;  %p72_p8 = scmp.eq.s32.totalorder %s3199_s14, 1 }
   0xf   : > { %s7165_s19 = scalar_select %p4742_p6, 1, 0 }
  0x10   : > { %p3239_p10 = scmp.lt.s32.totalorder %s4679_s12, 2  ;;  %p4749_p11 = por %p66_p7, %p36_p0 }
  0x11   : > { %p4753_p12 = por %p72_p8, %p42_p3  ;;  %s118_s22 = sand.u32 1, %s4675_s11  }
  0x12   : > { %s7166_s20 = scalar_select %p4749_p11, 1, 0 }
  0x13   : > { %s7167_s21 = scalar_select %p4753_p12, 1, 0 }
  0x14   : > { %s3217_s23 = smul.u32 40960, %s4679_s12  ;;  %p4764_p13 = pnand %p3239_p10, %p38_p5 }
  0x15   : > { %s3220_s24 = smul.u32 2560, %s118_s22  ;;  %s4770_s3 = scalar_lea.sflag [#allocation3], %s118_s22 }
  0x16   : > { %s4762_s27 = scalar_lea.hbm %s6944_s0, %s3217_s23  ;;  %p4559_p1 = pneg %p4764_p13 }
  0x17   : > { %s122_s29 = scalar_lea.vmem [#allocation2], %s3220_s24  ;;  %s4557_s4 = scalar_lea.hbm %s4762_s27, 40960 }
  0x18   : > { %s130_s30 = sshll.u32 %s122_s29, 4  ;;  %p4558_p0 = scmp.ne.s32.totalorder %s4762_s27, %s4557_s4  ;;  %s4768_s30 = int_to_ptr.vmem [resolvable:$true] %s130_s30 }
  0x19   : > { %s4562_s7 = scalar_lea.hbm %s6944_s0, 81920  ;;  %p4563_p4 = scmp.lt.s32.totalorder %s4762_s27, %s6944_s0 }
  0x1a   : > { %p4560_p2 = pnand %p4559_p1, %p4558_p0  ;;  %p4564_p5 = scmp.lt.s32.totalorder %s4562_s7, %s4557_s4 }
  0x1c   : > { %p4561_p3 = pneg %p4560_p2  ;;  %p4565_p7 = por %p4564_p5, %p4563_p4 }
  0x1e   : > { %p4566_p8 = pnand %p4565_p7, %p4561_p3 }
  0x20   : > { %4569 = shalt.err (!%p4566_p8)
}
  0x21   : > { %s4570_s16 = scalar_lea.vmem %s4768_s30, 40960  ;;  %s4681_s17 = smov [#allocation2]  }
  0x22   : > { %p4571_p10 = scmp.ne.s32.totalorder %s4768_s30, %s4570_s16  ;;  %s4575_s22 = sshll.u32 %s4681_s17, 4  ;;  %s4576_s22 = int_to_ptr.vmem [resolvable:$false] %s4575_s22 }
  0x23   : > { %s4577_s23 = scalar_lea.vmem %s4576_s22, 81920  ;;  %p4578_p2 = scmp.lt.s32.totalorder %s4768_s30, %s4576_s22 }
  0x24   : > { %p4573_p9 = pnand %p4571_p10, %p4559_p1  ;;  %p4579_p12 = scmp.lt.s32.totalorder %s4577_s23, %s4570_s16 }
  0x26   : > { %p4574_p0 = pneg %p4573_p9  ;;  %p4580_p11 = por %p4579_p12, %p4578_p2 }
  0x28   : > { %p4581_p6 = pnand %p4580_p11, %p4574_p0 }
  0x2a   : > { %4584 = shalt.err (!%p4581_p6)
}
  0x2b   : > { %s4682_s24 = smov 1024   ;;  %s4683_s25 = smov 64  }
  0x2c   : > { %3231 = dma.hbm_to_vmem [thread:$0]  (!%p4764_p13), %s4762_s27, 40960, %s4768_s30, %s4770_s3, %s4682_s24, %s4682_s24, %s4683_s25  }
  0x2d   : > { %p3204_p9 = scmp.ge.s32.totalorder %s4679_s12, 1  ;;  %p138_p1 = scmp.lt.s32.totalorder %s4679_s12, 3 }
  0x2f   : > { %p139_p3 = pnand %p3204_p9, %p138_p1 }
  0x31   : > { %142 = sbr.rel (%p139_p3) target bundleno = 816 (0x330), region = 24 }
  0x36   : > { %s4794_s26 = sand.u32 1, %s4671_s10   ;;  %p7169_p6 = scmp.ne.s32.totalorder %s7165_s19, 0 }
  0x37   : > { %s4797_s29 = smul.u32 2560, %s4794_s26  ;;  %s145_s4 = scalar_lea.sflag [#allocation3], %s4794_s26 }
  0x39   : > { %s4801_s5 = scalar_lea.vmem [#allocation2], %s4797_s29 }
  0x3a   : > { %4654 = dma.done.wait (%p7169_p6), %s145_s4, 40960  }
  0x3b   : > { %4656 = vsyncadd (%p7169_p6), %s145_s4, 4294926336  ;;  %v177_v0 = vld [vmem:[%s4801_s5] sm:$0xff]  ;;  %v178_v1 = vld [vmem:[%s4801_s5 + $0x8] sm:$0xff]  ;;  %s4886_s19 = scalar_lea.vmem [#allocation5], %s4797_s29  ;;  %s6160_s27 = scalar_lea.vmem [#allocation6], %s4797_s29 }
  0x3c   : > { %v179_v2 = vld [vmem:[%s4801_s5 + $0x10] sm:$0xff]  ;;  %3277 = vtanh.f32 %v177_v0  ;;  %v180_v3 = vld [vmem:[%s4801_s5 + $0x18] sm:$0xff]  ;;  %v181_v4 = vld [vmem:[%s4801_s5 + $0x20] sm:$0xff]  ;;  %s3218_s28 = smul.u32 40960, %s4724_s13  ;;  %s3094_s30 = sshll.u32 %s6160_s27, 4  ;;  %s6842_s30 = int_to_ptr.vmem [resolvable:$true] %s3094_s30 }
  0x3d   : > { %3279 = vtanh.f32 %v178_v1  ;;  %v182_v5 = vld [vmem:[%s4801_s5 + $0x28] sm:$0xff]  ;;  %v183_v6 = vld [vmem:[%s4801_s5 + $0x30] sm:$0xff]  ;;  %v184_v7 = vld [vmem:[%s4801_s5 + $0x38] sm:$0xff]  ;;  %s3063_s8 = scalar_lea.sflag [#allocation7], %s4794_s26  ;;  %s4585_s14 = scalar_lea.vmem %s6842_s30, 40960 }
  0x3e   : > { %3281 = vtanh.f32 %v179_v2  ;;  %v185_v8 = vld [vmem:[%s4801_s5 + $0x40] sm:$0xff]  ;;  %v186_v9 = vld [vmem:[%s4801_s5 + $0x48] sm:$0xff]  ;;  %v187_v10 = vld [vmem:[%s4801_s5 + $0x50] sm:$0xff]  ;;  %s6840_s7 = scalar_lea.hbm %s6946_s2, %s3218_s28  ;;  %p4586_p11 = scmp.ne.s32.totalorder %s6842_s30, %s4585_s14 }
  0x3f   : > { %3283 = vtanh.f32 %v180_v3  ;;  %v188_v11 = vld [vmem:[%s4801_s5 + $0x58] sm:$0xff]  ;;  %v189_v12 = vld [vmem:[%s4801_s5 + $0x60] sm:$0xff]  ;;  %v190_v13 = vld [vmem:[%s4801_s5 + $0x68] sm:$0xff]  ;;  %p7602_p12 = scmp.ne.s32.totalorder %s7166_s20, 0  ;;  %s4684_s16 = smov [#allocation6]  }
  0x40   : > { %3285 = vtanh.f32 %v181_v4  ;;  %v191_v14 = vld [vmem:[%s4801_s5 + $0x70] sm:$0xff]  ;;  %v192_v15 = vld [vmem:[%s4801_s5 + $0x78] sm:$0xff]  ;;  %v193_v17 = vld [vmem:[%s4801_s5 + $0x80] sm:$0xff]  ;;  %s4589_s17 = sshll.u32 %s4684_s16, 4  ;;  %s4590_s17 = int_to_ptr.vmem [resolvable:$false] %s4589_s17 }
  0x41   : > { %3287 = vtanh.f32 %v182_v5  ;;  %v194_v20 = vld [vmem:[%s4801_s5 + $0x88] sm:$0xff]  ;;  %v195_v23 = vld [vmem:[%s4801_s5 + $0x90] sm:$0xff]  ;;  %v196_v27 = vld [vmem:[%s4801_s5 + $0x98] sm:$0xff]  ;;  %p4587_p13 = pnand %p4586_p11, %p7602_p12  ;;  %s4591_s22 = scalar_lea.vmem %s4590_s17, 81920 }
  0x42   : > { %3289 = vtanh.f32 %v183_v6  ;;  %p4592_p5 = scmp.lt.s32.totalorder %s6842_s30, %s4590_s17  ;;  %p4593_p7 = scmp.lt.s32.totalorder %s4591_s22, %s4585_s14 }
  0x43   : > { %3291 = vtanh.f32 %v184_v7  ;;  %p4588_p4 = pneg %p4587_p13 }
  0x44   : > { %3293 = vtanh.f32 %v185_v8  ;;  %p4594_p8 = por %p4593_p7, %p4592_p5 }
  0x45   : > { %3295 = vtanh.f32 %v186_v9 }
  0x46   : > { %3297 = vtanh.f32 %v187_v10  ;;  %p4595_p10 = pnand %p4594_p8, %p4588_p4 }
  0x47   : > { %3299 = vtanh.f32 %v188_v11 }
  0x48   : > { %3301 = vtanh.f32 %v189_v12 }
  0x49   : > { %v4823_v16 = vpop.eup %3277  ;;  %3303 = vtanh.f32 %v190_v13 }
  0x4a   : > { %v4826_v18 = vpop.eup %3279  ;;  %v817_v19 = vadd.f32 1.0, %v4823_v16  ;;  %3305 = vtanh.f32 %v191_v14  ;;  %2737 = vst [vmem:[%s6160_s27] sm:$0xff] %v4823_v16 }
  0x4b   : > { %v4830_v21 = vpop.eup %3281  ;;  %v818_v22 = vadd.f32 1.0, %v4826_v18  ;;  %3307 = vtanh.f32 %v192_v15  ;;  %2738 = vst [vmem:[%s6160_s27 + $0x8] sm:$0xff] %v4826_v18 }
  0x4c   : > { %v4834_v24 = vpop.eup %3283  ;;  %v1137_v25 = vmul.f32 3.5, %v817_v19  ;;  %v819_v26 = vadd.f32 1.0, %v4830_v21  ;;  %3309 = vtanh.f32 %v193_v17  ;;  %2739 = vst [vmem:[%s6160_s27 + $0x10] sm:$0xff] %v4830_v21 }
  0x4d   : > { %v4838_v28 = vpop.eup %3285  ;;  %v1138_v29 = vmul.f32 3.5, %v818_v22  ;;  %v820_v30 = vadd.f32 1.0, %v4834_v24  ;;  %3311 = vtanh.f32 %v194_v20  ;;  %2740 = vst [vmem:[%s6160_s27 + $0x18] sm:$0xff] %v4834_v24 }
  0x4e   : > { %v4841_v31 = vpop.eup %3287  ;;  %v1457_v32 = vadd.f32 -5.0, %v1137_v25  ;;  %v1139_v33 = vmul.f32 3.5, %v819_v26  ;;  %v821_v34 = vadd.f32 1.0, %v4838_v28  ;;  %3313 = vtanh.f32 %v195_v23  ;;  %2741 = vst [vmem:[%s6160_s27 + $0x20] sm:$0xff] %v4838_v28 }
  0x4f   : > { %v4844_v35 = vpop.eup %3289  ;;  %v1458_v36 = vadd.f32 -5.0, %v1138_v29  ;;  %v1140_v37 = vmul.f32 3.5, %v820_v30  ;;  %v822_v38 = vadd.f32 1.0, %v4841_v31  ;;  %3315 = vtanh.f32 %v196_v27  ;;  %2742 = vst [vmem:[%s6160_s27 + $0x28] sm:$0xff] %v4841_v31 }
  0x50   : > { %v4847_v39 = vpop.eup %3291  ;;  %v1777_v40 = vmul.f32 1.442695, %v1457_v32  ;;  %v1459_v41 = vadd.f32 -5.0, %v1139_v33  ;;  %v1141_v42 = vmul.f32 3.5, %v821_v34  ;;  %v823_v43 = vadd.f32 1.0, %v4844_v35  ;;  %2743 = vst [vmem:[%s6160_s27 + $0x30] sm:$0xff] %v4844_v35 }
  0x51   : > { %v4850_v44 = vpop.eup %3293  ;;  %v1779_v45 = vmul.f32 1.442695, %v1458_v36  ;;  %v1460_v46 = vadd.f32 -5.0, %v1140_v37  ;;  %v1142_v47 = vmul.f32 3.5, %v822_v38  ;;  %v824_v48 = vadd.f32 1.0, %v4847_v39  ;;  %2744 = vst [vmem:[%s6160_s27 + $0x38] sm:$0xff] %v4847_v39 }
  0x52   : > { %v4853_v49 = vpop.eup %3295  ;;  %3317 = vpow2.f32 %v1777_v40  ;;  %v1781_v50 = vmul.f32 1.442695, %v1459_v41  ;;  %v1461_v51 = vadd.f32 -5.0, %v1141_v42  ;;  %v1143_v52 = vmul.f32 3.5, %v823_v43  ;;  %2745 = vst [vmem:[%s6160_s27 + $0x40] sm:$0xff] %v4850_v44 }
  0x53   : > { %v4855_v53 = vpop.eup %3297  ;;  %3319 = vpow2.f32 %v1779_v45  ;;  %v1783_v54 = vmul.f32 1.442695, %v1460_v46  ;;  %v1462_v55 = vadd.f32 -5.0, %v1142_v47  ;;  %v1144_v56 = vmul.f32 3.5, %v824_v48  ;;  %2746 = vst [vmem:[%s6160_s27 + $0x48] sm:$0xff] %v4853_v49 }
  0x54   : > { %v4857_v57 = vpop.eup %3299  ;;  %3321 = vpow2.f32 %v1781_v50  ;;  %v1785_v58 = vmul.f32 1.442695, %v1461_v51  ;;  %v1463_v59 = vadd.f32 -5.0, %v1143_v52  ;;  %v825_v60 = vadd.f32 1.0, %v4850_v44  ;;  %2747 = vst [vmem:[%s6160_s27 + $0x50] sm:$0xff] %v4855_v53 }
  0x55   : > { %v4860_v61 = vpop.eup %3301  ;;  %3323 = vpow2.f32 %v1783_v54  ;;  %v1787_v62 = vmul.f32 1.442695, %v1462_v55  ;;  %v1464_v63 = vadd.f32 -5.0, %v1144_v56  ;;  %v826_v0 = vadd.f32 1.0, %v4853_v49  ;;  %2748 = vst [vmem:[%s6160_s27 + $0x58] sm:$0xff] %v4857_v57 }
  0x56   : > { %v4863_v1 = vpop.eup %3303  ;;  %3325 = vpow2.f32 %v1785_v58  ;;  %v1789_v2 = vmul.f32 1.442695, %v1463_v59  ;;  %v1145_v3 = vmul.f32 3.5, %v825_v60  ;;  %v827_v4 = vadd.f32 1.0, %v4855_v53  ;;  %2749 = vst [vmem:[%s6160_s27 + $0x60] sm:$0xff] %v4860_v61 }
  0x57   : > { %v4866_v5 = vpop.eup %3305  ;;  %3327 = vpow2.f32 %v1787_v62  ;;  %v1791_v6 = vmul.f32 1.442695, %v1464_v63  ;;  %v1146_v7 = vmul.f32 3.5, %v826_v0  ;;  %v828_v8 = vadd.f32 1.0, %v4857_v57  ;;  %v197_v62 = vld [vmem:[%s4801_s5 + $0xa0] sm:$0xff]  ;;  %2750 = vst [vmem:[%s6160_s27 + $0x68] sm:$0xff] %v4863_v1 }
  0x58   : > { %v4869_v9 = vpop.eup %3307  ;;  %3329 = vpow2.f32 %v1789_v2  ;;  %v1465_v10 = vadd.f32 -5.0, %v1145_v3  ;;  %v1147_v11 = vmul.f32 3.5, %v827_v4  ;;  %v829_v12 = vadd.f32 1.0, %v4860_v61  ;;  %v198_v3 = vld [vmem:[%s4801_s5 + $0xa8] sm:$0xff]  ;;  %2751 = vst [vmem:[%s6160_s27 + $0x70] sm:$0xff] %v4866_v5 }
  0x59   : > { %v4872_v13 = vpop.eup %3309  ;;  %3331 = vpow2.f32 %v1791_v6  ;;  %v1466_v14 = vadd.f32 -5.0, %v1146_v7  ;;  %v1148_v15 = vmul.f32 3.5, %v828_v8  ;;  %v830_v17 = vadd.f32 1.0, %v4863_v1  ;;  %2752 = vst [vmem:[%s6160_s27 + $0x78] sm:$0xff] %v4869_v9 }
  0x5a   : > { %v4875_v19 = vpop.eup %3311  ;;  %v1793_v20 = vmul.f32 1.442695, %v1465_v10  ;;  %v1467_v22 = vadd.f32 -5.0, %v1147_v11  ;;  %v1149_v23 = vmul.f32 3.5, %v829_v12  ;;  %v831_v25 = vadd.f32 1.0, %v4866_v5  ;;  %2753 = vst [vmem:[%s6160_s27 + $0x80] sm:$0xff] %v4872_v13 }
  0x5b   : > { %v4878_v26 = vpop.eup %3313  ;;  %v1795_v27 = vmul.f32 1.442695, %v1466_v14  ;;  %v1468_v29 = vadd.f32 -5.0, %v1148_v15  ;;  %v1150_v30 = vmul.f32 3.5, %v830_v17  ;;  %v832_v32 = vadd.f32 1.0, %v4869_v9  ;;  %2754 = vst [vmem:[%s6160_s27 + $0x88] sm:$0xff] %v4875_v19 }
  0x5c   : > { %v4881_v33 = vpop.eup %3315  ;;  %3333 = vpow2.f32 %v1793_v20  ;;  %v1797_v34 = vmul.f32 1.442695, %v1467_v22  ;;  %v1469_v36 = vadd.f32 -5.0, %v1149_v23  ;;  %v1151_v37 = vmul.f32 3.5, %v831_v25  ;;  %v199_v23 = vld [vmem:[%s4801_s5 + $0xb0] sm:$0xff]  ;;  %v200_v25 = vld [vmem:[%s4801_s5 + $0xb8] sm:$0xff] }
  0x5d   : > { %3335 = vpow2.f32 %v1795_v27  ;;  %v1799_v38 = vmul.f32 1.442695, %v1468_v29  ;;  %v1470_v40 = vadd.f32 -5.0, %v1150_v30  ;;  %v1152_v41 = vmul.f32 3.5, %v832_v32  ;;  %v201_v29 = vld [vmem:[%s4801_s5 + $0xc0] sm:$0xff]  ;;  %v202_v32 = vld [vmem:[%s4801_s5 + $0xc8] sm:$0xff] }
  0x5e   : > { %3337 = vpow2.f32 %v1797_v34  ;;  %v1801_v42 = vmul.f32 1.442695, %v1469_v36  ;;  %v1471_v43 = vadd.f32 -5.0, %v1151_v37  ;;  %v833_v45 = vadd.f32 1.0, %v4872_v13  ;;  %v203_v36 = vld [vmem:[%s4801_s5 + $0xd0] sm:$0xff]  ;;  %2755 = vst [vmem:[%s6160_s27 + $0x90] sm:$0xff] %v4878_v26 }
  0x5f   : > { %v3318_v46 = vpop.eup %3317  ;;  %3339 = vpow2.f32 %v1799_v38  ;;  %v1803_v47 = vmul.f32 1.442695, %v1470_v40  ;;  %v1472_v48 = vadd.f32 -5.0, %v1152_v41  ;;  %v834_v50 = vadd.f32 1.0, %v4875_v19  ;;  %v204_v38 = vld [vmem:[%s4801_s5 + $0xd8] sm:$0xff]  ;;  %v205_v41 = vld [vmem:[%s4801_s5 + $0xe0] sm:$0xff] }
  0x60   : > { %v3320_v51 = vpop.eup %3319  ;;  %2417 = vst [vmem:[%s4886_s19] sm:$0xff] %v3318_v46  ;;  %3341 = vpow2.f32 %v1801_v42  ;;  %v1805_v52 = vmul.f32 1.442695, %v1471_v43  ;;  %v1153_v54 = vmul.f32 3.5, %v833_v45  ;;  %v835_v55 = vadd.f32 1.0, %v4878_v26  ;;  %v206_v43 = vld [vmem:[%s4801_s5 + $0xe8] sm:$0xff]  ;;  %v207_v46 = vld [vmem:[%s4801_s5 + $0xf0] sm:$0xff] }
  0x61   : > { %v3322_v56 = vpop.eup %3321  ;;  %2418 = vst [vmem:[%s4886_s19 + $0x8] sm:$0xff] %v3320_v51  ;;  %3343 = vpow2.f32 %v1803_v47  ;;  %v1807_v58 = vmul.f32 1.442695, %v1472_v48  ;;  %v1154_v59 = vmul.f32 3.5, %v834_v50  ;;  %v836_v60 = vadd.f32 1.0, %v4881_v33  ;;  %v208_v48 = vld [vmem:[%s4801_s5 + $0xf8] sm:$0xff] }
  0x62   : > { %v3324_v63 = vpop.eup %3323  ;;  %2419 = vst [vmem:[%s4886_s19 + $0x10] sm:$0xff] %v3322_v56  ;;  %3345 = vpow2.f32 %v1805_v52  ;;  %v1473_v0 = vadd.f32 -5.0, %v1153_v54  ;;  %v1155_v2 = vmul.f32 3.5, %v835_v55  ;;  %v209_v51 = vld [vmem:[%s4801_s5 + $0x100] sm:$0xff]  ;;  %v210_v55 = vld [vmem:[%s4801_s5 + $0x108] sm:$0xff]  ;;  %2756 = vst [vmem:[%s6160_s27 + $0x98] sm:$0xff] %v4881_v33 }
  0x63   : > { %v3326_v4 = vpop.eup %3325  ;;  %2420 = vst [vmem:[%s4886_s19 + $0x18] sm:$0xff] %v3324_v63  ;;  %3347 = vpow2.f32 %v1807_v58  ;;  %v1474_v6 = vadd.f32 -5.0, %v1154_v59  ;;  %v1156_v7 = vmul.f32 3.5, %v836_v60  ;;  %v211_v59 = vld [vmem:[%s4801_s5 + $0x110] sm:$0xff]  ;;  %v212_v63 = vld [vmem:[%s4801_s5 + $0x118] sm:$0xff] }
  0x64   : > { %v3328_v8 = vpop.eup %3327  ;;  %2421 = vst [vmem:[%s4886_s19 + $0x20] sm:$0xff] %v3326_v4  ;;  %v1809_v10 = vmul.f32 1.442695, %v1473_v0  ;;  %v1475_v11 = vadd.f32 -5.0, %v1155_v2  ;;  %3349 = vtanh.f32 %v197_v62 }
  0x65   : > { %v3330_v12 = vpop.eup %3329  ;;  %2422 = vst [vmem:[%s4886_s19 + $0x28] sm:$0xff] %v3328_v8  ;;  %v1811_v14 = vmul.f32 1.442695, %v1474_v6  ;;  %v1476_v15 = vadd.f32 -5.0, %v1156_v7  ;;  %3351 = vtanh.f32 %v198_v3  ;;  %v213_v3 = vld [vmem:[%s4801_s5 + $0x120] sm:$0xff]  ;;  %v214_v7 = vld [vmem:[%s4801_s5 + $0x128] sm:$0xff] }
  0x66   : > { %v3332_v17 = vpop.eup %3331  ;;  %2423 = vst [vmem:[%s4886_s19 + $0x30] sm:$0xff] %v3330_v12  ;;  %3353 = vpow2.f32 %v1809_v10  ;;  %v1813_v20 = vmul.f32 1.442695, %v1475_v11 }
  0x67   : > { %2424 = vst [vmem:[%s4886_s19 + $0x38] sm:$0xff] %v3332_v17  ;;  %3355 = vpow2.f32 %v1811_v14  ;;  %v1815_v22 = vmul.f32 1.442695, %v1476_v15 }
  0x68   : > { %3357 = vpow2.f32 %v1813_v20 }
  0x69   : > { %v3334_v27 = vpop.eup %3333  ;;  %3359 = vpow2.f32 %v1815_v22  ;;  %v215_v22 = vld [vmem:[%s4801_s5 + $0x130] sm:$0xff] }
  0x6a   : > { %v3336_v30 = vpop.eup %3335  ;;  %2425 = vst [vmem:[%s4886_s19 + $0x40] sm:$0xff] %v3334_v27  ;;  %3361 = vtanh.f32 %v199_v23 }
  0x6b   : > { %v3338_v34 = vpop.eup %3337  ;;  %2426 = vst [vmem:[%s4886_s19 + $0x48] sm:$0xff] %v3336_v30  ;;  %3363 = vtanh.f32 %v200_v25 }
  0x6c   : > { %v3340_v37 = vpop.eup %3339  ;;  %2427 = vst [vmem:[%s4886_s19 + $0x50] sm:$0xff] %v3338_v34  ;;  %3365 = vtanh.f32 %v201_v29  ;;  %v216_v29 = vld [vmem:[%s4801_s5 + $0x138] sm:$0xff] }
  0x6d   : > { %v3342_v40 = vpop.eup %3341  ;;  %2428 = vst [vmem:[%s4886_s19 + $0x58] sm:$0xff] %v3340_v37  ;;  %3367 = vtanh.f32 %v202_v32 }
  0x6e   : > { %v3344_v42 = vpop.eup %3343  ;;  %2429 = vst [vmem:[%s4886_s19 + $0x60] sm:$0xff] %v3342_v40  ;;  %3369 = vtanh.f32 %v203_v36 }
  0x6f   : > { %v3346_v45 = vpop.eup %3345  ;;  %2430 = vst [vmem:[%s4886_s19 + $0x68] sm:$0xff] %v3344_v42  ;;  %3371 = vtanh.f32 %v204_v38 }
  0x70   : > { %v3348_v47 = vpop.eup %3347  ;;  %2431 = vst [vmem:[%s4886_s19 + $0x70] sm:$0xff] %v3346_v45  ;;  %3373 = vtanh.f32 %v205_v41 }
  0x71   : > { %v4917_v50 = vpop.eup %3349  ;;  %2432 = vst [vmem:[%s4886_s19 + $0x78] sm:$0xff] %v3348_v47  ;;  %3375 = vtanh.f32 %v206_v43 }
  0x72   : > { %v4921_v52 = vpop.eup %3351  ;;  %v837_v54 = vadd.f32 1.0, %v4917_v50  ;;  %3377 = vtanh.f32 %v207_v46  ;;  %2757 = vst [vmem:[%s6160_s27 + $0xa0] sm:$0xff] %v4917_v50 }
  0x73   : > { %v3354_v56 = vpop.eup %3353  ;;  %v838_v58 = vadd.f32 1.0, %v4921_v52  ;;  %3379 = vtanh.f32 %v208_v48  ;;  %2758 = vst [vmem:[%s6160_s27 + $0xa8] sm:$0xff] %v4921_v52 }
  0x74   : > { %v3356_v60 = vpop.eup %3355  ;;  %2433 = vst [vmem:[%s4886_s19 + $0x80] sm:$0xff] %v3354_v56  ;;  %v1157_v62 = vmul.f32 3.5, %v837_v54  ;;  %3381 = vtanh.f32 %v209_v51 }
  0x75   : > { %v3358_v0 = vpop.eup %3357  ;;  %2434 = vst [vmem:[%s4886_s19 + $0x88] sm:$0xff] %v3356_v60  ;;  %v1158_v2 = vmul.f32 3.5, %v838_v58  ;;  %3383 = vtanh.f32 %v210_v55 }
  0x76   : > { %v3360_v4 = vpop.eup %3359  ;;  %2435 = vst [vmem:[%s4886_s19 + $0x90] sm:$0xff] %v3358_v0  ;;  %v1477_v6 = vadd.f32 -5.0, %v1157_v62  ;;  %3385 = vtanh.f32 %v211_v59 }
  0x77   : > { %v4933_v8 = vpop.eup %3361  ;;  %2436 = vst [vmem:[%s4886_s19 + $0x98] sm:$0xff] %v3360_v4  ;;  %v1478_v10 = vadd.f32 -5.0, %v1158_v2  ;;  %3387 = vtanh.f32 %v212_v63 }
  0x78   : > { %v4936_v11 = vpop.eup %3363  ;;  %v1817_v12 = vmul.f32 1.442695, %v1477_v6  ;;  %v839_v14 = vadd.f32 1.0, %v4933_v8  ;;  %3389 = vtanh.f32 %v213_v3  ;;  %2759 = vst [vmem:[%s6160_s27 + $0xb0] sm:$0xff] %v4933_v8 }
  0x79   : > { %v4939_v15 = vpop.eup %3365  ;;  %v1819_v17 = vmul.f32 1.442695, %v1478_v10  ;;  %v840_v20 = vadd.f32 1.0, %v4936_v11  ;;  %3391 = vtanh.f32 %v214_v7  ;;  %2760 = vst [vmem:[%s6160_s27 + $0xb8] sm:$0xff] %v4936_v11 }
  0x7a   : > { %v4943_v23 = vpop.eup %3367  ;;  %3393 = vpow2.f32 %v1817_v12  ;;  %v1159_v25 = vmul.f32 3.5, %v839_v14  ;;  %v841_v27 = vadd.f32 1.0, %v4939_v15  ;;  %2761 = vst [vmem:[%s6160_s27 + $0xc0] sm:$0xff] %v4939_v15 }
  0x7b   : > { %v4947_v30 = vpop.eup %3369  ;;  %3395 = vpow2.f32 %v1819_v17  ;;  %v1160_v32 = vmul.f32 3.5, %v840_v20  ;;  %v842_v34 = vadd.f32 1.0, %v4943_v23  ;;  %2762 = vst [vmem:[%s6160_s27 + $0xc8] sm:$0xff] %v4943_v23 }
  0x7c   : > { %v4950_v36 = vpop.eup %3371  ;;  %v1479_v37 = vadd.f32 -5.0, %v1159_v25  ;;  %v1161_v38 = vmul.f32 3.5, %v841_v27  ;;  %v843_v40 = vadd.f32 1.0, %v4947_v30  ;;  %3397 = vtanh.f32 %v215_v22  ;;  %2763 = vst [vmem:[%s6160_s27 + $0xd0] sm:$0xff] %v4947_v30 }
  0x7d   : > { %v4953_v41 = vpop.eup %3373  ;;  %v1480_v42 = vadd.f32 -5.0, %v1160_v32  ;;  %v1162_v43 = vmul.f32 3.5, %v842_v34  ;;  %v844_v45 = vadd.f32 1.0, %v4950_v36  ;;  %3399 = vtanh.f32 %v216_v29  ;;  %2764 = vst [vmem:[%s6160_s27 + $0xd8] sm:$0xff] %v4950_v36 }
  0x7e   : > { %v4956_v46 = vpop.eup %3375  ;;  %v1821_v47 = vmul.f32 1.442695, %v1479_v37  ;;  %v1481_v48 = vadd.f32 -5.0, %v1161_v38  ;;  %v1163_v51 = vmul.f32 3.5, %v843_v40  ;;  %v845_v54 = vadd.f32 1.0, %v4953_v41  ;;  %2765 = vst [vmem:[%s6160_s27 + $0xe0] sm:$0xff] %v4953_v41 }
  0x7f   : > { %v4959_v55 = vpop.eup %3377  ;;  %v1823_v56 = vmul.f32 1.442695, %v1480_v42  ;;  %v1482_v58 = vadd.f32 -5.0, %v1162_v43  ;;  %v1164_v59 = vmul.f32 3.5, %v844_v45  ;;  %v846_v60 = vadd.f32 1.0, %v4956_v46  ;;  %2766 = vst [vmem:[%s6160_s27 + $0xe8] sm:$0xff] %v4956_v46 }
  0x80   : > { %v4962_v62 = vpop.eup %3379  ;;  %3401 = vpow2.f32 %v1821_v47  ;;  %v1825_v63 = vmul.f32 1.442695, %v1481_v48  ;;  %v1483_v0 = vadd.f32 -5.0, %v1163_v51  ;;  %v1165_v2 = vmul.f32 3.5, %v845_v54  ;;  %2767 = vst [vmem:[%s6160_s27 + $0xf0] sm:$0xff] %v4959_v55 }
  0x81   : > { %v4964_v3 = vpop.eup %3381  ;;  %3403 = vpow2.f32 %v1823_v56  ;;  %v1827_v4 = vmul.f32 1.442695, %v1482_v58  ;;  %v1484_v6 = vadd.f32 -5.0, %v1164_v59  ;;  %v1166_v7 = vmul.f32 3.5, %v846_v60  ;;  %2768 = vst [vmem:[%s6160_s27 + $0xf8] sm:$0xff] %v4962_v62 }
  0x82   : > { %v4966_v10 = vpop.eup %3383  ;;  %3405 = vpow2.f32 %v1825_v63  ;;  %v1829_v12 = vmul.f32 1.442695, %v1483_v0  ;;  %v1485_v14 = vadd.f32 -5.0, %v1165_v2  ;;  %v847_v17 = vadd.f32 1.0, %v4959_v55  ;;  %2769 = vst [vmem:[%s6160_s27 + $0x100] sm:$0xff] %v4964_v3 }
  0x83   : > { %v4969_v20 = vpop.eup %3385  ;;  %3407 = vpow2.f32 %v1827_v4  ;;  %v1831_v22 = vmul.f32 1.442695, %v1484_v6  ;;  %v1486_v25 = vadd.f32 -5.0, %v1166_v7  ;;  %v848_v27 = vadd.f32 1.0, %v4962_v62  ;;  %2770 = vst [vmem:[%s6160_s27 + $0x108] sm:$0xff] %v4966_v10 }
  0x84   : > { %v4972_v29 = vpop.eup %3387  ;;  %3409 = vpow2.f32 %v1829_v12  ;;  %v1833_v32 = vmul.f32 1.442695, %v1485_v14  ;;  %v1167_v34 = vmul.f32 3.5, %v847_v17  ;;  %v849_v37 = vadd.f32 1.0, %v4964_v3  ;;  %2771 = vst [vmem:[%s6160_s27 + $0x110] sm:$0xff] %v4969_v20 }
  0x85   : > { %v4975_v38 = vpop.eup %3389  ;;  %3411 = vpow2.f32 %v1831_v22  ;;  %v1835_v40 = vmul.f32 1.442695, %v1486_v25  ;;  %v1168_v42 = vmul.f32 3.5, %v848_v27  ;;  %v850_v43 = vadd.f32 1.0, %v4966_v10  ;;  %2772 = vst [vmem:[%s6160_s27 + $0x118] sm:$0xff] %v4972_v29 }
  0x86   : > { %v4978_v45 = vpop.eup %3391  ;;  %3413 = vpow2.f32 %v1833_v32  ;;  %v1487_v47 = vadd.f32 -5.0, %v1167_v34  ;;  %v1169_v48 = vmul.f32 3.5, %v849_v37  ;;  %v851_v51 = vadd.f32 1.0, %v4969_v20  ;;  %2773 = vst [vmem:[%s6160_s27 + $0x120] sm:$0xff] %v4975_v38 }
  0x87   : > { %v3394_v54 = vpop.eup %3393  ;;  %3415 = vpow2.f32 %v1835_v40  ;;  %v1488_v56 = vadd.f32 -5.0, %v1168_v42  ;;  %v1170_v58 = vmul.f32 3.5, %v850_v43  ;;  %v852_v59 = vadd.f32 1.0, %v4972_v29  ;;  %2774 = vst [vmem:[%s6160_s27 + $0x128] sm:$0xff] %v4978_v45 }
  0x88   : > { %v3396_v60 = vpop.eup %3395  ;;  %2437 = vst [vmem:[%s4886_s19 + $0xa0] sm:$0xff] %v3394_v54  ;;  %v1837_v63 = vmul.f32 1.442695, %v1487_v47  ;;  %v1489_v0 = vadd.f32 -5.0, %v1169_v48  ;;  %v1171_v2 = vmul.f32 3.5, %v851_v51  ;;  %v853_v4 = vadd.f32 1.0, %v4975_v38 }
  0x89   : > { %v4984_v6 = vpop.eup %3397  ;;  %2438 = vst [vmem:[%s4886_s19 + $0xa8] sm:$0xff] %v3396_v60  ;;  %v1839_v7 = vmul.f32 1.442695, %v1488_v56  ;;  %v1490_v12 = vadd.f32 -5.0, %v1170_v58  ;;  %v1172_v14 = vmul.f32 3.5, %v852_v59  ;;  %v854_v17 = vadd.f32 1.0, %v4978_v45 }
  0x8a   : > { %v4988_v22 = vpop.eup %3399  ;;  %3417 = vpow2.f32 %v1837_v63  ;;  %v1841_v25 = vmul.f32 1.442695, %v1489_v0  ;;  %v1491_v27 = vadd.f32 -5.0, %v1171_v2  ;;  %v1173_v32 = vmul.f32 3.5, %v853_v4  ;;  %v217_v4 = vld [vmem:[%s4801_s5 + $0x140] sm:$0xff]  ;;  %2775 = vst [vmem:[%s6160_s27 + $0x130] sm:$0xff] %v4984_v6 }
  0x8b   : > { %3419 = vpow2.f32 %v1839_v7  ;;  %v1843_v34 = vmul.f32 1.442695, %v1490_v12  ;;  %v1492_v37 = vadd.f32 -5.0, %v1172_v14  ;;  %v1174_v40 = vmul.f32 3.5, %v854_v17  ;;  %v218_v14 = vld [vmem:[%s4801_s5 + $0x148] sm:$0xff]  ;;  %2776 = vst [vmem:[%s6160_s27 + $0x138] sm:$0xff] %v4988_v22 }
  0x8c   : > { %3421 = vpow2.f32 %v1841_v25  ;;  %v1845_v42 = vmul.f32 1.442695, %v1491_v27  ;;  %v1493_v43 = vadd.f32 -5.0, %v1173_v32  ;;  %v855_v47 = vadd.f32 1.0, %v4984_v6 }
  0x8d   : > { %v3402_v48 = vpop.eup %3401  ;;  %3423 = vpow2.f32 %v1843_v34  ;;  %v1847_v51 = vmul.f32 1.442695, %v1492_v37  ;;  %v1494_v54 = vadd.f32 -5.0, %v1174_v40  ;;  %v856_v56 = vadd.f32 1.0, %v4988_v22  ;;  %v219_v40 = vld [vmem:[%s4801_s5 + $0x150] sm:$0xff] }
  0x8e   : > { %v3404_v58 = vpop.eup %3403  ;;  %2439 = vst [vmem:[%s4886_s19 + $0xb0] sm:$0xff] %v3402_v48  ;;  %3425 = vpow2.f32 %v1845_v42  ;;  %v1849_v59 = vmul.f32 1.442695, %v1493_v43  ;;  %v1175_v60 = vmul.f32 3.5, %v855_v47  ;;  %v220_v43 = vld [vmem:[%s4801_s5 + $0x158] sm:$0xff]  ;;  %v221_v47 = vld [vmem:[%s4801_s5 + $0x160] sm:$0xff] }
  0x8f   : > { %v3406_v63 = vpop.eup %3405  ;;  %2440 = vst [vmem:[%s4886_s19 + $0xb8] sm:$0xff] %v3404_v58  ;;  %3427 = vpow2.f32 %v1847_v51  ;;  %v1851_v0 = vmul.f32 1.442695, %v1494_v54  ;;  %v1176_v2 = vmul.f32 3.5, %v856_v56  ;;  %v222_v48 = vld [vmem:[%s4801_s5 + $0x168] sm:$0xff]  ;;  %v223_v54 = vld [vmem:[%s4801_s5 + $0x170] sm:$0xff] }
  0x90   : > { %v3408_v7 = vpop.eup %3407  ;;  %2441 = vst [vmem:[%s4886_s19 + $0xc0] sm:$0xff] %v3406_v63  ;;  %3429 = vpow2.f32 %v1849_v59  ;;  %v1495_v12 = vadd.f32 -5.0, %v1175_v60  ;;  %v224_v58 = vld [vmem:[%s4801_s5 + $0x178] sm:$0xff]  ;;  %v225_v60 = vld [vmem:[%s4801_s5 + $0x180] sm:$0xff] }
  0x91   : > { %v3410_v17 = vpop.eup %3409  ;;  %2442 = vst [vmem:[%s4886_s19 + $0xc8] sm:$0xff] %v3408_v7  ;;  %3431 = vpow2.f32 %v1851_v0  ;;  %v1496_v25 = vadd.f32 -5.0, %v1176_v2  ;;  %v226_v0 = vld [vmem:[%s4801_s5 + $0x188] sm:$0xff] }
  0x92   : > { %v3412_v27 = vpop.eup %3411  ;;  %2443 = vst [vmem:[%s4886_s19 + $0xd0] sm:$0xff] %v3410_v17  ;;  %v1853_v32 = vmul.f32 1.442695, %v1495_v12  ;;  %3433 = vtanh.f32 %v217_v4  ;;  %v227_v4 = vld [vmem:[%s4801_s5 + $0x190] sm:$0xff]  ;;  %v228_v12 = vld [vmem:[%s4801_s5 + $0x198] sm:$0xff]  ;;  %v229_v17 = vld [vmem:[%s4801_s5 + $0x1a0] sm:$0xff] }
  0x93   : > { %v3414_v34 = vpop.eup %3413  ;;  %2444 = vst [vmem:[%s4886_s19 + $0xd8] sm:$0xff] %v3412_v27  ;;  %v1855_v37 = vmul.f32 1.442695, %v1496_v25  ;;  %3435 = vtanh.f32 %v218_v14  ;;  %v230_v27 = vld [vmem:[%s4801_s5 + $0x1a8] sm:$0xff] }
  0x94   : > { %v3416_v42 = vpop.eup %3415  ;;  %2445 = vst [vmem:[%s4886_s19 + $0xe0] sm:$0xff] %v3414_v34  ;;  %3437 = vpow2.f32 %v1853_v32  ;;  %v231_v34 = vld [vmem:[%s4801_s5 + $0x1b0] sm:$0xff] }
  0x95   : > { %2446 = vst [vmem:[%s4886_s19 + $0xe8] sm:$0xff] %v3416_v42  ;;  %3439 = vpow2.f32 %v1855_v37  ;;  %v232_v42 = vld [vmem:[%s4801_s5 + $0x1b8] sm:$0xff] }
  0x96   : > { %3441 = vtanh.f32 %v219_v40 }
  0x97   : > { %v3418_v51 = vpop.eup %3417  ;;  %3443 = vtanh.f32 %v220_v43 }
  0x98   : > { %v3420_v56 = vpop.eup %3419  ;;  %2447 = vst [vmem:[%s4886_s19 + $0xf0] sm:$0xff] %v3418_v51  ;;  %3445 = vtanh.f32 %v221_v47 }
  0x99   : > { %v3422_v59 = vpop.eup %3421  ;;  %2448 = vst [vmem:[%s4886_s19 + $0xf8] sm:$0xff] %v3420_v56  ;;  %3447 = vtanh.f32 %v222_v48  ;;  %v233_v48 = vld [vmem:[%s4801_s5 + $0x1c0] sm:$0xff]  ;;  %v234_v56 = vld [vmem:[%s4801_s5 + $0x1c8] sm:$0xff] }
  0x9a   : > { %v3424_v63 = vpop.eup %3423  ;;  %2449 = vst [vmem:[%s4886_s19 + $0x100] sm:$0xff] %v3422_v59  ;;  %3449 = vtanh.f32 %v223_v54 }
  0x9b   : > { %v3426_v2 = vpop.eup %3425  ;;  %2450 = vst [vmem:[%s4886_s19 + $0x108] sm:$0xff] %v3424_v63  ;;  %3451 = vtanh.f32 %v224_v58 }
  0x9c   : > { %v3428_v7 = vpop.eup %3427  ;;  %2451 = vst [vmem:[%s4886_s19 + $0x110] sm:$0xff] %v3426_v2  ;;  %3453 = vtanh.f32 %v225_v60  ;;  %v235_v60 = vld [vmem:[%s4801_s5 + $0x1d0] sm:$0xff] }
  0x9d   : > { %v3430_v14 = vpop.eup %3429  ;;  %2452 = vst [vmem:[%s4886_s19 + $0x118] sm:$0xff] %v3428_v7  ;;  %3455 = vtanh.f32 %v226_v0 }
  0x9e   : > { %v3432_v25 = vpop.eup %3431  ;;  %2453 = vst [vmem:[%s4886_s19 + $0x120] sm:$0xff] %v3430_v14  ;;  %3457 = vtanh.f32 %v227_v4  ;;  %v236_v4 = vld [vmem:[%s4801_s5 + $0x1d8] sm:$0xff] }
  0x9f   : > { %v5021_v32 = vpop.eup %3433  ;;  %2454 = vst [vmem:[%s4886_s19 + $0x128] sm:$0xff] %v3432_v25  ;;  %3459 = vtanh.f32 %v228_v12 }
  0xa0   : > { %7170 = vst [vmem:[#allocation11_spill] sm:$0xff] %v5021_v32  ;;  %v5025_v37 = vpop.eup %3435  ;;  %v857_v40 = vadd.f32 1.0, %v5021_v32  ;;  %3461 = vtanh.f32 %v229_v17 }
  0xa1   : > { %7171 = vst [vmem:[#allocation12_spill] sm:$0xff] %v5025_v37  ;;  %v3438_v43 = vpop.eup %3437  ;;  %v858_v47 = vadd.f32 1.0, %v5025_v37  ;;  %3463 = vtanh.f32 %v230_v27 }
  0xa2   : > { %v3440_v51 = vpop.eup %3439  ;;  %2455 = vst [vmem:[%s4886_s19 + $0x130] sm:$0xff] %v3438_v43  ;;  %v1177_v54 = vmul.f32 3.5, %v857_v40  ;;  %3465 = vtanh.f32 %v231_v34 }
  0xa3   : > { %v5033_v58 = vpop.eup %3441  ;;  %2456 = vst [vmem:[%s4886_s19 + $0x138] sm:$0xff] %v3440_v51  ;;  %v1178_v59 = vmul.f32 3.5, %v858_v47  ;;  %3467 = vtanh.f32 %v232_v42 }
  0xa4   : > { %7172 = vst [vmem:[#allocation13_spill] sm:$0xff] %v5033_v58  ;;  %v5037_v63 = vpop.eup %3443  ;;  %v1497_v0 = vadd.f32 -5.0, %v1177_v54  ;;  %v859_v2 = vadd.f32 1.0, %v5033_v58  ;;  %3469 = vtanh.f32 %v233_v48 }
  0xa5   : > { %7173 = vst [vmem:[#allocation14_spill] sm:$0xff] %v5037_v63  ;;  %v5041_v7 = vpop.eup %3445  ;;  %v1498_v12 = vadd.f32 -5.0, %v1178_v59  ;;  %v860_v14 = vadd.f32 1.0, %v5037_v63  ;;  %3471 = vtanh.f32 %v234_v56 }
  0xa6   : > { %7174 = vst [vmem:[#allocation15_spill] sm:$0xff] %v5041_v7  ;;  %v5044_v17 = vpop.eup %3447  ;;  %v1857_v25 = vmul.f32 1.442695, %v1497_v0  ;;  %v1179_v27 = vmul.f32 3.5, %v859_v2  ;;  %v861_v34 = vadd.f32 1.0, %v5041_v7  ;;  %3473 = vtanh.f32 %v235_v60 }
  0xa7   : > { %7175 = vst [vmem:[#allocation16_spill] sm:$0xff] %v5044_v17  ;;  %v5047_v40 = vpop.eup %3449  ;;  %v1859_v42 = vmul.f32 1.442695, %v1498_v12  ;;  %v1180_v43 = vmul.f32 3.5, %v860_v14  ;;  %v862_v47 = vadd.f32 1.0, %v5044_v17  ;;  %3475 = vtanh.f32 %v236_v4  ;;  %v7386_v16 = vld [vmem:[#allocation11_spill] sm:$0xff] }
  0xa8   : > { %7176 = vst [vmem:[#allocation17_spill] sm:$0xff] %v5047_v40  ;;  %v5050_v48 = vpop.eup %3451  ;;  %3477 = vpow2.f32 %v1857_v25  ;;  %v1499_v51 = vadd.f32 -5.0, %v1179_v27  ;;  %v1181_v54 = vmul.f32 3.5, %v861_v34  ;;  %v863_v56 = vadd.f32 1.0, %v5047_v40  ;;  %2777 = vst [vmem:[%s6160_s27 + $0x140] sm:$0xff] %v7386_v16  ;;  %v7387_v18 = vld [vmem:[#allocation12_spill] sm:$0xff] }
  0xa9   : > { %7177 = vst [vmem:[#allocation18_spill] sm:$0xff] %v5050_v48  ;;  %v5053_v59 = vpop.eup %3453  ;;  %3479 = vpow2.f32 %v1859_v42  ;;  %v1500_v0 = vadd.f32 -5.0, %v1180_v43  ;;  %v1182_v2 = vmul.f32 3.5, %v862_v47  ;;  %v864_v60 = vadd.f32 1.0, %v5050_v48  ;;  %2778 = vst [vmem:[%s6160_s27 + $0x148] sm:$0xff] %v7387_v18 }
  0xaa   : > { %7178 = vst [vmem:[#allocation19_spill] sm:$0xff] %v5053_v59  ;;  %v5056_v7 = vpop.eup %3455  ;;  %v1861_v12 = vmul.f32 1.442695, %v1499_v51  ;;  %v1501_v14 = vadd.f32 -5.0, %v1181_v54  ;;  %v1183_v17 = vmul.f32 3.5, %v863_v56  ;;  %v865_v4 = vadd.f32 1.0, %v5053_v59 }
  0xab   : > { %7179 = vst [vmem:[#allocation20_spill] sm:$0xff] %v5056_v7  ;;  %v5059_v63 = vpop.eup %3457  ;;  %v1863_v25 = vmul.f32 1.442695, %v1500_v0  ;;  %v1502_v27 = vadd.f32 -5.0, %v1182_v2  ;;  %v1184_v34 = vmul.f32 3.5, %v864_v60  ;;  %v866_v40 = vadd.f32 1.0, %v5056_v7 }
  0xac   : > { %7180 = vst [vmem:[#allocation21_spill] sm:$0xff] %v5059_v63  ;;  %v5062_v58 = vpop.eup %3459  ;;  %3481 = vpow2.f32 %v1861_v12  ;;  %v1865_v42 = vmul.f32 1.442695, %v1501_v14  ;;  %v1503_v43 = vadd.f32 -5.0, %v1183_v17  ;;  %v1185_v47 = vmul.f32 3.5, %v865_v4  ;;  %v7388_v21 = vld [vmem:[#allocation13_spill] sm:$0xff] }
  0xad   : > { %7181 = vst [vmem:[#allocation22_spill] sm:$0xff] %v5062_v58  ;;  %v5064_v48 = vpop.eup %3461  ;;  %3483 = vpow2.f32 %v1863_v25  ;;  %v1867_v51 = vmul.f32 1.442695, %v1502_v27  ;;  %v1504_v54 = vadd.f32 -5.0, %v1184_v34  ;;  %v1186_v56 = vmul.f32 3.5, %v866_v40  ;;  %2779 = vst [vmem:[%s6160_s27 + $0x150] sm:$0xff] %v7388_v21 }
  0xae   : > { %7182 = vst [vmem:[#allocation23_spill] sm:$0xff] %v5064_v48  ;;  %v5066_v59 = vpop.eup %3463  ;;  %3485 = vpow2.f32 %v1865_v42  ;;  %v1869_v0 = vmul.f32 1.442695, %v1503_v43  ;;  %v1505_v2 = vadd.f32 -5.0, %v1185_v47  ;;  %v867_v60 = vadd.f32 1.0, %v5059_v63  ;;  %v7389_v24 = vld [vmem:[#allocation14_spill] sm:$0xff] }
  0xaf   : > { %7183 = vst [vmem:[#allocation24_spill] sm:$0xff] %v5066_v59  ;;  %v5069_v7 = vpop.eup %3465  ;;  %3487 = vpow2.f32 %v1867_v51  ;;  %v1871_v12 = vmul.f32 1.442695, %v1504_v54  ;;  %v1506_v14 = vadd.f32 -5.0, %v1186_v56  ;;  %v868_v17 = vadd.f32 1.0, %v5062_v58  ;;  %2780 = vst [vmem:[%s6160_s27 + $0x158] sm:$0xff] %v7389_v24 }
  0xb0   : > { %7184 = vst [vmem:[#allocation25_spill] sm:$0xff] %v5069_v7  ;;  %v5072_v4 = vpop.eup %3467  ;;  %3489 = vpow2.f32 %v1869_v0  ;;  %v1873_v25 = vmul.f32 1.442695, %v1505_v2  ;;  %v1187_v27 = vmul.f32 3.5, %v867_v60  ;;  %v869_v40 = vadd.f32 1.0, %v5064_v48  ;;  %v7390_v28 = vld [vmem:[#allocation15_spill] sm:$0xff] }
  0xb1   : > { %7185 = vst [vmem:[#allocation26_spill] sm:$0xff] %v5072_v4  ;;  %v5075_v34 = vpop.eup %3469  ;;  %3491 = vpow2.f32 %v1871_v12  ;;  %v1875_v42 = vmul.f32 1.442695, %v1506_v14  ;;  %v1188_v43 = vmul.f32 3.5, %v868_v17  ;;  %v870_v47 = vadd.f32 1.0, %v5066_v59  ;;  %2781 = vst [vmem:[%s6160_s27 + $0x160] sm:$0xff] %v7390_v28 }
  0xb2   : > { %7186 = vst [vmem:[#allocation27_spill] sm:$0xff] %v5075_v34  ;;  %v5078_v63 = vpop.eup %3471  ;;  %3493 = vpow2.f32 %v1873_v25  ;;  %v1507_v51 = vadd.f32 -5.0, %v1187_v27  ;;  %v1189_v54 = vmul.f32 3.5, %v869_v40  ;;  %v871_v56 = vadd.f32 1.0, %v5069_v7  ;;  %v7391_v31 = vld [vmem:[#allocation16_spill] sm:$0xff]  ;;  %v7392_v35 = vld [vmem:[#allocation17_spill] sm:$0xff] }
  0xb3   : > { %7187 = vst [vmem:[#allocation28_spill] sm:$0xff] %v5078_v63  ;;  %v5081_v58 = vpop.eup %3473  ;;  %3495 = vpow2.f32 %v1875_v42  ;;  %v1508_v0 = vadd.f32 -5.0, %v1188_v43  ;;  %v1190_v2 = vmul.f32 3.5, %v870_v47  ;;  %v872_v60 = vadd.f32 1.0, %v5072_v4  ;;  %2782 = vst [vmem:[%s6160_s27 + $0x168] sm:$0xff] %v7391_v31  ;;  %v7393_v39 = vld [vmem:[#allocation18_spill] sm:$0xff] }
  0xb4   : > { %7188 = vst [vmem:[#allocation29_spill] sm:$0xff] %v5081_v58  ;;  %v5084_v12 = vpop.eup %3475  ;;  %v1877_v14 = vmul.f32 1.442695, %v1507_v51  ;;  %v1509_v17 = vadd.f32 -5.0, %v1189_v54  ;;  %v1191_v59 = vmul.f32 3.5, %v871_v56  ;;  %v873_v25 = vadd.f32 1.0, %v5075_v34 }
  0xb5   : > { %7189 = vst [vmem:[#allocation30_spill] sm:$0xff] %v5084_v12  ;;  %v3478_v27 = vpop.eup %3477  ;;  %v1879_v40 = vmul.f32 1.442695, %v1508_v0  ;;  %v1510_v48 = vadd.f32 -5.0, %v1190_v2  ;;  %v1192_v7 = vmul.f32 3.5, %v872_v60  ;;  %v874_v37 = vadd.f32 1.0, %v5078_v63 }
  0xb6   : > { %v3480_v32 = vpop.eup %3479  ;;  %2457 = vst [vmem:[%s4886_s19 + $0x140] sm:$0xff] %v3478_v27  ;;  %3497 = vpow2.f32 %v1877_v14  ;;  %v1881_v42 = vmul.f32 1.442695, %v1509_v17  ;;  %v1511_v43 = vadd.f32 -5.0, %v1191_v59  ;;  %v1193_v47 = vmul.f32 3.5, %v873_v25  ;;  %2783 = vst [vmem:[%s6160_s27 + $0x170] sm:$0xff] %v7392_v35 }
  0xb7   : > { %2458 = vst [vmem:[%s4886_s19 + $0x148] sm:$0xff] %v3480_v32  ;;  %3499 = vpow2.f32 %v1879_v40  ;;  %v1883_v51 = vmul.f32 1.442695, %v1510_v48  ;;  %v1512_v54 = vadd.f32 -5.0, %v1192_v7  ;;  %v1194_v56 = vmul.f32 3.5, %v874_v37  ;;  %v237_v40 = vld [vmem:[%s4801_s5 + $0x1e0] sm:$0xff] }
  0xb8   : > { %3501 = vpow2.f32 %v1881_v42  ;;  %v1885_v34 = vmul.f32 1.442695, %v1511_v43  ;;  %v1513_v0 = vadd.f32 -5.0, %v1193_v47  ;;  %v875_v2 = vadd.f32 1.0, %v5081_v58  ;;  %v238_v47 = vld [vmem:[%s4801_s5 + $0x1e8] sm:$0xff]  ;;  %2784 = vst [vmem:[%s6160_s27 + $0x178] sm:$0xff] %v7393_v39 }
  0xb9   : > { %v3482_v60 = vpop.eup %3481  ;;  %3503 = vpow2.f32 %v1883_v51  ;;  %v1887_v14 = vmul.f32 1.442695, %v1512_v54  ;;  %v1514_v17 = vadd.f32 -5.0, %v1194_v56  ;;  %v876_v59 = vadd.f32 1.0, %v5084_v12  ;;  %v7394_v44 = vld [vmem:[#allocation19_spill] sm:$0xff]  ;;  %v7395_v49 = vld [vmem:[#allocation20_spill] sm:$0xff] }
  0xba   : > { %v3484_v32 = vpop.eup %3483  ;;  %2459 = vst [vmem:[%s4886_s19 + $0x150] sm:$0xff] %v3482_v60  ;;  %3505 = vpow2.f32 %v1885_v34  ;;  %v1889_v37 = vmul.f32 1.442695, %v1513_v0  ;;  %v1195_v7 = vmul.f32 3.5, %v875_v2  ;;  %v239_v60 = vld [vmem:[%s4801_s5 + $0x1f0] sm:$0xff]  ;;  %2785 = vst [vmem:[%s6160_s27 + $0x180] sm:$0xff] %v7394_v44 }
  0xbb   : > { %v3486_v48 = vpop.eup %3485  ;;  %2460 = vst [vmem:[%s4886_s19 + $0x158] sm:$0xff] %v3484_v32  ;;  %3507 = vpow2.f32 %v1887_v14  ;;  %v1891_v25 = vmul.f32 1.442695, %v1514_v17  ;;  %v1196_v27 = vmul.f32 3.5, %v876_v59  ;;  %v240_v17 = vld [vmem:[%s4801_s5 + $0x1f8] sm:$0xff]  ;;  %v241_v59 = vld [vmem:[%s4801_s5 + $0x200] sm:$0xff] }
  0xbc   : > { %v3488_v42 = vpop.eup %3487  ;;  %2461 = vst [vmem:[%s4886_s19 + $0x160] sm:$0xff] %v3486_v48  ;;  %3509 = vpow2.f32 %v1889_v37  ;;  %v1515_v43 = vadd.f32 -5.0, %v1195_v7  ;;  %v242_v32 = vld [vmem:[%s4801_s5 + $0x208] sm:$0xff]  ;;  %v243_v7 = vld [vmem:[%s4801_s5 + $0x210] sm:$0xff]  ;;  %2786 = vst [vmem:[%s6160_s27 + $0x188] sm:$0xff] %v7395_v49 }
  0xbd   : > { %v3490_v51 = vpop.eup %3489  ;;  %2462 = vst [vmem:[%s4886_s19 + $0x168] sm:$0xff] %v3488_v42  ;;  %3511 = vpow2.f32 %v1891_v25  ;;  %v1516_v34 = vadd.f32 -5.0, %v1196_v27  ;;  %v244_v25 = vld [vmem:[%s4801_s5 + $0x218] sm:$0xff]  ;;  %v7396_v53 = vld [vmem:[#allocation21_spill] sm:$0xff]  ;;  %v7398_v61 = vld [vmem:[#allocation23_spill] sm:$0xff] }
  0xbe   : > { %v3492_v54 = vpop.eup %3491  ;;  %2463 = vst [vmem:[%s4886_s19 + $0x170] sm:$0xff] %v3490_v51  ;;  %v1893_v56 = vmul.f32 1.442695, %v1515_v43  ;;  %3513 = vtanh.f32 %v237_v40  ;;  %v245_v40 = vld [vmem:[%s4801_s5 + $0x220] sm:$0xff]  ;;  %v246_v43 = vld [vmem:[%s4801_s5 + $0x228] sm:$0xff]  ;;  %v247_v51 = vld [vmem:[%s4801_s5 + $0x230] sm:$0xff] }
  0xbf   : > { %v3494_v0 = vpop.eup %3493  ;;  %2464 = vst [vmem:[%s4886_s19 + $0x178] sm:$0xff] %v3492_v54  ;;  %v1895_v2 = vmul.f32 1.442695, %v1516_v34  ;;  %3515 = vtanh.f32 %v238_v47  ;;  %v248_v54 = vld [vmem:[%s4801_s5 + $0x238] sm:$0xff]  ;;  %2787 = vst [vmem:[%s6160_s27 + $0x190] sm:$0xff] %v7396_v53  ;;  %v7399_v1 = vld [vmem:[#allocation24_spill] sm:$0xff] }
  0xc0   : > { %v3496_v14 = vpop.eup %3495  ;;  %2465 = vst [vmem:[%s4886_s19 + $0x180] sm:$0xff] %v3494_v0  ;;  %3517 = vpow2.f32 %v1893_v56  ;;  %v249_v0 = vld [vmem:[%s4801_s5 + $0x240] sm:$0xff]  ;;  %v7397_v57 = vld [vmem:[#allocation22_spill] sm:$0xff]  ;;  %2789 = vst [vmem:[%s6160_s27 + $0x1a0] sm:$0xff] %v7398_v61 }
  0xc1   : > { %2466 = vst [vmem:[%s4886_s19 + $0x188] sm:$0xff] %v3496_v14  ;;  %3519 = vpow2.f32 %v1895_v2  ;;  %2788 = vst [vmem:[%s6160_s27 + $0x198] sm:$0xff] %v7397_v57  ;;  %v7400_v5 = vld [vmem:[#allocation25_spill] sm:$0xff]  ;;  %v7401_v9 = vld [vmem:[#allocation26_spill] sm:$0xff] }
  0xc2   : > { %3521 = vtanh.f32 %v239_v60  ;;  %v250_v60 = vld [vmem:[%s4801_s5 + $0x248] sm:$0xff]  ;;  %2790 = vst [vmem:[%s6160_s27 + $0x1a8] sm:$0xff] %v7399_v1  ;;  %2791 = vst [vmem:[%s6160_s27 + $0x1b0] sm:$0xff] %v7400_v5  ;;  %v7402_v13 = vld [vmem:[#allocation27_spill] sm:$0xff] }
  0xc3   : > { %v3498_v37 = vpop.eup %3497  ;;  %3523 = vtanh.f32 %v240_v17  ;;  %v251_v17 = vld [vmem:[%s4801_s5 + $0x250] sm:$0xff]  ;;  %2792 = vst [vmem:[%s6160_s27 + $0x1b8] sm:$0xff] %v7401_v9  ;;  %2793 = vst [vmem:[%s6160_s27 + $0x1c0] sm:$0xff] %v7402_v13  ;;  %v7403_v19 = vld [vmem:[#allocation28_spill] sm:$0xff] }
  0xc4   : > { %v3500_v48 = vpop.eup %3499  ;;  %2467 = vst [vmem:[%s4886_s19 + $0x190] sm:$0xff] %v3498_v37  ;;  %3525 = vtanh.f32 %v241_v59  ;;  %v252_v37 = vld [vmem:[%s4801_s5 + $0x258] sm:$0xff]  ;;  %2794 = vst [vmem:[%s6160_s27 + $0x1c8] sm:$0xff] %v7403_v19  ;;  %v7404_v26 = vld [vmem:[#allocation29_spill] sm:$0xff] }
  0xc5   : > { %v3502_v27 = vpop.eup %3501  ;;  %2468 = vst [vmem:[%s4886_s19 + $0x198] sm:$0xff] %v3500_v48  ;;  %3527 = vtanh.f32 %v242_v32  ;;  %2795 = vst [vmem:[%s6160_s27 + $0x1d0] sm:$0xff] %v7404_v26  ;;  %v7405_v33 = vld [vmem:[#allocation30_spill] sm:$0xff] }
  0xc6   : > { %v3504_v42 = vpop.eup %3503  ;;  %2469 = vst [vmem:[%s4886_s19 + $0x1a0] sm:$0xff] %v3502_v27  ;;  %3529 = vtanh.f32 %v243_v7  ;;  %2796 = vst [vmem:[%s6160_s27 + $0x1d8] sm:$0xff] %v7405_v33 }
  0xc7   : > { %v3506_v47 = vpop.eup %3505  ;;  %2470 = vst [vmem:[%s4886_s19 + $0x1a8] sm:$0xff] %v3504_v42  ;;  %3531 = vtanh.f32 %v244_v25  ;;  %v253_v25 = vld [vmem:[%s4801_s5 + $0x260] sm:$0xff]  ;;  %v254_v42 = vld [vmem:[%s4801_s5 + $0x268] sm:$0xff] }
  0xc8   : > { %v3508_v34 = vpop.eup %3507  ;;  %2471 = vst [vmem:[%s4886_s19 + $0x1b0] sm:$0xff] %v3506_v47  ;;  %3533 = vtanh.f32 %v245_v40 }
  0xc9   : > { %v3510_v56 = vpop.eup %3509  ;;  %2472 = vst [vmem:[%s4886_s19 + $0x1b8] sm:$0xff] %v3508_v34  ;;  %3535 = vtanh.f32 %v246_v43 }
  0xca   : > { %v3512_v2 = vpop.eup %3511  ;;  %2473 = vst [vmem:[%s4886_s19 + $0x1c0] sm:$0xff] %v3510_v56  ;;  %3537 = vtanh.f32 %v247_v51  ;;  %v255_v51 = vld [vmem:[%s4801_s5 + $0x270] sm:$0xff] }
  0xcb   : > { %v5121_v14 = vpop.eup %3513  ;;  %2474 = vst [vmem:[%s4886_s19 + $0x1c8] sm:$0xff] %v3512_v2  ;;  %3539 = vtanh.f32 %v248_v54 }
  0xcc   : > { %7190 = vst [vmem:[#allocation31_spill] sm:$0xff] %v5121_v14  ;;  %v5125_v59 = vpop.eup %3515  ;;  %v877_v32 = vadd.f32 1.0, %v5121_v14  ;;  %3541 = vtanh.f32 %v249_v0  ;;  %v256_v0 = vld [vmem:[%s4801_s5 + $0x278] sm:$0xff] }
  0xcd   : > { %7191 = vst [vmem:[#allocation32_spill] sm:$0xff] %v5125_v59  ;;  %v3518_v7 = vpop.eup %3517  ;;  %v878_v48 = vadd.f32 1.0, %v5125_v59  ;;  %3543 = vtanh.f32 %v250_v60 }
  0xce   : > { %v3520_v27 = vpop.eup %3519  ;;  %2475 = vst [vmem:[%s4886_s19 + $0x1d0] sm:$0xff] %v3518_v7  ;;  %v1197_v40 = vmul.f32 3.5, %v877_v32  ;;  %3545 = vtanh.f32 %v251_v17 }
  0xcf   : > { %v5133_v43 = vpop.eup %3521  ;;  %2476 = vst [vmem:[%s4886_s19 + $0x1d8] sm:$0xff] %v3520_v27  ;;  %v1198_v47 = vmul.f32 3.5, %v878_v48  ;;  %3547 = vtanh.f32 %v252_v37 }
  0xd0   : > { %7192 = vst [vmem:[#allocation33_spill] sm:$0xff] %v5133_v43  ;;  %v5137_v34 = vpop.eup %3523  ;;  %v1517_v54 = vadd.f32 -5.0, %v1197_v40  ;;  %v879_v56 = vadd.f32 1.0, %v5133_v43  ;;  %3549 = vtanh.f32 %v253_v25 }
  0xd1   : > { %7193 = vst [vmem:[#allocation34_spill] sm:$0xff] %v5137_v34  ;;  %v5141_v2 = vpop.eup %3525  ;;  %v1518_v60 = vadd.f32 -5.0, %v1198_v47  ;;  %v880_v32 = vadd.f32 1.0, %v5137_v34  ;;  %3551 = vtanh.f32 %v254_v42 }
  0xd2   : > { %7194 = vst [vmem:[#allocation35_spill] sm:$0xff] %v5141_v2  ;;  %v5144_v17 = vpop.eup %3527  ;;  %v1897_v7 = vmul.f32 1.442695, %v1517_v54  ;;  %v1199_v27 = vmul.f32 3.5, %v879_v56  ;;  %v881_v37 = vadd.f32 1.0, %v5141_v2  ;;  %3553 = vtanh.f32 %v255_v51 }
  0xd3   : > { %7195 = vst [vmem:[#allocation36_spill] sm:$0xff] %v5144_v17  ;;  %v5147_v48 = vpop.eup %3529  ;;  %v1899_v40 = vmul.f32 1.442695, %v1518_v60  ;;  %v1200_v59 = vmul.f32 3.5, %v880_v32  ;;  %v882_v25 = vadd.f32 1.0, %v5144_v17  ;;  %3555 = vtanh.f32 %v256_v0  ;;  %v7406_v50 = vld [vmem:[#allocation31_spill] sm:$0xff] }
  0xd4   : > { %7196 = vst [vmem:[#allocation37_spill] sm:$0xff] %v5147_v48  ;;  %v5150_v43 = vpop.eup %3531  ;;  %3557 = vpow2.f32 %v1897_v7  ;;  %v1519_v47 = vadd.f32 -5.0, %v1199_v27  ;;  %v1201_v34 = vmul.f32 3.5, %v881_v37  ;;  %v883_v42 = vadd.f32 1.0, %v5147_v48  ;;  %2797 = vst [vmem:[%s6160_s27 + $0x1e0] sm:$0xff] %v7406_v50  ;;  %v7407_v52 = vld [vmem:[#allocation32_spill] sm:$0xff] }
  0xd5   : > { %7197 = vst [vmem:[#allocation38_spill] sm:$0xff] %v5150_v43  ;;  %v5153_v14 = vpop.eup %3533  ;;  %3559 = vpow2.f32 %v1899_v40  ;;  %v1520_v54 = vadd.f32 -5.0, %v1200_v59  ;;  %v1202_v56 = vmul.f32 3.5, %v882_v25  ;;  %v884_v51 = vadd.f32 1.0, %v5150_v43  ;;  %2798 = vst [vmem:[%s6160_s27 + $0x1e8] sm:$0xff] %v7407_v52 }
  0xd6   : > { %7198 = vst [vmem:[#allocation39_spill] sm:$0xff] %v5153_v14  ;;  %v5156_v2 = vpop.eup %3535  ;;  %v1901_v60 = vmul.f32 1.442695, %v1519_v47  ;;  %v1521_v32 = vadd.f32 -5.0, %v1201_v34  ;;  %v1203_v17 = vmul.f32 3.5, %v883_v42  ;;  %v885_v0 = vadd.f32 1.0, %v5153_v14 }
  0xd7   : > { %7199 = vst [vmem:[#allocation40_spill] sm:$0xff] %v5156_v2  ;;  %v5159_v12 = vpop.eup %3537  ;;  %v1903_v7 = vmul.f32 1.442695, %v1520_v54  ;;  %v1522_v27 = vadd.f32 -5.0, %v1202_v56  ;;  %v1204_v37 = vmul.f32 3.5, %v884_v51  ;;  %v886_v48 = vadd.f32 1.0, %v5156_v2 }
  0xd8   : > { %7200 = vst [vmem:[#allocation41_spill] sm:$0xff] %v5159_v12  ;;  %v5162_v58 = vpop.eup %3539  ;;  %3561 = vpow2.f32 %v1901_v60  ;;  %v1905_v59 = vmul.f32 1.442695, %v1521_v32  ;;  %v1523_v40 = vadd.f32 -5.0, %v1203_v17  ;;  %v1205_v25 = vmul.f32 3.5, %v885_v0  ;;  %v7408_v8 = vld [vmem:[#allocation33_spill] sm:$0xff] }
  0xd9   : > { %7201 = vst [vmem:[#allocation42_spill] sm:$0xff] %v5162_v58  ;;  %v5164_v43 = vpop.eup %3541  ;;  %3563 = vpow2.f32 %v1903_v7  ;;  %v1907_v34 = vmul.f32 1.442695, %v1522_v27  ;;  %v1524_v47 = vadd.f32 -5.0, %v1204_v37  ;;  %v1206_v42 = vmul.f32 3.5, %v886_v48  ;;  %2799 = vst [vmem:[%s6160_s27 + $0x1f0] sm:$0xff] %v7408_v8 }
  0xda   : > { %7202 = vst [vmem:[#allocation43_spill] sm:$0xff] %v5164_v43  ;;  %v5166_v14 = vpop.eup %3543  ;;  %3565 = vpow2.f32 %v1905_v59  ;;  %v1909_v54 = vmul.f32 1.442695, %v1523_v40  ;;  %v1525_v56 = vadd.f32 -5.0, %v1205_v25  ;;  %v887_v51 = vadd.f32 1.0, %v5159_v12  ;;  %v7409_v11 = vld [vmem:[#allocation34_spill] sm:$0xff] }
  0xdb   : > { %7203 = vst [vmem:[#allocation44_spill] sm:$0xff] %v5166_v14  ;;  %v5169_v2 = vpop.eup %3545  ;;  %3567 = vpow2.f32 %v1907_v34  ;;  %v1911_v60 = vmul.f32 1.442695, %v1524_v47  ;;  %v1526_v32 = vadd.f32 -5.0, %v1206_v42  ;;  %v888_v17 = vadd.f32 1.0, %v5162_v58  ;;  %2800 = vst [vmem:[%s6160_s27 + $0x1f8] sm:$0xff] %v7409_v11 }
  0xdc   : > { %7204 = vst [vmem:[#allocation45_spill] sm:$0xff] %v5169_v2  ;;  %v5172_v0 = vpop.eup %3547  ;;  %3569 = vpow2.f32 %v1909_v54  ;;  %v1913_v7 = vmul.f32 1.442695, %v1525_v56  ;;  %v1207_v27 = vmul.f32 3.5, %v887_v51  ;;  %v889_v48 = vadd.f32 1.0, %v5164_v43  ;;  %v7410_v15 = vld [vmem:[#allocation35_spill] sm:$0xff] }
  0xdd   : > { %7205 = vst [vmem:[#allocation46_spill] sm:$0xff] %v5172_v0  ;;  %v5175_v37 = vpop.eup %3549  ;;  %3571 = vpow2.f32 %v1911_v60  ;;  %v1915_v59 = vmul.f32 1.442695, %v1526_v32  ;;  %v1208_v40 = vmul.f32 3.5, %v888_v17  ;;  %v890_v25 = vadd.f32 1.0, %v5166_v14  ;;  %2801 = vst [vmem:[%s6160_s27 + $0x200] sm:$0xff] %v7410_v15 }
  0xde   : > { %7206 = vst [vmem:[#allocation47_spill] sm:$0xff] %v5175_v37  ;;  %v5178_v12 = vpop.eup %3551  ;;  %3573 = vpow2.f32 %v1913_v7  ;;  %v1527_v34 = vadd.f32 -5.0, %v1207_v27  ;;  %v1209_v47 = vmul.f32 3.5, %v889_v48  ;;  %v891_v42 = vadd.f32 1.0, %v5169_v2  ;;  %v7411_v23 = vld [vmem:[#allocation36_spill] sm:$0xff]  ;;  %v7412_v30 = vld [vmem:[#allocation37_spill] sm:$0xff] }
  0xdf   : > { %7207 = vst [vmem:[#allocation48_spill] sm:$0xff] %v5178_v12  ;;  %v5181_v58 = vpop.eup %3553  ;;  %3575 = vpow2.f32 %v1915_v59  ;;  %v1528_v54 = vadd.f32 -5.0, %v1208_v40  ;;  %v1210_v56 = vmul.f32 3.5, %v890_v25  ;;  %v892_v51 = vadd.f32 1.0, %v5172_v0  ;;  %2802 = vst [vmem:[%s6160_s27 + $0x208] sm:$0xff] %v7411_v23  ;;  %v7413_v36 = vld [vmem:[#allocation38_spill] sm:$0xff] }
  0xe0   : > { %7208 = vst [vmem:[#allocation49_spill] sm:$0xff] %v5181_v58  ;;  %v5184_v60 = vpop.eup %3555  ;;  %v1917_v32 = vmul.f32 1.442695, %v1527_v34  ;;  %v1529_v17 = vadd.f32 -5.0, %v1209_v47  ;;  %v1211_v14 = vmul.f32 3.5, %v891_v42  ;;  %v893_v7 = vadd.f32 1.0, %v5175_v37 }
  0xe1   : > { %7209 = vst [vmem:[#allocation50_spill] sm:$0xff] %v5184_v60  ;;  %v3558_v27 = vpop.eup %3557  ;;  %v1919_v48 = vmul.f32 1.442695, %v1528_v54  ;;  %v1530_v43 = vadd.f32 -5.0, %v1210_v56  ;;  %v1212_v2 = vmul.f32 3.5, %v892_v51  ;;  %v894_v63 = vadd.f32 1.0, %v5178_v12 }
  0xe2   : > { %v3560_v4 = vpop.eup %3559  ;;  %2477 = vst [vmem:[%s4886_s19 + $0x1e0] sm:$0xff] %v3558_v27  ;;  %3577 = vpow2.f32 %v1917_v32  ;;  %v1921_v59 = vmul.f32 1.442695, %v1529_v17  ;;  %v1531_v40 = vadd.f32 -5.0, %v1211_v14  ;;  %v1213_v25 = vmul.f32 3.5, %v893_v7  ;;  %2803 = vst [vmem:[%s6160_s27 + $0x210] sm:$0xff] %v7412_v30 }
  0xe3   : > { %2478 = vst [vmem:[%s4886_s19 + $0x1e8] sm:$0xff] %v3560_v4  ;;  %3579 = vpow2.f32 %v1919_v48  ;;  %v1923_v34 = vmul.f32 1.442695, %v1530_v43  ;;  %v1532_v47 = vadd.f32 -5.0, %v1212_v2  ;;  %v1214_v42 = vmul.f32 3.5, %v894_v63  ;;  %v257_v48 = vld [vmem:[%s4801_s5 + $0x280] sm:$0xff] }
  0xe4   : > { %3581 = vpow2.f32 %v1921_v59  ;;  %v1925_v37 = vmul.f32 1.442695, %v1531_v40  ;;  %v1533_v54 = vadd.f32 -5.0, %v1213_v25  ;;  %v895_v56 = vadd.f32 1.0, %v5181_v58  ;;  %v258_v25 = vld [vmem:[%s4801_s5 + $0x288] sm:$0xff]  ;;  %2804 = vst [vmem:[%s6160_s27 + $0x218] sm:$0xff] %v7413_v36 }
  0xe5   : > { %v3562_v51 = vpop.eup %3561  ;;  %3583 = vpow2.f32 %v1923_v34  ;;  %v1927_v32 = vmul.f32 1.442695, %v1532_v47  ;;  %v1534_v17 = vadd.f32 -5.0, %v1214_v42  ;;  %v896_v14 = vadd.f32 1.0, %v5184_v60  ;;  %v7414_v41 = vld [vmem:[#allocation39_spill] sm:$0xff]  ;;  %v7415_v46 = vld [vmem:[#allocation40_spill] sm:$0xff] }
  0xe6   : > { %v3564_v4 = vpop.eup %3563  ;;  %2479 = vst [vmem:[%s4886_s19 + $0x1f0] sm:$0xff] %v3562_v51  ;;  %3585 = vpow2.f32 %v1925_v37  ;;  %v1929_v63 = vmul.f32 1.442695, %v1533_v54  ;;  %v1215_v43 = vmul.f32 3.5, %v895_v56  ;;  %v259_v51 = vld [vmem:[%s4801_s5 + $0x290] sm:$0xff]  ;;  %2805 = vst [vmem:[%s6160_s27 + $0x220] sm:$0xff] %v7414_v41 }
  0xe7   : > { %v3566_v2 = vpop.eup %3565  ;;  %2480 = vst [vmem:[%s4886_s19 + $0x1f8] sm:$0xff] %v3564_v4  ;;  %3587 = vpow2.f32 %v1927_v32  ;;  %v1931_v7 = vmul.f32 1.442695, %v1534_v17  ;;  %v1216_v27 = vmul.f32 3.5, %v896_v14  ;;  %v260_v17 = vld [vmem:[%s4801_s5 + $0x298] sm:$0xff]  ;;  %v261_v14 = vld [vmem:[%s4801_s5 + $0x2a0] sm:$0xff] }
  0xe8   : > { %v3568_v59 = vpop.eup %3567  ;;  %2481 = vst [vmem:[%s4886_s19 + $0x200] sm:$0xff] %v3566_v2  ;;  %3589 = vpow2.f32 %v1929_v63  ;;  %v1535_v40 = vadd.f32 -5.0, %v1215_v43  ;;  %v262_v4 = vld [vmem:[%s4801_s5 + $0x2a8] sm:$0xff]  ;;  %v263_v43 = vld [vmem:[%s4801_s5 + $0x2b0] sm:$0xff]  ;;  %2806 = vst [vmem:[%s6160_s27 + $0x228] sm:$0xff] %v7415_v46 }
  0xe9   : > { %v3570_v34 = vpop.eup %3569  ;;  %2482 = vst [vmem:[%s4886_s19 + $0x208] sm:$0xff] %v3568_v59  ;;  %3591 = vpow2.f32 %v1931_v7  ;;  %v1536_v37 = vadd.f32 -5.0, %v1216_v27  ;;  %v264_v7 = vld [vmem:[%s4801_s5 + $0x2b8] sm:$0xff]  ;;  %v7416_v55 = vld [vmem:[#allocation41_spill] sm:$0xff]  ;;  %v7418_v3 = vld [vmem:[#allocation43_spill] sm:$0xff] }
  0xea   : > { %v3572_v47 = vpop.eup %3571  ;;  %2483 = vst [vmem:[%s4886_s19 + $0x210] sm:$0xff] %v3570_v34  ;;  %v1933_v42 = vmul.f32 1.442695, %v1535_v40  ;;  %3593 = vtanh.f32 %v257_v48  ;;  %v265_v48 = vld [vmem:[%s4801_s5 + $0x2c0] sm:$0xff]  ;;  %v266_v40 = vld [vmem:[%s4801_s5 + $0x2c8] sm:$0xff]  ;;  %v267_v34 = vld [vmem:[%s4801_s5 + $0x2d0] sm:$0xff] }
  0xeb   : > { %v3574_v54 = vpop.eup %3573  ;;  %2484 = vst [vmem:[%s4886_s19 + $0x218] sm:$0xff] %v3572_v47  ;;  %v1935_v56 = vmul.f32 1.442695, %v1536_v37  ;;  %3595 = vtanh.f32 %v258_v25  ;;  %v268_v47 = vld [vmem:[%s4801_s5 + $0x2d8] sm:$0xff]  ;;  %2807 = vst [vmem:[%s6160_s27 + $0x230] sm:$0xff] %v7416_v55  ;;  %v7419_v10 = vld [vmem:[#allocation44_spill] sm:$0xff] }
  0xec   : > { %v3576_v32 = vpop.eup %3575  ;;  %2485 = vst [vmem:[%s4886_s19 + $0x220] sm:$0xff] %v3574_v54  ;;  %3597 = vpow2.f32 %v1933_v42  ;;  %v269_v54 = vld [vmem:[%s4801_s5 + $0x2e0] sm:$0xff]  ;;  %v7417_v62 = vld [vmem:[#allocation42_spill] sm:$0xff]  ;;  %2809 = vst [vmem:[%s6160_s27 + $0x240] sm:$0xff] %v7418_v3 }
  0xed   : > { %2486 = vst [vmem:[%s4886_s19 + $0x228] sm:$0xff] %v3576_v32  ;;  %3599 = vpow2.f32 %v1935_v56  ;;  %2808 = vst [vmem:[%s6160_s27 + $0x238] sm:$0xff] %v7417_v62  ;;  %v7420_v20 = vld [vmem:[#allocation45_spill] sm:$0xff]  ;;  %v7421_v29 = vld [vmem:[#allocation46_spill] sm:$0xff] }
  0xee   : > { %3601 = vtanh.f32 %v259_v51  ;;  %v270_v51 = vld [vmem:[%s4801_s5 + $0x2e8] sm:$0xff]  ;;  %2810 = vst [vmem:[%s6160_s27 + $0x248] sm:$0xff] %v7419_v10  ;;  %2811 = vst [vmem:[%s6160_s27 + $0x250] sm:$0xff] %v7420_v20  ;;  %v7422_v38 = vld [vmem:[#allocation47_spill] sm:$0xff] }
  0xef   : > { %v3578_v63 = vpop.eup %3577  ;;  %3603 = vtanh.f32 %v260_v17  ;;  %v271_v17 = vld [vmem:[%s4801_s5 + $0x2f0] sm:$0xff]  ;;  %2812 = vst [vmem:[%s6160_s27 + $0x258] sm:$0xff] %v7421_v29  ;;  %2813 = vst [vmem:[%s6160_s27 + $0x260] sm:$0xff] %v7422_v38  ;;  %v7423_v45 = vld [vmem:[#allocation48_spill] sm:$0xff] }
  0xf0   : > { %v3580_v2 = vpop.eup %3579  ;;  %2487 = vst [vmem:[%s4886_s19 + $0x230] sm:$0xff] %v3578_v63  ;;  %3605 = vtanh.f32 %v261_v14  ;;  %v272_v63 = vld [vmem:[%s4801_s5 + $0x2f8] sm:$0xff]  ;;  %2814 = vst [vmem:[%s6160_s27 + $0x268] sm:$0xff] %v7423_v45  ;;  %v7424_v6 = vld [vmem:[#allocation49_spill] sm:$0xff] }
  0xf1   : > { %v3582_v27 = vpop.eup %3581  ;;  %2488 = vst [vmem:[%s4886_s19 + $0x238] sm:$0xff] %v3580_v2  ;;  %3607 = vtanh.f32 %v262_v4  ;;  %2815 = vst [vmem:[%s6160_s27 + $0x270] sm:$0xff] %v7424_v6  ;;  %v7425_v22 = vld [vmem:[#allocation50_spill] sm:$0xff] }
  0xf2   : > { %v3584_v59 = vpop.eup %3583  ;;  %2489 = vst [vmem:[%s4886_s19 + $0x240] sm:$0xff] %v3582_v27  ;;  %3609 = vtanh.f32 %v263_v43  ;;  %2816 = vst [vmem:[%s6160_s27 + $0x278] sm:$0xff] %v7425_v22 }
  0xf3   : > { %v3586_v25 = vpop.eup %3585  ;;  %2490 = vst [vmem:[%s4886_s19 + $0x248] sm:$0xff] %v3584_v59  ;;  %3611 = vtanh.f32 %v264_v7  ;;  %v273_v7 = vld [vmem:[%s4801_s5 + $0x300] sm:$0xff]  ;;  %v274_v59 = vld [vmem:[%s4801_s5 + $0x308] sm:$0xff] }
  0xf4   : > { %v3588_v37 = vpop.eup %3587  ;;  %2491 = vst [vmem:[%s4886_s19 + $0x250] sm:$0xff] %v3586_v25  ;;  %3613 = vtanh.f32 %v265_v48 }
  0xf5   : > { %v3590_v42 = vpop.eup %3589  ;;  %2492 = vst [vmem:[%s4886_s19 + $0x258] sm:$0xff] %v3588_v37  ;;  %3615 = vtanh.f32 %v266_v40 }
  0xf6   : > { %v3592_v56 = vpop.eup %3591  ;;  %2493 = vst [vmem:[%s4886_s19 + $0x260] sm:$0xff] %v3590_v42  ;;  %3617 = vtanh.f32 %v267_v34  ;;  %v275_v34 = vld [vmem:[%s4801_s5 + $0x310] sm:$0xff] }
  0xf7   : > { %v5221_v32 = vpop.eup %3593  ;;  %2494 = vst [vmem:[%s4886_s19 + $0x268] sm:$0xff] %v3592_v56  ;;  %3619 = vtanh.f32 %v268_v47 }
  0xf8   : > { %7210 = vst [vmem:[#allocation51_spill] sm:$0xff] %v5221_v32  ;;  %v5225_v14 = vpop.eup %3595  ;;  %v897_v4 = vadd.f32 1.0, %v5221_v32  ;;  %3621 = vtanh.f32 %v269_v54  ;;  %v276_v54 = vld [vmem:[%s4801_s5 + $0x318] sm:$0xff] }
  0xf9   : > { %7211 = vst [vmem:[#allocation52_spill] sm:$0xff] %v5225_v14  ;;  %v3598_v43 = vpop.eup %3597  ;;  %v898_v2 = vadd.f32 1.0, %v5225_v14  ;;  %3623 = vtanh.f32 %v270_v51 }
  0xfa   : > { %v3600_v27 = vpop.eup %3599  ;;  %2495 = vst [vmem:[%s4886_s19 + $0x270] sm:$0xff] %v3598_v43  ;;  %v1217_v48 = vmul.f32 3.5, %v897_v4  ;;  %3625 = vtanh.f32 %v271_v17 }
  0xfb   : > { %v5233_v40 = vpop.eup %3601  ;;  %2496 = vst [vmem:[%s4886_s19 + $0x278] sm:$0xff] %v3600_v27  ;;  %v1218_v25 = vmul.f32 3.5, %v898_v2  ;;  %3627 = vtanh.f32 %v272_v63 }
  0xfc   : > { %7212 = vst [vmem:[#allocation53_spill] sm:$0xff] %v5233_v40  ;;  %v5237_v37 = vpop.eup %3603  ;;  %v1537_v47 = vadd.f32 -5.0, %v1217_v48  ;;  %v899_v42 = vadd.f32 1.0, %v5233_v40  ;;  %3629 = vtanh.f32 %v273_v7 }
  0xfd   : > { %7213 = vst [vmem:[#allocation54_spill] sm:$0xff] %v5237_v37  ;;  %v5241_v56 = vpop.eup %3605  ;;  %v1538_v51 = vadd.f32 -5.0, %v1218_v25  ;;  %v900_v4 = vadd.f32 1.0, %v5237_v37  ;;  %3631 = vtanh.f32 %v274_v59 }
  0xfe   : > { %7214 = vst [vmem:[#allocation55_spill] sm:$0xff] %v5241_v56  ;;  %v5244_v17 = vpop.eup %3607  ;;  %v1937_v43 = vmul.f32 1.442695, %v1537_v47  ;;  %v1219_v27 = vmul.f32 3.5, %v899_v42  ;;  %v901_v63 = vadd.f32 1.0, %v5241_v56  ;;  %3633 = vtanh.f32 %v275_v34 }
  0xff   : > { %7215 = vst [vmem:[#allocation56_spill] sm:$0xff] %v5244_v17  ;;  %v5247_v2 = vpop.eup %3609  ;;  %v1939_v48 = vmul.f32 1.442695, %v1538_v51  ;;  %v1220_v14 = vmul.f32 3.5, %v900_v4  ;;  %v902_v7 = vadd.f32 1.0, %v5244_v17  ;;  %3635 = vtanh.f32 %v276_v54 }
 0x100   : > { %7216 = vst [vmem:[#allocation57_spill] sm:$0xff] %v5247_v2  ;;  %v5250_v40 = vpop.eup %3611  ;;  %3637 = vpow2.f32 %v1937_v43  ;;  %v1539_v25 = vadd.f32 -5.0, %v1219_v27  ;;  %v1221_v37 = vmul.f32 3.5, %v901_v63  ;;  %v903_v59 = vadd.f32 1.0, %v5247_v2 }
 0x101   : > { %7217 = vst [vmem:[#allocation58_spill] sm:$0xff] %v5250_v40  ;;  %v5253_v32 = vpop.eup %3613  ;;  %3639 = vpow2.f32 %v1939_v48  ;;  %v1540_v47 = vadd.f32 -5.0, %v1220_v14  ;;  %v1222_v42 = vmul.f32 3.5, %v902_v7  ;;  %v904_v34 = vadd.f32 1.0, %v5250_v40 }
 0x102   : > { %7218 = vst [vmem:[#allocation59_spill] sm:$0xff] %v5253_v32  ;;  %v5256_v56 = vpop.eup %3615  ;;  %v1941_v51 = vmul.f32 1.442695, %v1539_v25  ;;  %v1541_v4 = vadd.f32 -5.0, %v1221_v37  ;;  %v1223_v17 = vmul.f32 3.5, %v903_v59  ;;  %v905_v54 = vadd.f32 1.0, %v5253_v32 }
 0x103   : > { %7219 = vst [vmem:[#allocation60_spill] sm:$0xff] %v5256_v56  ;;  %v5259_v60 = vpop.eup %3617  ;;  %v1943_v43 = vmul.f32 1.442695, %v1540_v47  ;;  %v1542_v27 = vadd.f32 -5.0, %v1222_v42  ;;  %v1224_v63 = vmul.f32 3.5, %v904_v34  ;;  %v906_v2 = vadd.f32 1.0, %v5256_v56 }
 0x104   : > { %7220 = vst [vmem:[#allocation61_spill] sm:$0xff] %v5259_v60  ;;  %v5262_v58 = vpop.eup %3619  ;;  %3641 = vpow2.f32 %v1941_v51  ;;  %v1945_v14 = vmul.f32 1.442695, %v1541_v4  ;;  %v1543_v48 = vadd.f32 -5.0, %v1223_v17  ;;  %v1225_v7 = vmul.f32 3.5, %v905_v54 }
 0x105   : > { %7221 = vst [vmem:[#allocation62_spill] sm:$0xff] %v5262_v58  ;;  %v5264_v40 = vpop.eup %3621  ;;  %3643 = vpow2.f32 %v1943_v43  ;;  %v1947_v37 = vmul.f32 1.442695, %v1542_v27  ;;  %v1544_v25 = vadd.f32 -5.0, %v1224_v63  ;;  %v1226_v59 = vmul.f32 3.5, %v906_v2 }
 0x106   : > { %7222 = vst [vmem:[#allocation63_spill] sm:$0xff] %v5264_v40  ;;  %v5266_v32 = vpop.eup %3623  ;;  %3645 = vpow2.f32 %v1945_v14  ;;  %v1949_v47 = vmul.f32 1.442695, %v1543_v48  ;;  %v1545_v42 = vadd.f32 -5.0, %v1225_v7  ;;  %v907_v34 = vadd.f32 1.0, %v5259_v60 }
 0x107   : > { %7223 = vst [vmem:[#allocation64_spill] sm:$0xff] %v5266_v32  ;;  %v5269_v56 = vpop.eup %3625  ;;  %3647 = vpow2.f32 %v1947_v37  ;;  %v1951_v51 = vmul.f32 1.442695, %v1544_v25  ;;  %v1546_v4 = vadd.f32 -5.0, %v1226_v59  ;;  %v908_v17 = vadd.f32 1.0, %v5262_v58 }
 0x108   : > { %7224 = vst [vmem:[#allocation65_spill] sm:$0xff] %v5269_v56  ;;  %v5272_v54 = vpop.eup %3627  ;;  %3649 = vpow2.f32 %v1949_v47  ;;  %v1953_v43 = vmul.f32 1.442695, %v1545_v42  ;;  %v1227_v27 = vmul.f32 3.5, %v907_v34  ;;  %v909_v2 = vadd.f32 1.0, %v5264_v40 }
 0x109   : > { %7225 = vst [vmem:[#allocation66_spill] sm:$0xff] %v5272_v54  ;;  %v5275_v63 = vpop.eup %3629  ;;  %3651 = vpow2.f32 %v1951_v51  ;;  %v1955_v14 = vmul.f32 1.442695, %v1546_v4  ;;  %v1228_v48 = vmul.f32 3.5, %v908_v17  ;;  %v910_v7 = vadd.f32 1.0, %v5266_v32  ;;  %v7434_v16 = vld [vmem:[#allocation59_spill] sm:$0xff] }
 0x10a   : > { %7226 = vst [vmem:[#allocation67_spill] sm:$0xff] %v5275_v63  ;;  %v5278_v60 = vpop.eup %3631  ;;  %3653 = vpow2.f32 %v1953_v43  ;;  %v1547_v37 = vadd.f32 -5.0, %v1227_v27  ;;  %v1229_v25 = vmul.f32 3.5, %v909_v2  ;;  %v911_v59 = vadd.f32 1.0, %v5269_v56  ;;  %2825 = vst [vmem:[%s6160_s27 + $0x2c0] sm:$0xff] %v7434_v16  ;;  %v7435_v18 = vld [vmem:[#allocation60_spill] sm:$0xff] }
 0x10b   : > { %7227 = vst [vmem:[#allocation68_spill] sm:$0xff] %v5278_v60  ;;  %v5281_v58 = vpop.eup %3633  ;;  %3655 = vpow2.f32 %v1955_v14  ;;  %v1548_v47 = vadd.f32 -5.0, %v1228_v48  ;;  %v1230_v42 = vmul.f32 3.5, %v910_v7  ;;  %v912_v34 = vadd.f32 1.0, %v5272_v54  ;;  %2826 = vst [vmem:[%s6160_s27 + $0x2c8] sm:$0xff] %v7435_v18  ;;  %v7436_v21 = vld [vmem:[#allocation61_spill] sm:$0xff] }
 0x10c   : > { %7228 = vst [vmem:[#allocation69_spill] sm:$0xff] %v5281_v58  ;;  %v5284_v51 = vpop.eup %3635  ;;  %v1957_v4 = vmul.f32 1.442695, %v1547_v37  ;;  %v1549_v17 = vadd.f32 -5.0, %v1229_v25  ;;  %v1231_v32 = vmul.f32 3.5, %v911_v59  ;;  %v913_v43 = vadd.f32 1.0, %v5275_v63 }
 0x10d   : > { %7229 = vst [vmem:[#allocation70_spill] sm:$0xff] %v5284_v51  ;;  %v3638_v27 = vpop.eup %3637  ;;  %v1959_v2 = vmul.f32 1.442695, %v1548_v47  ;;  %v1550_v40 = vadd.f32 -5.0, %v1230_v42  ;;  %v1232_v56 = vmul.f32 3.5, %v912_v34  ;;  %v914_v12 = vadd.f32 1.0, %v5278_v60 }
 0x10e   : > { %v3640_v0 = vpop.eup %3639  ;;  %2497 = vst [vmem:[%s4886_s19 + $0x280] sm:$0xff] %v3638_v27  ;;  %3657 = vpow2.f32 %v1957_v4  ;;  %v1961_v14 = vmul.f32 1.442695, %v1549_v17  ;;  %v1551_v48 = vadd.f32 -5.0, %v1231_v32  ;;  %v1233_v7 = vmul.f32 3.5, %v913_v43  ;;  %2827 = vst [vmem:[%s6160_s27 + $0x2d0] sm:$0xff] %v7436_v21 }
 0x10f   : > { %2498 = vst [vmem:[%s4886_s19 + $0x288] sm:$0xff] %v3640_v0  ;;  %3659 = vpow2.f32 %v1959_v2  ;;  %v1963_v37 = vmul.f32 1.442695, %v1550_v40  ;;  %v1552_v25 = vadd.f32 -5.0, %v1232_v56  ;;  %v1234_v59 = vmul.f32 3.5, %v914_v12  ;;  %v277_v2 = vld [vmem:[%s4801_s5 + $0x320] sm:$0xff] }
 0x110   : > { %3661 = vpow2.f32 %v1961_v14  ;;  %v1965_v63 = vmul.f32 1.442695, %v1551_v48  ;;  %v1553_v47 = vadd.f32 -5.0, %v1233_v7  ;;  %v915_v42 = vadd.f32 1.0, %v5281_v58  ;;  %v278_v7 = vld [vmem:[%s4801_s5 + $0x328] sm:$0xff]  ;;  %v7437_v24 = vld [vmem:[#allocation62_spill] sm:$0xff] }
 0x111   : > { %v3642_v34 = vpop.eup %3641  ;;  %3663 = vpow2.f32 %v1963_v37  ;;  %v1967_v4 = vmul.f32 1.442695, %v1552_v25  ;;  %v1554_v17 = vadd.f32 -5.0, %v1234_v59  ;;  %v916_v32 = vadd.f32 1.0, %v5284_v51  ;;  %2828 = vst [vmem:[%s6160_s27 + $0x2d8] sm:$0xff] %v7437_v24  ;;  %v7438_v28 = vld [vmem:[#allocation63_spill] sm:$0xff] }
 0x112   : > { %v3644_v0 = vpop.eup %3643  ;;  %2499 = vst [vmem:[%s4886_s19 + $0x290] sm:$0xff] %v3642_v34  ;;  %3665 = vpow2.f32 %v1965_v63  ;;  %v1969_v12 = vmul.f32 1.442695, %v1553_v47  ;;  %v1235_v40 = vmul.f32 3.5, %v915_v42  ;;  %v279_v34 = vld [vmem:[%s4801_s5 + $0x330] sm:$0xff]  ;;  %2829 = vst [vmem:[%s6160_s27 + $0x2e0] sm:$0xff] %v7438_v28 }
 0x113   : > { %v3646_v56 = vpop.eup %3645  ;;  %2500 = vst [vmem:[%s4886_s19 + $0x298] sm:$0xff] %v3644_v0  ;;  %3667 = vpow2.f32 %v1967_v4  ;;  %v1971_v43 = vmul.f32 1.442695, %v1554_v17  ;;  %v1236_v27 = vmul.f32 3.5, %v916_v32  ;;  %v280_v17 = vld [vmem:[%s4801_s5 + $0x338] sm:$0xff]  ;;  %v281_v32 = vld [vmem:[%s4801_s5 + $0x340] sm:$0xff] }
 0x114   : > { %v3648_v14 = vpop.eup %3647  ;;  %2501 = vst [vmem:[%s4886_s19 + $0x2a0] sm:$0xff] %v3646_v56  ;;  %3669 = vpow2.f32 %v1969_v12  ;;  %v1555_v48 = vadd.f32 -5.0, %v1235_v40  ;;  %v282_v0 = vld [vmem:[%s4801_s5 + $0x348] sm:$0xff]  ;;  %v283_v40 = vld [vmem:[%s4801_s5 + $0x350] sm:$0xff]  ;;  %v7441_v39 = vld [vmem:[#allocation66_spill] sm:$0xff] }
 0x115   : > { %v3650_v37 = vpop.eup %3649  ;;  %2502 = vst [vmem:[%s4886_s19 + $0x2a8] sm:$0xff] %v3648_v14  ;;  %3671 = vpow2.f32 %v1971_v43  ;;  %v1556_v63 = vadd.f32 -5.0, %v1236_v27  ;;  %v284_v43 = vld [vmem:[%s4801_s5 + $0x358] sm:$0xff]  ;;  %v7439_v31 = vld [vmem:[#allocation64_spill] sm:$0xff]  ;;  %v7440_v35 = vld [vmem:[#allocation65_spill] sm:$0xff] }
 0x116   : > { %v3652_v25 = vpop.eup %3651  ;;  %2503 = vst [vmem:[%s4886_s19 + $0x2b0] sm:$0xff] %v3650_v37  ;;  %v1973_v59 = vmul.f32 1.442695, %v1555_v48  ;;  %3673 = vtanh.f32 %v277_v2  ;;  %v285_v2 = vld [vmem:[%s4801_s5 + $0x360] sm:$0xff]  ;;  %v286_v48 = vld [vmem:[%s4801_s5 + $0x368] sm:$0xff]  ;;  %v287_v37 = vld [vmem:[%s4801_s5 + $0x370] sm:$0xff] }
 0x117   : > { %v3654_v47 = vpop.eup %3653  ;;  %2504 = vst [vmem:[%s4886_s19 + $0x2b8] sm:$0xff] %v3652_v25  ;;  %v1975_v42 = vmul.f32 1.442695, %v1556_v63  ;;  %3675 = vtanh.f32 %v278_v7  ;;  %v288_v25 = vld [vmem:[%s4801_s5 + $0x378] sm:$0xff]  ;;  %2830 = vst [vmem:[%s6160_s27 + $0x2e8] sm:$0xff] %v7439_v31  ;;  %v7442_v44 = vld [vmem:[#allocation67_spill] sm:$0xff] }
 0x118   : > { %v3656_v4 = vpop.eup %3655  ;;  %2505 = vst [vmem:[%s4886_s19 + $0x2c0] sm:$0xff] %v3654_v47  ;;  %3677 = vpow2.f32 %v1973_v59  ;;  %v289_v47 = vld [vmem:[%s4801_s5 + $0x380] sm:$0xff]  ;;  %2831 = vst [vmem:[%s6160_s27 + $0x2f0] sm:$0xff] %v7440_v35  ;;  %v7443_v49 = vld [vmem:[#allocation68_spill] sm:$0xff] }
 0x119   : > { %2506 = vst [vmem:[%s4886_s19 + $0x2c8] sm:$0xff] %v3656_v4  ;;  %3679 = vpow2.f32 %v1975_v42  ;;  %2832 = vst [vmem:[%s6160_s27 + $0x2f8] sm:$0xff] %v7441_v39  ;;  %v7444_v53 = vld [vmem:[#allocation69_spill] sm:$0xff]  ;;  %v7445_v57 = vld [vmem:[#allocation70_spill] sm:$0xff] }
 0x11a   : > { %3681 = vtanh.f32 %v279_v34  ;;  %v290_v34 = vld [vmem:[%s4801_s5 + $0x388] sm:$0xff]  ;;  %2833 = vst [vmem:[%s6160_s27 + $0x300] sm:$0xff] %v7442_v44  ;;  %2834 = vst [vmem:[%s6160_s27 + $0x308] sm:$0xff] %v7443_v49 }
 0x11b   : > { %v3658_v12 = vpop.eup %3657  ;;  %3683 = vtanh.f32 %v280_v17  ;;  %v291_v17 = vld [vmem:[%s4801_s5 + $0x390] sm:$0xff]  ;;  %2835 = vst [vmem:[%s6160_s27 + $0x310] sm:$0xff] %v7444_v53  ;;  %2836 = vst [vmem:[%s6160_s27 + $0x318] sm:$0xff] %v7445_v57 }
 0x11c   : > { %v3660_v56 = vpop.eup %3659  ;;  %2507 = vst [vmem:[%s4886_s19 + $0x2d0] sm:$0xff] %v3658_v12  ;;  %3685 = vtanh.f32 %v281_v32  ;;  %v292_v12 = vld [vmem:[%s4801_s5 + $0x398] sm:$0xff] }
 0x11d   : > { %v3662_v27 = vpop.eup %3661  ;;  %2508 = vst [vmem:[%s4886_s19 + $0x2d8] sm:$0xff] %v3660_v56  ;;  %3687 = vtanh.f32 %v282_v0 }
 0x11e   : > { %v3664_v14 = vpop.eup %3663  ;;  %2509 = vst [vmem:[%s4886_s19 + $0x2e0] sm:$0xff] %v3662_v27  ;;  %3689 = vtanh.f32 %v283_v40 }
 0x11f   : > { %v3666_v7 = vpop.eup %3665  ;;  %2510 = vst [vmem:[%s4886_s19 + $0x2e8] sm:$0xff] %v3664_v14  ;;  %3691 = vtanh.f32 %v284_v43  ;;  %v293_v43 = vld [vmem:[%s4801_s5 + $0x3a0] sm:$0xff]  ;;  %v294_v14 = vld [vmem:[%s4801_s5 + $0x3a8] sm:$0xff] }
 0x120   : > { %v3668_v63 = vpop.eup %3667  ;;  %2511 = vst [vmem:[%s4886_s19 + $0x2f0] sm:$0xff] %v3666_v7  ;;  %3693 = vtanh.f32 %v285_v2 }
 0x121   : > { %v3670_v59 = vpop.eup %3669  ;;  %2512 = vst [vmem:[%s4886_s19 + $0x2f8] sm:$0xff] %v3668_v63  ;;  %3695 = vtanh.f32 %v286_v48 }
 0x122   : > { %v3672_v42 = vpop.eup %3671  ;;  %2513 = vst [vmem:[%s4886_s19 + $0x300] sm:$0xff] %v3670_v59  ;;  %3697 = vtanh.f32 %v287_v37  ;;  %v295_v37 = vld [vmem:[%s4801_s5 + $0x3b0] sm:$0xff] }
 0x123   : > { %v5321_v4 = vpop.eup %3673  ;;  %2514 = vst [vmem:[%s4886_s19 + $0x308] sm:$0xff] %v3672_v42  ;;  %3699 = vtanh.f32 %v288_v25 }
 0x124   : > { %7230 = vst [vmem:[#allocation71_spill] sm:$0xff] %v5321_v4  ;;  %v5325_v32 = vpop.eup %3675  ;;  %v917_v0 = vadd.f32 1.0, %v5321_v4  ;;  %3701 = vtanh.f32 %v289_v47  ;;  %v296_v47 = vld [vmem:[%s4801_s5 + $0x3b8] sm:$0xff] }
 0x125   : > { %7231 = vst [vmem:[#allocation72_spill] sm:$0xff] %v5325_v32  ;;  %v3678_v40 = vpop.eup %3677  ;;  %v918_v56 = vadd.f32 1.0, %v5325_v32  ;;  %3703 = vtanh.f32 %v290_v34 }
 0x126   : > { %v3680_v27 = vpop.eup %3679  ;;  %2515 = vst [vmem:[%s4886_s19 + $0x310] sm:$0xff] %v3678_v40  ;;  %v1237_v2 = vmul.f32 3.5, %v917_v0  ;;  %3705 = vtanh.f32 %v291_v17 }
 0x127   : > { %v5333_v48 = vpop.eup %3681  ;;  %2516 = vst [vmem:[%s4886_s19 + $0x318] sm:$0xff] %v3680_v27  ;;  %v1238_v7 = vmul.f32 3.5, %v918_v56  ;;  %3707 = vtanh.f32 %v292_v12 }
 0x128   : > { %7232 = vst [vmem:[#allocation73_spill] sm:$0xff] %v5333_v48  ;;  %v5337_v63 = vpop.eup %3683  ;;  %v1557_v25 = vadd.f32 -5.0, %v1237_v2  ;;  %v919_v59 = vadd.f32 1.0, %v5333_v48  ;;  %3709 = vtanh.f32 %v293_v43 }
 0x129   : > { %7233 = vst [vmem:[#allocation74_spill] sm:$0xff] %v5337_v63  ;;  %v5341_v42 = vpop.eup %3685  ;;  %v1558_v34 = vadd.f32 -5.0, %v1238_v7  ;;  %v920_v0 = vadd.f32 1.0, %v5337_v63  ;;  %3711 = vtanh.f32 %v294_v14 }
 0x12a   : > { %7234 = vst [vmem:[#allocation75_spill] sm:$0xff] %v5341_v42  ;;  %v5344_v17 = vpop.eup %3687  ;;  %v1977_v40 = vmul.f32 1.442695, %v1557_v25  ;;  %v1239_v27 = vmul.f32 3.5, %v919_v59  ;;  %v921_v12 = vadd.f32 1.0, %v5341_v42  ;;  %3713 = vtanh.f32 %v295_v37 }
 0x12b   : > { %7235 = vst [vmem:[#allocation76_spill] sm:$0xff] %v5344_v17  ;;  %v5347_v56 = vpop.eup %3689  ;;  %v1979_v2 = vmul.f32 1.442695, %v1558_v34  ;;  %v1240_v32 = vmul.f32 3.5, %v920_v0  ;;  %v922_v43 = vadd.f32 1.0, %v5344_v17  ;;  %3715 = vtanh.f32 %v296_v47  ;;  %v7446_v61 = vld [vmem:[#allocation71_spill] sm:$0xff] }
 0x12c   : > { %7236 = vst [vmem:[#allocation77_spill] sm:$0xff] %v5347_v56  ;;  %v5350_v48 = vpop.eup %3691  ;;  %3717 = vpow2.f32 %v1977_v40  ;;  %v1559_v7 = vadd.f32 -5.0, %v1239_v27  ;;  %v1241_v63 = vmul.f32 3.5, %v921_v12  ;;  %v923_v14 = vadd.f32 1.0, %v5347_v56  ;;  %2837 = vst [vmem:[%s6160_s27 + $0x320] sm:$0xff] %v7446_v61  ;;  %v7447_v1 = vld [vmem:[#allocation72_spill] sm:$0xff] }
 0x12d   : > { %7237 = vst [vmem:[#allocation78_spill] sm:$0xff] %v5350_v48  ;;  %v5353_v4 = vpop.eup %3693  ;;  %3719 = vpow2.f32 %v1979_v2  ;;  %v1560_v25 = vadd.f32 -5.0, %v1240_v32  ;;  %v1242_v59 = vmul.f32 3.5, %v922_v43  ;;  %v924_v37 = vadd.f32 1.0, %v5350_v48  ;;  %2838 = vst [vmem:[%s6160_s27 + $0x328] sm:$0xff] %v7447_v1 }
 0x12e   : > { %7238 = vst [vmem:[#allocation79_spill] sm:$0xff] %v5353_v4  ;;  %v5356_v42 = vpop.eup %3695  ;;  %v1981_v34 = vmul.f32 1.442695, %v1559_v7  ;;  %v1561_v0 = vadd.f32 -5.0, %v1241_v63  ;;  %v1243_v17 = vmul.f32 3.5, %v923_v14  ;;  %v925_v47 = vadd.f32 1.0, %v5353_v4 }
 0x12f   : > { %7239 = vst [vmem:[#allocation80_spill] sm:$0xff] %v5356_v42  ;;  %v5359_v51 = vpop.eup %3697  ;;  %v1983_v40 = vmul.f32 1.442695, %v1560_v25  ;;  %v1562_v27 = vadd.f32 -5.0, %v1242_v59  ;;  %v1244_v12 = vmul.f32 3.5, %v924_v37  ;;  %v926_v56 = vadd.f32 1.0, %v5356_v42 }
 0x130   : > { %7240 = vst [vmem:[#allocation81_spill] sm:$0xff] %v5359_v51  ;;  %v5362_v58 = vpop.eup %3699  ;;  %3721 = vpow2.f32 %v1981_v34  ;;  %v1985_v32 = vmul.f32 1.442695, %v1561_v0  ;;  %v1563_v2 = vadd.f32 -5.0, %v1243_v17  ;;  %v1245_v43 = vmul.f32 3.5, %v925_v47  ;;  %v7448_v5 = vld [vmem:[#allocation73_spill] sm:$0xff] }
 0x131   : > { %7241 = vst [vmem:[#allocation82_spill] sm:$0xff] %v5362_v58  ;;  %v5364_v48 = vpop.eup %3701  ;;  %3723 = vpow2.f32 %v1983_v40  ;;  %v1987_v63 = vmul.f32 1.442695, %v1562_v27  ;;  %v1564_v7 = vadd.f32 -5.0, %v1244_v12  ;;  %v1246_v14 = vmul.f32 3.5, %v926_v56  ;;  %2839 = vst [vmem:[%s6160_s27 + $0x330] sm:$0xff] %v7448_v5 }
 0x132   : > { %7242 = vst [vmem:[#allocation83_spill] sm:$0xff] %v5364_v48  ;;  %v5366_v4 = vpop.eup %3703  ;;  %3725 = vpow2.f32 %v1985_v32  ;;  %v1989_v25 = vmul.f32 1.442695, %v1563_v2  ;;  %v1565_v59 = vadd.f32 -5.0, %v1245_v43  ;;  %v927_v37 = vadd.f32 1.0, %v5359_v51  ;;  %v7449_v9 = vld [vmem:[#allocation74_spill] sm:$0xff] }
 0x133   : > { %7243 = vst [vmem:[#allocation84_spill] sm:$0xff] %v5366_v4  ;;  %v5369_v42 = vpop.eup %3705  ;;  %3727 = vpow2.f32 %v1987_v63  ;;  %v1991_v34 = vmul.f32 1.442695, %v1564_v7  ;;  %v1566_v0 = vadd.f32 -5.0, %v1246_v14  ;;  %v928_v17 = vadd.f32 1.0, %v5362_v58  ;;  %2840 = vst [vmem:[%s6160_s27 + $0x338] sm:$0xff] %v7449_v9 }
 0x134   : > { %7244 = vst [vmem:[#allocation85_spill] sm:$0xff] %v5369_v42  ;;  %v5372_v47 = vpop.eup %3707  ;;  %3729 = vpow2.f32 %v1989_v25  ;;  %v1993_v40 = vmul.f32 1.442695, %v1565_v59  ;;  %v1247_v27 = vmul.f32 3.5, %v927_v37  ;;  %v929_v56 = vadd.f32 1.0, %v5364_v48  ;;  %v7450_v13 = vld [vmem:[#allocation75_spill] sm:$0xff] }
 0x135   : > { %7245 = vst [vmem:[#allocation86_spill] sm:$0xff] %v5372_v47  ;;  %v5375_v12 = vpop.eup %3709  ;;  %3731 = vpow2.f32 %v1991_v34  ;;  %v1995_v32 = vmul.f32 1.442695, %v1566_v0  ;;  %v1248_v2 = vmul.f32 3.5, %v928_v17  ;;  %v930_v43 = vadd.f32 1.0, %v5366_v4  ;;  %2841 = vst [vmem:[%s6160_s27 + $0x340] sm:$0xff] %v7450_v13 }
 0x136   : > { %7246 = vst [vmem:[#allocation87_spill] sm:$0xff] %v5375_v12  ;;  %v5378_v51 = vpop.eup %3711  ;;  %3733 = vpow2.f32 %v1993_v40  ;;  %v1567_v63 = vadd.f32 -5.0, %v1247_v27  ;;  %v1249_v7 = vmul.f32 3.5, %v929_v56  ;;  %v931_v14 = vadd.f32 1.0, %v5369_v42  ;;  %v7451_v19 = vld [vmem:[#allocation76_spill] sm:$0xff]  ;;  %v7452_v26 = vld [vmem:[#allocation77_spill] sm:$0xff] }
 0x137   : > { %7247 = vst [vmem:[#allocation88_spill] sm:$0xff] %v5378_v51  ;;  %v5381_v58 = vpop.eup %3713  ;;  %3735 = vpow2.f32 %v1995_v32  ;;  %v1568_v25 = vadd.f32 -5.0, %v1248_v2  ;;  %v1250_v59 = vmul.f32 3.5, %v930_v43  ;;  %v932_v37 = vadd.f32 1.0, %v5372_v47  ;;  %2842 = vst [vmem:[%s6160_s27 + $0x348] sm:$0xff] %v7451_v19  ;;  %v7453_v33 = vld [vmem:[#allocation78_spill] sm:$0xff] }
 0x138   : > { %7248 = vst [vmem:[#allocation89_spill] sm:$0xff] %v5381_v58  ;;  %v5384_v34 = vpop.eup %3715  ;;  %v1997_v0 = vmul.f32 1.442695, %v1567_v63  ;;  %v1569_v17 = vadd.f32 -5.0, %v1249_v7  ;;  %v1251_v4 = vmul.f32 3.5, %v931_v14  ;;  %v933_v40 = vadd.f32 1.0, %v5375_v12 }
 0x139   : > { %7249 = vst [vmem:[#allocation90_spill] sm:$0xff] %v5384_v34  ;;  %v3718_v27 = vpop.eup %3717  ;;  %v1999_v56 = vmul.f32 1.442695, %v1568_v25  ;;  %v1570_v48 = vadd.f32 -5.0, %v1250_v59  ;;  %v1252_v42 = vmul.f32 3.5, %v932_v37  ;;  %v934_v60 = vadd.f32 1.0, %v5378_v51 }
 0x13a   : > { %v3720_v54 = vpop.eup %3719  ;;  %2517 = vst [vmem:[%s4886_s19 + $0x320] sm:$0xff] %v3718_v27  ;;  %3737 = vpow2.f32 %v1997_v0  ;;  %v2001_v32 = vmul.f32 1.442695, %v1569_v17  ;;  %v1571_v2 = vadd.f32 -5.0, %v1251_v4  ;;  %v1253_v43 = vmul.f32 3.5, %v933_v40  ;;  %2843 = vst [vmem:[%s6160_s27 + $0x350] sm:$0xff] %v7452_v26 }
 0x13b   : > { %2518 = vst [vmem:[%s4886_s19 + $0x328] sm:$0xff] %v3720_v54  ;;  %3739 = vpow2.f32 %v1999_v56  ;;  %v2003_v63 = vmul.f32 1.442695, %v1570_v48  ;;  %v1572_v7 = vadd.f32 -5.0, %v1252_v42  ;;  %v1254_v14 = vmul.f32 3.5, %v934_v60  ;;  %v297_v56 = vld [vmem:[%s4801_s5 + $0x3c0] sm:$0xff] }
 0x13c   : > { %3741 = vpow2.f32 %v2001_v32  ;;  %v2005_v12 = vmul.f32 1.442695, %v1571_v2  ;;  %v1573_v25 = vadd.f32 -5.0, %v1253_v43  ;;  %v935_v59 = vadd.f32 1.0, %v5381_v58  ;;  %v298_v43 = vld [vmem:[%s4801_s5 + $0x3c8] sm:$0xff]  ;;  %2844 = vst [vmem:[%s6160_s27 + $0x358] sm:$0xff] %v7453_v33 }
 0x13d   : > { %v3722_v37 = vpop.eup %3721  ;;  %3743 = vpow2.f32 %v2003_v63  ;;  %v2007_v0 = vmul.f32 1.442695, %v1572_v7  ;;  %v1574_v17 = vadd.f32 -5.0, %v1254_v14  ;;  %v936_v4 = vadd.f32 1.0, %v5384_v34  ;;  %v7454_v50 = vld [vmem:[#allocation79_spill] sm:$0xff]  ;;  %v7455_v52 = vld [vmem:[#allocation80_spill] sm:$0xff] }
 0x13e   : > { %v3724_v54 = vpop.eup %3723  ;;  %2519 = vst [vmem:[%s4886_s19 + $0x330] sm:$0xff] %v3722_v37  ;;  %3745 = vpow2.f32 %v2005_v12  ;;  %v2009_v60 = vmul.f32 1.442695, %v1573_v25  ;;  %v1255_v48 = vmul.f32 3.5, %v935_v59  ;;  %v299_v37 = vld [vmem:[%s4801_s5 + $0x3d0] sm:$0xff]  ;;  %2845 = vst [vmem:[%s6160_s27 + $0x360] sm:$0xff] %v7454_v50 }
 0x13f   : > { %v3726_v42 = vpop.eup %3725  ;;  %2520 = vst [vmem:[%s4886_s19 + $0x338] sm:$0xff] %v3724_v54  ;;  %3747 = vpow2.f32 %v2007_v0  ;;  %v2011_v40 = vmul.f32 1.442695, %v1574_v17  ;;  %v1256_v27 = vmul.f32 3.5, %v936_v4  ;;  %v300_v17 = vld [vmem:[%s4801_s5 + $0x3d8] sm:$0xff]  ;;  %v301_v4 = vld [vmem:[%s4801_s5 + $0x3e0] sm:$0xff] }
 0x140   : > { %v3728_v32 = vpop.eup %3727  ;;  %2521 = vst [vmem:[%s4886_s19 + $0x340] sm:$0xff] %v3726_v42  ;;  %3749 = vpow2.f32 %v2009_v60  ;;  %v1575_v2 = vadd.f32 -5.0, %v1255_v48  ;;  %v302_v54 = vld [vmem:[%s4801_s5 + $0x3e8] sm:$0xff]  ;;  %v303_v48 = vld [vmem:[%s4801_s5 + $0x3f0] sm:$0xff]  ;;  %2846 = vst [vmem:[%s6160_s27 + $0x368] sm:$0xff] %v7455_v52 }
 0x141   : > { %v3730_v63 = vpop.eup %3729  ;;  %2522 = vst [vmem:[%s4886_s19 + $0x348] sm:$0xff] %v3728_v32  ;;  %3751 = vpow2.f32 %v2011_v40  ;;  %v1576_v12 = vadd.f32 -5.0, %v1256_v27  ;;  %v304_v40 = vld [vmem:[%s4801_s5 + $0x3f8] sm:$0xff]  ;;  %v7456_v8 = vld [vmem:[#allocation81_spill] sm:$0xff]  ;;  %v7458_v15 = vld [vmem:[#allocation83_spill] sm:$0xff] }
 0x142   : > { %v3732_v7 = vpop.eup %3731  ;;  %2523 = vst [vmem:[%s4886_s19 + $0x350] sm:$0xff] %v3730_v63  ;;  %v2013_v14 = vmul.f32 1.442695, %v1575_v2  ;;  %3753 = vtanh.f32 %v297_v56  ;;  %v305_v56 = vld [vmem:[%s4801_s5 + $0x400] sm:$0xff]  ;;  %v306_v2 = vld [vmem:[%s4801_s5 + $0x408] sm:$0xff]  ;;  %v307_v63 = vld [vmem:[%s4801_s5 + $0x410] sm:$0xff] }
 0x143   : > { %v3734_v25 = vpop.eup %3733  ;;  %2524 = vst [vmem:[%s4886_s19 + $0x358] sm:$0xff] %v3732_v7  ;;  %v2015_v59 = vmul.f32 1.442695, %v1576_v12  ;;  %3755 = vtanh.f32 %v298_v43  ;;  %v308_v7 = vld [vmem:[%s4801_s5 + $0x418] sm:$0xff]  ;;  %2847 = vst [vmem:[%s6160_s27 + $0x370] sm:$0xff] %v7456_v8  ;;  %v7459_v23 = vld [vmem:[#allocation84_spill] sm:$0xff] }
 0x144   : > { %v3736_v0 = vpop.eup %3735  ;;  %2525 = vst [vmem:[%s4886_s19 + $0x360] sm:$0xff] %v3734_v25  ;;  %3757 = vpow2.f32 %v2013_v14  ;;  %v309_v25 = vld [vmem:[%s4801_s5 + $0x420] sm:$0xff]  ;;  %v7457_v11 = vld [vmem:[#allocation82_spill] sm:$0xff]  ;;  %2849 = vst [vmem:[%s6160_s27 + $0x380] sm:$0xff] %v7458_v15 }
 0x145   : > { %2526 = vst [vmem:[%s4886_s19 + $0x368] sm:$0xff] %v3736_v0  ;;  %3759 = vpow2.f32 %v2015_v59  ;;  %2848 = vst [vmem:[%s6160_s27 + $0x378] sm:$0xff] %v7457_v11  ;;  %v7460_v30 = vld [vmem:[#allocation85_spill] sm:$0xff]  ;;  %v7461_v36 = vld [vmem:[#allocation86_spill] sm:$0xff] }
 0x146   : > { %3761 = vtanh.f32 %v299_v37  ;;  %v310_v37 = vld [vmem:[%s4801_s5 + $0x428] sm:$0xff]  ;;  %2850 = vst [vmem:[%s6160_s27 + $0x388] sm:$0xff] %v7459_v23  ;;  %2851 = vst [vmem:[%s6160_s27 + $0x390] sm:$0xff] %v7460_v30  ;;  %v7462_v41 = vld [vmem:[#allocation87_spill] sm:$0xff] }
 0x147   : > { %v3738_v60 = vpop.eup %3737  ;;  %3763 = vtanh.f32 %v300_v17  ;;  %v311_v17 = vld [vmem:[%s4801_s5 + $0x430] sm:$0xff]  ;;  %2852 = vst [vmem:[%s6160_s27 + $0x398] sm:$0xff] %v7461_v36  ;;  %2853 = vst [vmem:[%s6160_s27 + $0x3a0] sm:$0xff] %v7462_v41  ;;  %v7463_v46 = vld [vmem:[#allocation88_spill] sm:$0xff] }
 0x148   : > { %v3740_v42 = vpop.eup %3739  ;;  %2527 = vst [vmem:[%s4886_s19 + $0x370] sm:$0xff] %v3738_v60  ;;  %3765 = vtanh.f32 %v301_v4  ;;  %v312_v60 = vld [vmem:[%s4801_s5 + $0x438] sm:$0xff]  ;;  %2854 = vst [vmem:[%s6160_s27 + $0x3a8] sm:$0xff] %v7463_v46  ;;  %v7464_v55 = vld [vmem:[#allocation89_spill] sm:$0xff] }
 0x149   : > { %v3742_v27 = vpop.eup %3741  ;;  %2528 = vst [vmem:[%s4886_s19 + $0x378] sm:$0xff] %v3740_v42  ;;  %3767 = vtanh.f32 %v302_v54  ;;  %2855 = vst [vmem:[%s6160_s27 + $0x3b0] sm:$0xff] %v7464_v55  ;;  %v7465_v62 = vld [vmem:[#allocation90_spill] sm:$0xff] }
 0x14a   : > { %v3744_v32 = vpop.eup %3743  ;;  %2529 = vst [vmem:[%s4886_s19 + $0x380] sm:$0xff] %v3742_v27  ;;  %3769 = vtanh.f32 %v303_v48  ;;  %2856 = vst [vmem:[%s6160_s27 + $0x3b8] sm:$0xff] %v7465_v62 }
 0x14b   : > { %v3746_v43 = vpop.eup %3745  ;;  %2530 = vst [vmem:[%s4886_s19 + $0x388] sm:$0xff] %v3744_v32  ;;  %3771 = vtanh.f32 %v304_v40  ;;  %v313_v40 = vld [vmem:[%s4801_s5 + $0x440] sm:$0xff]  ;;  %v314_v32 = vld [vmem:[%s4801_s5 + $0x448] sm:$0xff] }
 0x14c   : > { %v3748_v12 = vpop.eup %3747  ;;  %2531 = vst [vmem:[%s4886_s19 + $0x390] sm:$0xff] %v3746_v43  ;;  %3773 = vtanh.f32 %v305_v56 }
 0x14d   : > { %v3750_v14 = vpop.eup %3749  ;;  %2532 = vst [vmem:[%s4886_s19 + $0x398] sm:$0xff] %v3748_v12  ;;  %3775 = vtanh.f32 %v306_v2 }
 0x14e   : > { %v3752_v59 = vpop.eup %3751  ;;  %2533 = vst [vmem:[%s4886_s19 + $0x3a0] sm:$0xff] %v3750_v14  ;;  %3777 = vtanh.f32 %v307_v63  ;;  %v315_v63 = vld [vmem:[%s4801_s5 + $0x450] sm:$0xff] }
 0x14f   : > { %v5421_v0 = vpop.eup %3753  ;;  %2534 = vst [vmem:[%s4886_s19 + $0x3a8] sm:$0xff] %v3752_v59  ;;  %3779 = vtanh.f32 %v308_v7 }
 0x150   : > { %7250 = vst [vmem:[#allocation91_spill] sm:$0xff] %v5421_v0  ;;  %v5425_v4 = vpop.eup %3755  ;;  %v937_v54 = vadd.f32 1.0, %v5421_v0  ;;  %3781 = vtanh.f32 %v309_v25  ;;  %v316_v25 = vld [vmem:[%s4801_s5 + $0x458] sm:$0xff] }
 0x151   : > { %7251 = vst [vmem:[#allocation92_spill] sm:$0xff] %v5425_v4  ;;  %v3758_v48 = vpop.eup %3757  ;;  %v938_v42 = vadd.f32 1.0, %v5425_v4  ;;  %3783 = vtanh.f32 %v310_v37 }
 0x152   : > { %v3760_v27 = vpop.eup %3759  ;;  %2535 = vst [vmem:[%s4886_s19 + $0x3b0] sm:$0xff] %v3758_v48  ;;  %v1257_v56 = vmul.f32 3.5, %v937_v54  ;;  %3785 = vtanh.f32 %v311_v17 }
 0x153   : > { %v5433_v2 = vpop.eup %3761  ;;  %2536 = vst [vmem:[%s4886_s19 + $0x3b8] sm:$0xff] %v3760_v27  ;;  %v1258_v43 = vmul.f32 3.5, %v938_v42  ;;  %3787 = vtanh.f32 %v312_v60 }
 0x154   : > { %7252 = vst [vmem:[#allocation93_spill] sm:$0xff] %v5433_v2  ;;  %v5437_v12 = vpop.eup %3763  ;;  %v1577_v7 = vadd.f32 -5.0, %v1257_v56  ;;  %v939_v14 = vadd.f32 1.0, %v5433_v2  ;;  %3789 = vtanh.f32 %v313_v40 }
 0x155   : > { %7253 = vst [vmem:[#allocation94_spill] sm:$0xff] %v5437_v12  ;;  %v5441_v59 = vpop.eup %3765  ;;  %v1578_v37 = vadd.f32 -5.0, %v1258_v43  ;;  %v940_v54 = vadd.f32 1.0, %v5437_v12  ;;  %3791 = vtanh.f32 %v314_v32 }
 0x156   : > { %7254 = vst [vmem:[#allocation95_spill] sm:$0xff] %v5441_v59  ;;  %v5444_v17 = vpop.eup %3767  ;;  %v2017_v48 = vmul.f32 1.442695, %v1577_v7  ;;  %v1259_v27 = vmul.f32 3.5, %v939_v14  ;;  %v941_v60 = vadd.f32 1.0, %v5441_v59  ;;  %3793 = vtanh.f32 %v315_v63 }
 0x157   : > { %7255 = vst [vmem:[#allocation96_spill] sm:$0xff] %v5444_v17  ;;  %v5447_v42 = vpop.eup %3769  ;;  %v2019_v56 = vmul.f32 1.442695, %v1578_v37  ;;  %v1260_v4 = vmul.f32 3.5, %v940_v54  ;;  %v942_v40 = vadd.f32 1.0, %v5444_v17  ;;  %3795 = vtanh.f32 %v316_v25  ;;  %v7466_v3 = vld [vmem:[#allocation91_spill] sm:$0xff] }
 0x158   : > { %7256 = vst [vmem:[#allocation97_spill] sm:$0xff] %v5447_v42  ;;  %v5450_v2 = vpop.eup %3771  ;;  %3797 = vpow2.f32 %v2017_v48  ;;  %v1579_v43 = vadd.f32 -5.0, %v1259_v27  ;;  %v1261_v12 = vmul.f32 3.5, %v941_v60  ;;  %v943_v32 = vadd.f32 1.0, %v5447_v42  ;;  %2857 = vst [vmem:[%s6160_s27 + $0x3c0] sm:$0xff] %v7466_v3  ;;  %v7467_v10 = vld [vmem:[#allocation92_spill] sm:$0xff] }
 0x159   : > { %7257 = vst [vmem:[#allocation98_spill] sm:$0xff] %v5450_v2  ;;  %v5453_v0 = vpop.eup %3773  ;;  %3799 = vpow2.f32 %v2019_v56  ;;  %v1580_v7 = vadd.f32 -5.0, %v1260_v4  ;;  %v1262_v14 = vmul.f32 3.5, %v942_v40  ;;  %v944_v63 = vadd.f32 1.0, %v5450_v2  ;;  %2858 = vst [vmem:[%s6160_s27 + $0x3c8] sm:$0xff] %v7467_v10 }
 0x15a   : > { %7258 = vst [vmem:[#allocation99_spill] sm:$0xff] %v5453_v0  ;;  %v5456_v59 = vpop.eup %3775  ;;  %v2021_v37 = vmul.f32 1.442695, %v1579_v43  ;;  %v1581_v54 = vadd.f32 -5.0, %v1261_v12  ;;  %v1263_v17 = vmul.f32 3.5, %v943_v32  ;;  %v945_v25 = vadd.f32 1.0, %v5453_v0 }
 0x15b   : > { %7259 = vst [vmem:[#allocation100_spill] sm:$0xff] %v5456_v59  ;;  %v5459_v34 = vpop.eup %3777  ;;  %v2023_v48 = vmul.f32 1.442695, %v1580_v7  ;;  %v1582_v27 = vadd.f32 -5.0, %v1262_v14  ;;  %v1264_v60 = vmul.f32 3.5, %v944_v63  ;;  %v946_v42 = vadd.f32 1.0, %v5456_v59 }
 0x15c   : > { %7260 = vst [vmem:[#allocation101_spill] sm:$0xff] %v5459_v34  ;;  %v5462_v58 = vpop.eup %3779  ;;  %3801 = vpow2.f32 %v2021_v37  ;;  %v2025_v4 = vmul.f32 1.442695, %v1581_v54  ;;  %v1583_v56 = vadd.f32 -5.0, %v1263_v17  ;;  %v1265_v40 = vmul.f32 3.5, %v945_v25  ;;  %v7468_v20 = vld [vmem:[#allocation93_spill] sm:$0xff] }
 0x15d   : > { %7261 = vst [vmem:[#allocation102_spill] sm:$0xff] %v5462_v58  ;;  %v5464_v2 = vpop.eup %3781  ;;  %3803 = vpow2.f32 %v2023_v48  ;;  %v2027_v12 = vmul.f32 1.442695, %v1582_v27  ;;  %v1584_v43 = vadd.f32 -5.0, %v1264_v60  ;;  %v1266_v32 = vmul.f32 3.5, %v946_v42  ;;  %2859 = vst [vmem:[%s6160_s27 + $0x3d0] sm:$0xff] %v7468_v20 }
 0x15e   : > { %7262 = vst [vmem:[#allocation103_spill] sm:$0xff] %v5464_v2  ;;  %v5466_v0 = vpop.eup %3783  ;;  %3805 = vpow2.f32 %v2025_v4  ;;  %v2029_v7 = vmul.f32 1.442695, %v1583_v56  ;;  %v1585_v14 = vadd.f32 -5.0, %v1265_v40  ;;  %v947_v63 = vadd.f32 1.0, %v5459_v34  ;;  %v7469_v29 = vld [vmem:[#allocation94_spill] sm:$0xff] }
 0x15f   : > { %7263 = vst [vmem:[#allocation104_spill] sm:$0xff] %v5466_v0  ;;  %v5469_v59 = vpop.eup %3785  ;;  %3807 = vpow2.f32 %v2027_v12  ;;  %v2031_v37 = vmul.f32 1.442695, %v1584_v43  ;;  %v1586_v54 = vadd.f32 -5.0, %v1266_v32  ;;  %v948_v17 = vadd.f32 1.0, %v5462_v58  ;;  %2860 = vst [vmem:[%s6160_s27 + $0x3d8] sm:$0xff] %v7469_v29 }
 0x160   : > { %7264 = vst [vmem:[#allocation105_spill] sm:$0xff] %v5469_v59  ;;  %v5472_v25 = vpop.eup %3787  ;;  %3809 = vpow2.f32 %v2029_v7  ;;  %v2033_v48 = vmul.f32 1.442695, %v1585_v14  ;;  %v1267_v27 = vmul.f32 3.5, %v947_v63  ;;  %v949_v42 = vadd.f32 1.0, %v5464_v2  ;;  %v7470_v38 = vld [vmem:[#allocation95_spill] sm:$0xff] }
 0x161   : > { %7265 = vst [vmem:[#allocation106_spill] sm:$0xff] %v5472_v25  ;;  %v5475_v60 = vpop.eup %3789  ;;  %3811 = vpow2.f32 %v2031_v37  ;;  %v2035_v4 = vmul.f32 1.442695, %v1586_v54  ;;  %v1268_v56 = vmul.f32 3.5, %v948_v17  ;;  %v950_v40 = vadd.f32 1.0, %v5466_v0  ;;  %2861 = vst [vmem:[%s6160_s27 + $0x3e0] sm:$0xff] %v7470_v38 }
 0x162   : > { %7266 = vst [vmem:[#allocation107_spill] sm:$0xff] %v5475_v60  ;;  %v5478_v34 = vpop.eup %3791  ;;  %3813 = vpow2.f32 %v2033_v48  ;;  %v1587_v12 = vadd.f32 -5.0, %v1267_v27  ;;  %v1269_v43 = vmul.f32 3.5, %v949_v42  ;;  %v951_v32 = vadd.f32 1.0, %v5469_v59  ;;  %v7471_v45 = vld [vmem:[#allocation96_spill] sm:$0xff]  ;;  %v7472_v6 = vld [vmem:[#allocation97_spill] sm:$0xff] }
 0x163   : > { %7267 = vst [vmem:[#allocation108_spill] sm:$0xff] %v5478_v34  ;;  %v5481_v58 = vpop.eup %3793  ;;  %3815 = vpow2.f32 %v2035_v4  ;;  %v1588_v7 = vadd.f32 -5.0, %v1268_v56  ;;  %v1270_v14 = vmul.f32 3.5, %v950_v40  ;;  %v952_v63 = vadd.f32 1.0, %v5472_v25  ;;  %2862 = vst [vmem:[%s6160_s27 + $0x3e8] sm:$0xff] %v7471_v45  ;;  %v7473_v22 = vld [vmem:[#allocation98_spill] sm:$0xff] }
 0x164   : > { %7268 = vst [vmem:[#allocation109_spill] sm:$0xff] %v5481_v58  ;;  %v5484_v37 = vpop.eup %3795  ;;  %v2037_v54 = vmul.f32 1.442695, %v1587_v12  ;;  %v1589_v17 = vadd.f32 -5.0, %v1269_v43  ;;  %v1271_v0 = vmul.f32 3.5, %v951_v32  ;;  %v953_v48 = vadd.f32 1.0, %v5475_v60 }
 0x165   : > { %7269 = vst [vmem:[#allocation110_spill] sm:$0xff] %v5484_v37  ;;  %v3798_v27 = vpop.eup %3797  ;;  %v2039_v42 = vmul.f32 1.442695, %v1588_v7  ;;  %v1590_v2 = vadd.f32 -5.0, %v1270_v14  ;;  %v1272_v59 = vmul.f32 3.5, %v952_v63  ;;  %v954_v51 = vadd.f32 1.0, %v5478_v34 }
 0x166   : > { %v3800_v47 = vpop.eup %3799  ;;  %2537 = vst [vmem:[%s4886_s19 + $0x3c0] sm:$0xff] %v3798_v27  ;;  %3817 = vpow2.f32 %v2037_v54  ;;  %v2041_v4 = vmul.f32 1.442695, %v1589_v17  ;;  %v1591_v56 = vadd.f32 -5.0, %v1271_v0  ;;  %v1273_v40 = vmul.f32 3.5, %v953_v48  ;;  %2863 = vst [vmem:[%s6160_s27 + $0x3f0] sm:$0xff] %v7472_v6 }
 0x167   : > { %2538 = vst [vmem:[%s4886_s19 + $0x3c8] sm:$0xff] %v3800_v47  ;;  %3819 = vpow2.f32 %v2039_v42  ;;  %v2043_v12 = vmul.f32 1.442695, %v1590_v2  ;;  %v1592_v43 = vadd.f32 -5.0, %v1272_v59  ;;  %v1274_v32 = vmul.f32 3.5, %v954_v51  ;;  %v317_v42 = vld [vmem:[%s4801_s5 + $0x460] sm:$0xff] }
 0x168   : > { %3821 = vpow2.f32 %v2041_v4  ;;  %v2045_v60 = vmul.f32 1.442695, %v1591_v56  ;;  %v1593_v7 = vadd.f32 -5.0, %v1273_v40  ;;  %v955_v14 = vadd.f32 1.0, %v5481_v58  ;;  %v318_v40 = vld [vmem:[%s4801_s5 + $0x468] sm:$0xff]  ;;  %2864 = vst [vmem:[%s6160_s27 + $0x3f8] sm:$0xff] %v7473_v22 }
 0x169   : > { %v3802_v63 = vpop.eup %3801  ;;  %3823 = vpow2.f32 %v2043_v12  ;;  %v2047_v54 = vmul.f32 1.442695, %v1592_v43  ;;  %v1594_v17 = vadd.f32 -5.0, %v1274_v32  ;;  %v956_v0 = vadd.f32 1.0, %v5484_v37  ;;  %v7482_v16 = vld [vmem:[#allocation107_spill] sm:$0xff] }
 0x16a   : > { %v3804_v47 = vpop.eup %3803  ;;  %2539 = vst [vmem:[%s4886_s19 + $0x3d0] sm:$0xff] %v3802_v63  ;;  %3825 = vpow2.f32 %v2045_v60  ;;  %v2049_v51 = vmul.f32 1.442695, %v1593_v7  ;;  %v1275_v2 = vmul.f32 3.5, %v955_v14  ;;  %v319_v63 = vld [vmem:[%s4801_s5 + $0x470] sm:$0xff]  ;;  %2873 = vst [vmem:[%s6160_s27 + $0x440] sm:$0xff] %v7482_v16 }
 0x16b   : > { %v3806_v59 = vpop.eup %3805  ;;  %2540 = vst [vmem:[%s4886_s19 + $0x3d8] sm:$0xff] %v3804_v47  ;;  %3827 = vpow2.f32 %v2047_v54  ;;  %v2051_v48 = vmul.f32 1.442695, %v1594_v17  ;;  %v1276_v27 = vmul.f32 3.5, %v956_v0  ;;  %v320_v17 = vld [vmem:[%s4801_s5 + $0x478] sm:$0xff]  ;;  %v321_v0 = vld [vmem:[%s4801_s5 + $0x480] sm:$0xff] }
 0x16c   : > { %v3808_v4 = vpop.eup %3807  ;;  %2541 = vst [vmem:[%s4886_s19 + $0x3e0] sm:$0xff] %v3806_v59  ;;  %3829 = vpow2.f32 %v2049_v51  ;;  %v1595_v56 = vadd.f32 -5.0, %v1275_v2  ;;  %v322_v47 = vld [vmem:[%s4801_s5 + $0x488] sm:$0xff]  ;;  %v323_v2 = vld [vmem:[%s4801_s5 + $0x490] sm:$0xff]  ;;  %v7485_v24 = vld [vmem:[#allocation110_spill] sm:$0xff] }
 0x16d   : > { %v3810_v12 = vpop.eup %3809  ;;  %2542 = vst [vmem:[%s4886_s19 + $0x3e8] sm:$0xff] %v3808_v4  ;;  %3831 = vpow2.f32 %v2051_v48  ;;  %v1596_v60 = vadd.f32 -5.0, %v1276_v27  ;;  %v324_v48 = vld [vmem:[%s4801_s5 + $0x498] sm:$0xff]  ;;  %v7483_v18 = vld [vmem:[#allocation108_spill] sm:$0xff]  ;;  %v7484_v21 = vld [vmem:[#allocation109_spill] sm:$0xff] }
 0x16e   : > { %v3812_v43 = vpop.eup %3811  ;;  %2543 = vst [vmem:[%s4886_s19 + $0x3f0] sm:$0xff] %v3810_v12  ;;  %v2053_v32 = vmul.f32 1.442695, %v1595_v56  ;;  %3833 = vtanh.f32 %v317_v42  ;;  %v325_v42 = vld [vmem:[%s4801_s5 + $0x4a0] sm:$0xff]  ;;  %v326_v56 = vld [vmem:[%s4801_s5 + $0x4a8] sm:$0xff]  ;;  %v327_v12 = vld [vmem:[%s4801_s5 + $0x4b0] sm:$0xff] }
 0x16f   : > { %v3814_v7 = vpop.eup %3813  ;;  %2544 = vst [vmem:[%s4886_s19 + $0x3f8] sm:$0xff] %v3812_v43  ;;  %v2055_v14 = vmul.f32 1.442695, %v1596_v60  ;;  %3835 = vtanh.f32 %v318_v40  ;;  %v328_v43 = vld [vmem:[%s4801_s5 + $0x4b8] sm:$0xff]  ;;  %2874 = vst [vmem:[%s6160_s27 + $0x448] sm:$0xff] %v7483_v18 }
 0x170   : > { %v3816_v54 = vpop.eup %3815  ;;  %2545 = vst [vmem:[%s4886_s19 + $0x400] sm:$0xff] %v3814_v7  ;;  %3837 = vpow2.f32 %v2053_v32  ;;  %v329_v7 = vld [vmem:[%s4801_s5 + $0x4c0] sm:$0xff]  ;;  %2875 = vst [vmem:[%s6160_s27 + $0x450] sm:$0xff] %v7484_v21 }
 0x171   : > { %2546 = vst [vmem:[%s4886_s19 + $0x408] sm:$0xff] %v3816_v54  ;;  %3839 = vpow2.f32 %v2055_v14  ;;  %2876 = vst [vmem:[%s6160_s27 + $0x458] sm:$0xff] %v7485_v24 }
 0x172   : > { %3841 = vtanh.f32 %v319_v63  ;;  %v330_v63 = vld [vmem:[%s4801_s5 + $0x4c8] sm:$0xff] }
 0x173   : > { %v3818_v51 = vpop.eup %3817  ;;  %3843 = vtanh.f32 %v320_v17  ;;  %v331_v17 = vld [vmem:[%s4801_s5 + $0x4d0] sm:$0xff] }
 0x174   : > { %v3820_v59 = vpop.eup %3819  ;;  %2547 = vst [vmem:[%s4886_s19 + $0x410] sm:$0xff] %v3818_v51  ;;  %3845 = vtanh.f32 %v321_v0  ;;  %v332_v51 = vld [vmem:[%s4801_s5 + $0x4d8] sm:$0xff] }
 0x175   : > { %v3822_v27 = vpop.eup %3821  ;;  %2548 = vst [vmem:[%s4886_s19 + $0x418] sm:$0xff] %v3820_v59  ;;  %3847 = vtanh.f32 %v322_v47 }
 0x176   : > { %v3824_v4 = vpop.eup %3823  ;;  %2549 = vst [vmem:[%s4886_s19 + $0x420] sm:$0xff] %v3822_v27  ;;  %3849 = vtanh.f32 %v323_v2 }
 0x177   : > { %v3826_v40 = vpop.eup %3825  ;;  %2550 = vst [vmem:[%s4886_s19 + $0x428] sm:$0xff] %v3824_v4  ;;  %3851 = vtanh.f32 %v324_v48  ;;  %v333_v48 = vld [vmem:[%s4801_s5 + $0x4e0] sm:$0xff]  ;;  %v334_v4 = vld [vmem:[%s4801_s5 + $0x4e8] sm:$0xff] }
 0x178   : > { %v3828_v60 = vpop.eup %3827  ;;  %2551 = vst [vmem:[%s4886_s19 + $0x430] sm:$0xff] %v3826_v40  ;;  %3853 = vtanh.f32 %v325_v42 }
 0x179   : > { %v3830_v32 = vpop.eup %3829  ;;  %2552 = vst [vmem:[%s4886_s19 + $0x438] sm:$0xff] %v3828_v60  ;;  %3855 = vtanh.f32 %v326_v56 }
 0x17a   : > { %v3832_v14 = vpop.eup %3831  ;;  %2553 = vst [vmem:[%s4886_s19 + $0x440] sm:$0xff] %v3830_v32  ;;  %3857 = vtanh.f32 %v327_v12  ;;  %v335_v12 = vld [vmem:[%s4801_s5 + $0x4f0] sm:$0xff] }
 0x17b   : > { %v5521_v54 = vpop.eup %3833  ;;  %2554 = vst [vmem:[%s4886_s19 + $0x448] sm:$0xff] %v3832_v14  ;;  %3859 = vtanh.f32 %v328_v43 }
 0x17c   : > { %7270 = vst [vmem:[#allocation111_spill] sm:$0xff] %v5521_v54  ;;  %v5525_v0 = vpop.eup %3835  ;;  %v957_v47 = vadd.f32 1.0, %v5521_v54  ;;  %3861 = vtanh.f32 %v329_v7  ;;  %v336_v7 = vld [vmem:[%s4801_s5 + $0x4f8] sm:$0xff] }
 0x17d   : > { %7271 = vst [vmem:[#allocation112_spill] sm:$0xff] %v5525_v0  ;;  %v3838_v2 = vpop.eup %3837  ;;  %v958_v59 = vadd.f32 1.0, %v5525_v0  ;;  %3863 = vtanh.f32 %v330_v63 }
 0x17e   : > { %v3840_v27 = vpop.eup %3839  ;;  %2555 = vst [vmem:[%s4886_s19 + $0x450] sm:$0xff] %v3838_v2  ;;  %v1277_v42 = vmul.f32 3.5, %v957_v47  ;;  %3865 = vtanh.f32 %v331_v17 }
 0x17f   : > { %v5533_v56 = vpop.eup %3841  ;;  %2556 = vst [vmem:[%s4886_s19 + $0x458] sm:$0xff] %v3840_v27  ;;  %v1278_v40 = vmul.f32 3.5, %v958_v59  ;;  %3867 = vtanh.f32 %v332_v51 }
 0x180   : > { %7272 = vst [vmem:[#allocation113_spill] sm:$0xff] %v5533_v56  ;;  %v5537_v60 = vpop.eup %3843  ;;  %v1597_v43 = vadd.f32 -5.0, %v1277_v42  ;;  %v959_v32 = vadd.f32 1.0, %v5533_v56  ;;  %3869 = vtanh.f32 %v333_v48 }
 0x181   : > { %7273 = vst [vmem:[#allocation114_spill] sm:$0xff] %v5537_v60  ;;  %v5541_v14 = vpop.eup %3845  ;;  %v1598_v63 = vadd.f32 -5.0, %v1278_v40  ;;  %v960_v47 = vadd.f32 1.0, %v5537_v60  ;;  %3871 = vtanh.f32 %v334_v4 }
 0x182   : > { %7274 = vst [vmem:[#allocation115_spill] sm:$0xff] %v5541_v14  ;;  %v5544_v17 = vpop.eup %3847  ;;  %v2057_v2 = vmul.f32 1.442695, %v1597_v43  ;;  %v1279_v27 = vmul.f32 3.5, %v959_v32  ;;  %v961_v51 = vadd.f32 1.0, %v5541_v14  ;;  %3873 = vtanh.f32 %v335_v12 }
 0x183   : > { %7275 = vst [vmem:[#allocation116_spill] sm:$0xff] %v5544_v17  ;;  %v5547_v59 = vpop.eup %3849  ;;  %v2059_v42 = vmul.f32 1.442695, %v1598_v63  ;;  %v1280_v0 = vmul.f32 3.5, %v960_v47  ;;  %v962_v48 = vadd.f32 1.0, %v5544_v17  ;;  %3875 = vtanh.f32 %v336_v7  ;;  %v7486_v28 = vld [vmem:[#allocation111_spill] sm:$0xff] }
 0x184   : > { %7276 = vst [vmem:[#allocation117_spill] sm:$0xff] %v5547_v59  ;;  %v5550_v56 = vpop.eup %3851  ;;  %3877 = vpow2.f32 %v2057_v2  ;;  %v1599_v40 = vadd.f32 -5.0, %v1279_v27  ;;  %v1281_v60 = vmul.f32 3.5, %v961_v51  ;;  %v963_v4 = vadd.f32 1.0, %v5547_v59  ;;  %2877 = vst [vmem:[%s6160_s27 + $0x460] sm:$0xff] %v7486_v28  ;;  %v7487_v31 = vld [vmem:[#allocation112_spill] sm:$0xff] }
 0x185   : > { %7277 = vst [vmem:[#allocation118_spill] sm:$0xff] %v5550_v56  ;;  %v5553_v54 = vpop.eup %3853  ;;  %3879 = vpow2.f32 %v2059_v42  ;;  %v1600_v43 = vadd.f32 -5.0, %v1280_v0  ;;  %v1282_v32 = vmul.f32 3.5, %v962_v48  ;;  %v964_v12 = vadd.f32 1.0, %v5550_v56  ;;  %2878 = vst [vmem:[%s6160_s27 + $0x468] sm:$0xff] %v7487_v31 }
 0x186   : > { %7278 = vst [vmem:[#allocation119_spill] sm:$0xff] %v5553_v54  ;;  %v5556_v14 = vpop.eup %3855  ;;  %v2061_v63 = vmul.f32 1.442695, %v1599_v40  ;;  %v1601_v47 = vadd.f32 -5.0, %v1281_v60  ;;  %v1283_v17 = vmul.f32 3.5, %v963_v4  ;;  %v965_v7 = vadd.f32 1.0, %v5553_v54 }
 0x187   : > { %7279 = vst [vmem:[#allocation120_spill] sm:$0xff] %v5556_v14  ;;  %v5559_v37 = vpop.eup %3857  ;;  %v2063_v2 = vmul.f32 1.442695, %v1600_v43  ;;  %v1602_v27 = vadd.f32 -5.0, %v1282_v32  ;;  %v1284_v51 = vmul.f32 3.5, %v964_v12  ;;  %v966_v59 = vadd.f32 1.0, %v5556_v14 }
 0x188   : > { %7280 = vst [vmem:[#allocation121_spill] sm:$0xff] %v5559_v37  ;;  %v5562_v58 = vpop.eup %3859  ;;  %3881 = vpow2.f32 %v2061_v63  ;;  %v2065_v0 = vmul.f32 1.442695, %v1601_v47  ;;  %v1603_v42 = vadd.f32 -5.0, %v1283_v17  ;;  %v1285_v48 = vmul.f32 3.5, %v965_v7  ;;  %v7488_v35 = vld [vmem:[#allocation113_spill] sm:$0xff] }
 0x189   : > { %7281 = vst [vmem:[#allocation122_spill] sm:$0xff] %v5562_v58  ;;  %v5564_v56 = vpop.eup %3861  ;;  %3883 = vpow2.f32 %v2063_v2  ;;  %v2067_v60 = vmul.f32 1.442695, %v1602_v27  ;;  %v1604_v40 = vadd.f32 -5.0, %v1284_v51  ;;  %v1286_v4 = vmul.f32 3.5, %v966_v59  ;;  %2879 = vst [vmem:[%s6160_s27 + $0x470] sm:$0xff] %v7488_v35 }
 0x18a   : > { %7282 = vst [vmem:[#allocation123_spill] sm:$0xff] %v5564_v56  ;;  %v5566_v54 = vpop.eup %3863  ;;  %3885 = vpow2.f32 %v2065_v0  ;;  %v2069_v43 = vmul.f32 1.442695, %v1603_v42  ;;  %v1605_v32 = vadd.f32 -5.0, %v1285_v48  ;;  %v967_v12 = vadd.f32 1.0, %v5559_v37  ;;  %v7489_v39 = vld [vmem:[#allocation114_spill] sm:$0xff] }
 0x18b   : > { %7283 = vst [vmem:[#allocation124_spill] sm:$0xff] %v5566_v54  ;;  %v5569_v14 = vpop.eup %3865  ;;  %3887 = vpow2.f32 %v2067_v60  ;;  %v2071_v63 = vmul.f32 1.442695, %v1604_v40  ;;  %v1606_v47 = vadd.f32 -5.0, %v1286_v4  ;;  %v968_v17 = vadd.f32 1.0, %v5562_v58  ;;  %2880 = vst [vmem:[%s6160_s27 + $0x478] sm:$0xff] %v7489_v39 }
 0x18c   : > { %7284 = vst [vmem:[#allocation125_spill] sm:$0xff] %v5569_v14  ;;  %v5572_v7 = vpop.eup %3867  ;;  %3889 = vpow2.f32 %v2069_v43  ;;  %v2073_v2 = vmul.f32 1.442695, %v1605_v32  ;;  %v1287_v27 = vmul.f32 3.5, %v967_v12  ;;  %v969_v59 = vadd.f32 1.0, %v5564_v56  ;;  %v7490_v44 = vld [vmem:[#allocation115_spill] sm:$0xff] }
 0x18d   : > { %7285 = vst [vmem:[#allocation126_spill] sm:$0xff] %v5572_v7  ;;  %v5575_v51 = vpop.eup %3869  ;;  %3891 = vpow2.f32 %v2071_v63  ;;  %v2075_v0 = vmul.f32 1.442695, %v1606_v47  ;;  %v1288_v42 = vmul.f32 3.5, %v968_v17  ;;  %v970_v48 = vadd.f32 1.0, %v5566_v54  ;;  %2881 = vst [vmem:[%s6160_s27 + $0x480] sm:$0xff] %v7490_v44 }
 0x18e   : > { %7286 = vst [vmem:[#allocation127_spill] sm:$0xff] %v5575_v51  ;;  %v5578_v37 = vpop.eup %3871  ;;  %3893 = vpow2.f32 %v2073_v2  ;;  %v1607_v60 = vadd.f32 -5.0, %v1287_v27  ;;  %v1289_v40 = vmul.f32 3.5, %v969_v59  ;;  %v971_v4 = vadd.f32 1.0, %v5569_v14  ;;  %v7491_v49 = vld [vmem:[#allocation116_spill] sm:$0xff]  ;;  %v7492_v53 = vld [vmem:[#allocation117_spill] sm:$0xff] }
 0x18f   : > { %7287 = vst [vmem:[#allocation128_spill] sm:$0xff] %v5578_v37  ;;  %v5581_v58 = vpop.eup %3873  ;;  %3895 = vpow2.f32 %v2075_v0  ;;  %v1608_v43 = vadd.f32 -5.0, %v1288_v42  ;;  %v1290_v32 = vmul.f32 3.5, %v970_v48  ;;  %v972_v12 = vadd.f32 1.0, %v5572_v7  ;;  %2882 = vst [vmem:[%s6160_s27 + $0x488] sm:$0xff] %v7491_v49  ;;  %v7493_v57 = vld [vmem:[#allocation118_spill] sm:$0xff] }
 0x190   : > { %7288 = vst [vmem:[#allocation129_spill] sm:$0xff] %v5581_v58  ;;  %v5584_v63 = vpop.eup %3875  ;;  %v2077_v47 = vmul.f32 1.442695, %v1607_v60  ;;  %v1609_v17 = vadd.f32 -5.0, %v1289_v40  ;;  %v1291_v54 = vmul.f32 3.5, %v971_v4  ;;  %v973_v2 = vadd.f32 1.0, %v5575_v51 }
 0x191   : > { %7289 = vst [vmem:[#allocation130_spill] sm:$0xff] %v5584_v63  ;;  %v3878_v27 = vpop.eup %3877  ;;  %v2079_v59 = vmul.f32 1.442695, %v1608_v43  ;;  %v1610_v56 = vadd.f32 -5.0, %v1290_v32  ;;  %v1292_v14 = vmul.f32 3.5, %v972_v12  ;;  %v974_v34 = vadd.f32 1.0, %v5578_v37 }
 0x192   : > { %v3880_v25 = vpop.eup %3879  ;;  %2557 = vst [vmem:[%s4886_s19 + $0x460] sm:$0xff] %v3878_v27  ;;  %3897 = vpow2.f32 %v2077_v47  ;;  %v2081_v0 = vmul.f32 1.442695, %v1609_v17  ;;  %v1611_v42 = vadd.f32 -5.0, %v1291_v54  ;;  %v1293_v48 = vmul.f32 3.5, %v973_v2  ;;  %2883 = vst [vmem:[%s6160_s27 + $0x490] sm:$0xff] %v7492_v53 }
 0x193   : > { %2558 = vst [vmem:[%s4886_s19 + $0x468] sm:$0xff] %v3880_v25  ;;  %3899 = vpow2.f32 %v2079_v59  ;;  %v2083_v60 = vmul.f32 1.442695, %v1610_v56  ;;  %v1612_v40 = vadd.f32 -5.0, %v1292_v14  ;;  %v1294_v4 = vmul.f32 3.5, %v974_v34  ;;  %v337_v59 = vld [vmem:[%s4801_s5 + $0x500] sm:$0xff] }
 0x194   : > { %3901 = vpow2.f32 %v2081_v0  ;;  %v2085_v51 = vmul.f32 1.442695, %v1611_v42  ;;  %v1613_v43 = vadd.f32 -5.0, %v1293_v48  ;;  %v975_v32 = vadd.f32 1.0, %v5581_v58  ;;  %v338_v48 = vld [vmem:[%s4801_s5 + $0x508] sm:$0xff]  ;;  %2884 = vst [vmem:[%s6160_s27 + $0x498] sm:$0xff] %v7493_v57 }
 0x195   : > { %v3882_v12 = vpop.eup %3881  ;;  %3903 = vpow2.f32 %v2083_v60  ;;  %v2087_v47 = vmul.f32 1.442695, %v1612_v40  ;;  %v1614_v17 = vadd.f32 -5.0, %v1294_v4  ;;  %v976_v54 = vadd.f32 1.0, %v5584_v63  ;;  %v7494_v61 = vld [vmem:[#allocation119_spill] sm:$0xff]  ;;  %v7495_v1 = vld [vmem:[#allocation120_spill] sm:$0xff] }
 0x196   : > { %v3884_v25 = vpop.eup %3883  ;;  %2559 = vst [vmem:[%s4886_s19 + $0x470] sm:$0xff] %v3882_v12  ;;  %3905 = vpow2.f32 %v2085_v51  ;;  %v2089_v34 = vmul.f32 1.442695, %v1613_v43  ;;  %v1295_v56 = vmul.f32 3.5, %v975_v32  ;;  %v339_v12 = vld [vmem:[%s4801_s5 + $0x510] sm:$0xff]  ;;  %2885 = vst [vmem:[%s6160_s27 + $0x4a0] sm:$0xff] %v7494_v61 }
 0x197   : > { %v3886_v14 = vpop.eup %3885  ;;  %2560 = vst [vmem:[%s4886_s19 + $0x478] sm:$0xff] %v3884_v25  ;;  %3907 = vpow2.f32 %v2087_v47  ;;  %v2091_v2 = vmul.f32 1.442695, %v1614_v17  ;;  %v1296_v27 = vmul.f32 3.5, %v976_v54  ;;  %v340_v17 = vld [vmem:[%s4801_s5 + $0x518] sm:$0xff]  ;;  %v341_v54 = vld [vmem:[%s4801_s5 + $0x520] sm:$0xff] }
 0x198   : > { %v3888_v0 = vpop.eup %3887  ;;  %2561 = vst [vmem:[%s4886_s19 + $0x480] sm:$0xff] %v3886_v14  ;;  %3909 = vpow2.f32 %v2089_v34  ;;  %v1615_v42 = vadd.f32 -5.0, %v1295_v56  ;;  %v342_v25 = vld [vmem:[%s4801_s5 + $0x528] sm:$0xff]  ;;  %v343_v56 = vld [vmem:[%s4801_s5 + $0x530] sm:$0xff]  ;;  %2886 = vst [vmem:[%s6160_s27 + $0x4a8] sm:$0xff] %v7495_v1 }
 0x199   : > { %v3890_v60 = vpop.eup %3889  ;;  %2562 = vst [vmem:[%s4886_s19 + $0x488] sm:$0xff] %v3888_v0  ;;  %3911 = vpow2.f32 %v2091_v2  ;;  %v1616_v51 = vadd.f32 -5.0, %v1296_v27  ;;  %v344_v2 = vld [vmem:[%s4801_s5 + $0x538] sm:$0xff]  ;;  %v7496_v5 = vld [vmem:[#allocation121_spill] sm:$0xff]  ;;  %v7498_v13 = vld [vmem:[#allocation123_spill] sm:$0xff] }
 0x19a   : > { %v3892_v40 = vpop.eup %3891  ;;  %2563 = vst [vmem:[%s4886_s19 + $0x490] sm:$0xff] %v3890_v60  ;;  %v2093_v4 = vmul.f32 1.442695, %v1615_v42  ;;  %3913 = vtanh.f32 %v337_v59  ;;  %v345_v59 = vld [vmem:[%s4801_s5 + $0x540] sm:$0xff]  ;;  %v346_v42 = vld [vmem:[%s4801_s5 + $0x548] sm:$0xff]  ;;  %v347_v60 = vld [vmem:[%s4801_s5 + $0x550] sm:$0xff] }
 0x19b   : > { %v3894_v43 = vpop.eup %3893  ;;  %2564 = vst [vmem:[%s4886_s19 + $0x498] sm:$0xff] %v3892_v40  ;;  %v2095_v32 = vmul.f32 1.442695, %v1616_v51  ;;  %3915 = vtanh.f32 %v338_v48  ;;  %v348_v40 = vld [vmem:[%s4801_s5 + $0x558] sm:$0xff]  ;;  %2887 = vst [vmem:[%s6160_s27 + $0x4b0] sm:$0xff] %v7496_v5  ;;  %v7499_v19 = vld [vmem:[#allocation124_spill] sm:$0xff] }
 0x19c   : > { %v3896_v47 = vpop.eup %3895  ;;  %2565 = vst [vmem:[%s4886_s19 + $0x4a0] sm:$0xff] %v3894_v43  ;;  %3917 = vpow2.f32 %v2093_v4  ;;  %v349_v43 = vld [vmem:[%s4801_s5 + $0x560] sm:$0xff]  ;;  %v7497_v9 = vld [vmem:[#allocation122_spill] sm:$0xff]  ;;  %2889 = vst [vmem:[%s6160_s27 + $0x4c0] sm:$0xff] %v7498_v13 }
 0x19d   : > { %2566 = vst [vmem:[%s4886_s19 + $0x4a8] sm:$0xff] %v3896_v47  ;;  %3919 = vpow2.f32 %v2095_v32  ;;  %2888 = vst [vmem:[%s6160_s27 + $0x4b8] sm:$0xff] %v7497_v9  ;;  %v7500_v26 = vld [vmem:[#allocation125_spill] sm:$0xff]  ;;  %v7501_v33 = vld [vmem:[#allocation126_spill] sm:$0xff] }
 0x19e   : > { %3921 = vtanh.f32 %v339_v12  ;;  %v350_v12 = vld [vmem:[%s4801_s5 + $0x568] sm:$0xff]  ;;  %2890 = vst [vmem:[%s6160_s27 + $0x4c8] sm:$0xff] %v7499_v19  ;;  %2891 = vst [vmem:[%s6160_s27 + $0x4d0] sm:$0xff] %v7500_v26  ;;  %v7502_v50 = vld [vmem:[#allocation127_spill] sm:$0xff] }
 0x19f   : > { %v3898_v34 = vpop.eup %3897  ;;  %3923 = vtanh.f32 %v340_v17  ;;  %v351_v17 = vld [vmem:[%s4801_s5 + $0x570] sm:$0xff]  ;;  %2892 = vst [vmem:[%s6160_s27 + $0x4d8] sm:$0xff] %v7501_v33  ;;  %2893 = vst [vmem:[%s6160_s27 + $0x4e0] sm:$0xff] %v7502_v50  ;;  %v7503_v52 = vld [vmem:[#allocation128_spill] sm:$0xff] }
 0x1a0   : > { %v3900_v14 = vpop.eup %3899  ;;  %2567 = vst [vmem:[%s4886_s19 + $0x4b0] sm:$0xff] %v3898_v34  ;;  %3925 = vtanh.f32 %v341_v54  ;;  %v352_v34 = vld [vmem:[%s4801_s5 + $0x578] sm:$0xff]  ;;  %2894 = vst [vmem:[%s6160_s27 + $0x4e8] sm:$0xff] %v7503_v52  ;;  %v7504_v8 = vld [vmem:[#allocation129_spill] sm:$0xff] }
 0x1a1   : > { %v3902_v27 = vpop.eup %3901  ;;  %2568 = vst [vmem:[%s4886_s19 + $0x4b8] sm:$0xff] %v3900_v14  ;;  %3927 = vtanh.f32 %v342_v25  ;;  %2895 = vst [vmem:[%s6160_s27 + $0x4f0] sm:$0xff] %v7504_v8  ;;  %v7505_v11 = vld [vmem:[#allocation130_spill] sm:$0xff] }
 0x1a2   : > { %v3904_v0 = vpop.eup %3903  ;;  %2569 = vst [vmem:[%s4886_s19 + $0x4c0] sm:$0xff] %v3902_v27  ;;  %3929 = vtanh.f32 %v343_v56  ;;  %2896 = vst [vmem:[%s6160_s27 + $0x4f8] sm:$0xff] %v7505_v11 }
 0x1a3   : > { %v3906_v48 = vpop.eup %3905  ;;  %2570 = vst [vmem:[%s4886_s19 + $0x4c8] sm:$0xff] %v3904_v0  ;;  %3931 = vtanh.f32 %v344_v2  ;;  %v353_v2 = vld [vmem:[%s4801_s5 + $0x580] sm:$0xff]  ;;  %v354_v0 = vld [vmem:[%s4801_s5 + $0x588] sm:$0xff] }
 0x1a4   : > { %v3908_v51 = vpop.eup %3907  ;;  %2571 = vst [vmem:[%s4886_s19 + $0x4d0] sm:$0xff] %v3906_v48  ;;  %3933 = vtanh.f32 %v345_v59 }
 0x1a5   : > { %v3910_v4 = vpop.eup %3909  ;;  %2572 = vst [vmem:[%s4886_s19 + $0x4d8] sm:$0xff] %v3908_v51  ;;  %3935 = vtanh.f32 %v346_v42 }
 0x1a6   : > { %v3912_v32 = vpop.eup %3911  ;;  %2573 = vst [vmem:[%s4886_s19 + $0x4e0] sm:$0xff] %v3910_v4  ;;  %3937 = vtanh.f32 %v347_v60  ;;  %v355_v60 = vld [vmem:[%s4801_s5 + $0x590] sm:$0xff] }
 0x1a7   : > { %v5621_v47 = vpop.eup %3913  ;;  %2574 = vst [vmem:[%s4886_s19 + $0x4e8] sm:$0xff] %v3912_v32  ;;  %3939 = vtanh.f32 %v348_v40 }
 0x1a8   : > { %7290 = vst [vmem:[#allocation131_spill] sm:$0xff] %v5621_v47  ;;  %v5625_v54 = vpop.eup %3915  ;;  %v977_v25 = vadd.f32 1.0, %v5621_v47  ;;  %3941 = vtanh.f32 %v349_v43  ;;  %v356_v43 = vld [vmem:[%s4801_s5 + $0x598] sm:$0xff] }
 0x1a9   : > { %7291 = vst [vmem:[#allocation132_spill] sm:$0xff] %v5625_v54  ;;  %v3918_v56 = vpop.eup %3917  ;;  %v978_v14 = vadd.f32 1.0, %v5625_v54  ;;  %3943 = vtanh.f32 %v350_v12 }
 0x1aa   : > { %v3920_v27 = vpop.eup %3919  ;;  %2575 = vst [vmem:[%s4886_s19 + $0x4f0] sm:$0xff] %v3918_v56  ;;  %v1297_v59 = vmul.f32 3.5, %v977_v25  ;;  %3945 = vtanh.f32 %v351_v17 }
 0x1ab   : > { %v5633_v42 = vpop.eup %3921  ;;  %2576 = vst [vmem:[%s4886_s19 + $0x4f8] sm:$0xff] %v3920_v27  ;;  %v1298_v48 = vmul.f32 3.5, %v978_v14  ;;  %3947 = vtanh.f32 %v352_v34 }
 0x1ac   : > { %7292 = vst [vmem:[#allocation133_spill] sm:$0xff] %v5633_v42  ;;  %v5637_v51 = vpop.eup %3923  ;;  %v1617_v40 = vadd.f32 -5.0, %v1297_v59  ;;  %v979_v4 = vadd.f32 1.0, %v5633_v42  ;;  %3949 = vtanh.f32 %v353_v2 }
 0x1ad   : > { %7293 = vst [vmem:[#allocation134_spill] sm:$0xff] %v5637_v51  ;;  %v5641_v32 = vpop.eup %3925  ;;  %v1618_v12 = vadd.f32 -5.0, %v1298_v48  ;;  %v980_v25 = vadd.f32 1.0, %v5637_v51  ;;  %3951 = vtanh.f32 %v354_v0 }
 0x1ae   : > { %7294 = vst [vmem:[#allocation135_spill] sm:$0xff] %v5641_v32  ;;  %v5644_v17 = vpop.eup %3927  ;;  %v2097_v56 = vmul.f32 1.442695, %v1617_v40  ;;  %v1299_v27 = vmul.f32 3.5, %v979_v4  ;;  %v981_v34 = vadd.f32 1.0, %v5641_v32  ;;  %3953 = vtanh.f32 %v355_v60 }
 0x1af   : > { %7295 = vst [vmem:[#allocation136_spill] sm:$0xff] %v5644_v17  ;;  %v5647_v14 = vpop.eup %3929  ;;  %v2099_v59 = vmul.f32 1.442695, %v1618_v12  ;;  %v1300_v54 = vmul.f32 3.5, %v980_v25  ;;  %v982_v2 = vadd.f32 1.0, %v5644_v17  ;;  %3955 = vtanh.f32 %v356_v43  ;;  %v7506_v15 = vld [vmem:[#allocation131_spill] sm:$0xff] }
 0x1b0   : > { %7296 = vst [vmem:[#allocation137_spill] sm:$0xff] %v5647_v14  ;;  %v5650_v42 = vpop.eup %3931  ;;  %3957 = vpow2.f32 %v2097_v56  ;;  %v1619_v48 = vadd.f32 -5.0, %v1299_v27  ;;  %v1301_v51 = vmul.f32 3.5, %v981_v34  ;;  %v983_v0 = vadd.f32 1.0, %v5647_v14  ;;  %2897 = vst [vmem:[%s6160_s27 + $0x500] sm:$0xff] %v7506_v15  ;;  %v7507_v23 = vld [vmem:[#allocation132_spill] sm:$0xff] }
 0x1b1   : > { %7297 = vst [vmem:[#allocation138_spill] sm:$0xff] %v5650_v42  ;;  %v5653_v47 = vpop.eup %3933  ;;  %3959 = vpow2.f32 %v2099_v59  ;;  %v1620_v40 = vadd.f32 -5.0, %v1300_v54  ;;  %v1302_v4 = vmul.f32 3.5, %v982_v2  ;;  %v984_v60 = vadd.f32 1.0, %v5650_v42  ;;  %2898 = vst [vmem:[%s6160_s27 + $0x508] sm:$0xff] %v7507_v23 }
 0x1b2   : > { %7298 = vst [vmem:[#allocation139_spill] sm:$0xff] %v5653_v47  ;;  %v5656_v32 = vpop.eup %3935  ;;  %v2101_v12 = vmul.f32 1.442695, %v1619_v48  ;;  %v1621_v25 = vadd.f32 -5.0, %v1301_v51  ;;  %v1303_v17 = vmul.f32 3.5, %v983_v0  ;;  %v985_v43 = vadd.f32 1.0, %v5653_v47 }
 0x1b3   : > { %7299 = vst [vmem:[#allocation140_spill] sm:$0xff] %v5656_v32  ;;  %v5659_v63 = vpop.eup %3937  ;;  %v2103_v56 = vmul.f32 1.442695, %v1620_v40  ;;  %v1622_v27 = vadd.f32 -5.0, %v1302_v4  ;;  %v1304_v34 = vmul.f32 3.5, %v984_v60  ;;  %v986_v14 = vadd.f32 1.0, %v5656_v32 }
 0x1b4   : > { %7300 = vst [vmem:[#allocation141_spill] sm:$0xff] %v5659_v63  ;;  %v5662_v58 = vpop.eup %3939  ;;  %3961 = vpow2.f32 %v2101_v12  ;;  %v2105_v54 = vmul.f32 1.442695, %v1621_v25  ;;  %v1623_v59 = vadd.f32 -5.0, %v1303_v17  ;;  %v1305_v2 = vmul.f32 3.5, %v985_v43  ;;  %v7508_v30 = vld [vmem:[#allocation133_spill] sm:$0xff] }
 0x1b5   : > { %7301 = vst [vmem:[#allocation142_spill] sm:$0xff] %v5662_v58  ;;  %v5664_v42 = vpop.eup %3941  ;;  %3963 = vpow2.f32 %v2103_v56  ;;  %v2107_v51 = vmul.f32 1.442695, %v1622_v27  ;;  %v1624_v48 = vadd.f32 -5.0, %v1304_v34  ;;  %v1306_v0 = vmul.f32 3.5, %v986_v14  ;;  %2899 = vst [vmem:[%s6160_s27 + $0x510] sm:$0xff] %v7508_v30 }
 0x1b6   : > { %7302 = vst [vmem:[#allocation143_spill] sm:$0xff] %v5664_v42  ;;  %v5666_v47 = vpop.eup %3943  ;;  %3965 = vpow2.f32 %v2105_v54  ;;  %v2109_v40 = vmul.f32 1.442695, %v1623_v59  ;;  %v1625_v4 = vadd.f32 -5.0, %v1305_v2  ;;  %v987_v60 = vadd.f32 1.0, %v5659_v63  ;;  %v7509_v36 = vld [vmem:[#allocation134_spill] sm:$0xff] }
 0x1b7   : > { %7303 = vst [vmem:[#allocation144_spill] sm:$0xff] %v5666_v47  ;;  %v5669_v32 = vpop.eup %3945  ;;  %3967 = vpow2.f32 %v2107_v51  ;;  %v2111_v12 = vmul.f32 1.442695, %v1624_v48  ;;  %v1626_v25 = vadd.f32 -5.0, %v1306_v0  ;;  %v988_v17 = vadd.f32 1.0, %v5662_v58  ;;  %2900 = vst [vmem:[%s6160_s27 + $0x518] sm:$0xff] %v7509_v36 }
 0x1b8   : > { %7304 = vst [vmem:[#allocation145_spill] sm:$0xff] %v5669_v32  ;;  %v5672_v43 = vpop.eup %3947  ;;  %3969 = vpow2.f32 %v2109_v40  ;;  %v2113_v56 = vmul.f32 1.442695, %v1625_v4  ;;  %v1307_v27 = vmul.f32 3.5, %v987_v60  ;;  %v989_v14 = vadd.f32 1.0, %v5664_v42  ;;  %v7510_v41 = vld [vmem:[#allocation135_spill] sm:$0xff] }
 0x1b9   : > { %7305 = vst [vmem:[#allocation146_spill] sm:$0xff] %v5672_v43  ;;  %v5675_v34 = vpop.eup %3949  ;;  %3971 = vpow2.f32 %v2111_v12  ;;  %v2115_v54 = vmul.f32 1.442695, %v1626_v25  ;;  %v1308_v59 = vmul.f32 3.5, %v988_v17  ;;  %v990_v2 = vadd.f32 1.0, %v5666_v47  ;;  %2901 = vst [vmem:[%s6160_s27 + $0x520] sm:$0xff] %v7510_v41 }
 0x1ba   : > { %7306 = vst [vmem:[#allocation147_spill] sm:$0xff] %v5675_v34  ;;  %v5678_v63 = vpop.eup %3951  ;;  %3973 = vpow2.f32 %v2113_v56  ;;  %v1627_v51 = vadd.f32 -5.0, %v1307_v27  ;;  %v1309_v48 = vmul.f32 3.5, %v989_v14  ;;  %v991_v0 = vadd.f32 1.0, %v5669_v32  ;;  %v7511_v46 = vld [vmem:[#allocation136_spill] sm:$0xff]  ;;  %v7512_v55 = vld [vmem:[#allocation137_spill] sm:$0xff] }
 0x1bb   : > { %7307 = vst [vmem:[#allocation148_spill] sm:$0xff] %v5678_v63  ;;  %v5681_v58 = vpop.eup %3953  ;;  %3975 = vpow2.f32 %v2115_v54  ;;  %v1628_v40 = vadd.f32 -5.0, %v1308_v59  ;;  %v1310_v4 = vmul.f32 3.5, %v990_v2  ;;  %v992_v60 = vadd.f32 1.0, %v5672_v43  ;;  %2902 = vst [vmem:[%s6160_s27 + $0x528] sm:$0xff] %v7511_v46  ;;  %v7513_v62 = vld [vmem:[#allocation138_spill] sm:$0xff] }
 0x1bc   : > { %7308 = vst [vmem:[#allocation149_spill] sm:$0xff] %v5681_v58  ;;  %v5684_v12 = vpop.eup %3955  ;;  %v2117_v25 = vmul.f32 1.442695, %v1627_v51  ;;  %v1629_v17 = vadd.f32 -5.0, %v1309_v48  ;;  %v1311_v47 = vmul.f32 3.5, %v991_v0  ;;  %v993_v56 = vadd.f32 1.0, %v5675_v34 }
 0x1bd   : > { %7309 = vst [vmem:[#allocation150_spill] sm:$0xff] %v5684_v12  ;;  %v3958_v27 = vpop.eup %3957  ;;  %v2119_v14 = vmul.f32 1.442695, %v1628_v40  ;;  %v1630_v42 = vadd.f32 -5.0, %v1310_v4  ;;  %v1312_v32 = vmul.f32 3.5, %v992_v60  ;;  %v994_v37 = vadd.f32 1.0, %v5678_v63 }
 0x1be   : > { %v3960_v7 = vpop.eup %3959  ;;  %2577 = vst [vmem:[%s4886_s19 + $0x500] sm:$0xff] %v3958_v27  ;;  %3977 = vpow2.f32 %v2117_v25  ;;  %v2121_v54 = vmul.f32 1.442695, %v1629_v17  ;;  %v1631_v59 = vadd.f32 -5.0, %v1311_v47  ;;  %v1313_v2 = vmul.f32 3.5, %v993_v56  ;;  %2903 = vst [vmem:[%s6160_s27 + $0x530] sm:$0xff] %v7512_v55 }
 0x1bf   : > { %2578 = vst [vmem:[%s4886_s19 + $0x508] sm:$0xff] %v3960_v7  ;;  %3979 = vpow2.f32 %v2119_v14  ;;  %v2123_v51 = vmul.f32 1.442695, %v1630_v42  ;;  %v1632_v48 = vadd.f32 -5.0, %v1312_v32  ;;  %v1314_v0 = vmul.f32 3.5, %v994_v37  ;;  %v357_v14 = vld [vmem:[%s4801_s5 + $0x5a0] sm:$0xff] }
 0x1c0   : > { %3981 = vpow2.f32 %v2121_v54  ;;  %v2125_v34 = vmul.f32 1.442695, %v1631_v59  ;;  %v1633_v40 = vadd.f32 -5.0, %v1313_v2  ;;  %v995_v4 = vadd.f32 1.0, %v5681_v58  ;;  %v358_v2 = vld [vmem:[%s4801_s5 + $0x5a8] sm:$0xff]  ;;  %2904 = vst [vmem:[%s6160_s27 + $0x538] sm:$0xff] %v7513_v62 }
 0x1c1   : > { %v3962_v60 = vpop.eup %3961  ;;  %3983 = vpow2.f32 %v2123_v51  ;;  %v2127_v25 = vmul.f32 1.442695, %v1632_v48  ;;  %v1634_v17 = vadd.f32 -5.0, %v1314_v0  ;;  %v996_v47 = vadd.f32 1.0, %v5684_v12  ;;  %v7514_v3 = vld [vmem:[#allocation139_spill] sm:$0xff]  ;;  %v7515_v10 = vld [vmem:[#allocation140_spill] sm:$0xff] }
 0x1c2   : > { %v3964_v7 = vpop.eup %3963  ;;  %2579 = vst [vmem:[%s4886_s19 + $0x510] sm:$0xff] %v3962_v60  ;;  %3985 = vpow2.f32 %v2125_v34  ;;  %v2129_v37 = vmul.f32 1.442695, %v1633_v40  ;;  %v1315_v42 = vmul.f32 3.5, %v995_v4  ;;  %v359_v60 = vld [vmem:[%s4801_s5 + $0x5b0] sm:$0xff]  ;;  %2905 = vst [vmem:[%s6160_s27 + $0x540] sm:$0xff] %v7514_v3 }
 0x1c3   : > { %v3966_v32 = vpop.eup %3965  ;;  %2580 = vst [vmem:[%s4886_s19 + $0x518] sm:$0xff] %v3964_v7  ;;  %3987 = vpow2.f32 %v2127_v25  ;;  %v2131_v56 = vmul.f32 1.442695, %v1634_v17  ;;  %v1316_v27 = vmul.f32 3.5, %v996_v47  ;;  %v360_v17 = vld [vmem:[%s4801_s5 + $0x5b8] sm:$0xff]  ;;  %v361_v47 = vld [vmem:[%s4801_s5 + $0x5c0] sm:$0xff] }
 0x1c4   : > { %v3968_v54 = vpop.eup %3967  ;;  %2581 = vst [vmem:[%s4886_s19 + $0x520] sm:$0xff] %v3966_v32  ;;  %3989 = vpow2.f32 %v2129_v37  ;;  %v1635_v59 = vadd.f32 -5.0, %v1315_v42  ;;  %v362_v7 = vld [vmem:[%s4801_s5 + $0x5c8] sm:$0xff]  ;;  %v363_v42 = vld [vmem:[%s4801_s5 + $0x5d0] sm:$0xff]  ;;  %2906 = vst [vmem:[%s6160_s27 + $0x548] sm:$0xff] %v7515_v10 }
 0x1c5   : > { %v3970_v51 = vpop.eup %3969  ;;  %2582 = vst [vmem:[%s4886_s19 + $0x528] sm:$0xff] %v3968_v54  ;;  %3991 = vpow2.f32 %v2131_v56  ;;  %v1636_v34 = vadd.f32 -5.0, %v1316_v27  ;;  %v364_v56 = vld [vmem:[%s4801_s5 + $0x5d8] sm:$0xff]  ;;  %v7516_v20 = vld [vmem:[#allocation141_spill] sm:$0xff]  ;;  %v7518_v38 = vld [vmem:[#allocation143_spill] sm:$0xff] }
 0x1c6   : > { %v3972_v48 = vpop.eup %3971  ;;  %2583 = vst [vmem:[%s4886_s19 + $0x530] sm:$0xff] %v3970_v51  ;;  %v2133_v0 = vmul.f32 1.442695, %v1635_v59  ;;  %3993 = vtanh.f32 %v357_v14  ;;  %v365_v14 = vld [vmem:[%s4801_s5 + $0x5e0] sm:$0xff]  ;;  %v366_v59 = vld [vmem:[%s4801_s5 + $0x5e8] sm:$0xff]  ;;  %v367_v51 = vld [vmem:[%s4801_s5 + $0x5f0] sm:$0xff] }
 0x1c7   : > { %v3974_v40 = vpop.eup %3973  ;;  %2584 = vst [vmem:[%s4886_s19 + $0x538] sm:$0xff] %v3972_v48  ;;  %v2135_v4 = vmul.f32 1.442695, %v1636_v34  ;;  %3995 = vtanh.f32 %v358_v2  ;;  %v368_v48 = vld [vmem:[%s4801_s5 + $0x5f8] sm:$0xff]  ;;  %2907 = vst [vmem:[%s6160_s27 + $0x550] sm:$0xff] %v7516_v20  ;;  %v7519_v45 = vld [vmem:[#allocation144_spill] sm:$0xff] }
 0x1c8   : > { %v3976_v25 = vpop.eup %3975  ;;  %2585 = vst [vmem:[%s4886_s19 + $0x540] sm:$0xff] %v3974_v40  ;;  %3997 = vpow2.f32 %v2133_v0  ;;  %v369_v40 = vld [vmem:[%s4801_s5 + $0x600] sm:$0xff]  ;;  %v7517_v29 = vld [vmem:[#allocation142_spill] sm:$0xff]  ;;  %2909 = vst [vmem:[%s6160_s27 + $0x560] sm:$0xff] %v7518_v38 }
 0x1c9   : > { %2586 = vst [vmem:[%s4886_s19 + $0x548] sm:$0xff] %v3976_v25  ;;  %3999 = vpow2.f32 %v2135_v4  ;;  %2908 = vst [vmem:[%s6160_s27 + $0x558] sm:$0xff] %v7517_v29  ;;  %v7520_v6 = vld [vmem:[#allocation145_spill] sm:$0xff]  ;;  %v7521_v22 = vld [vmem:[#allocation146_spill] sm:$0xff] }
 0x1ca   : > { %4001 = vtanh.f32 %v359_v60  ;;  %v370_v60 = vld [vmem:[%s4801_s5 + $0x608] sm:$0xff]  ;;  %2910 = vst [vmem:[%s6160_s27 + $0x568] sm:$0xff] %v7519_v45  ;;  %2911 = vst [vmem:[%s6160_s27 + $0x570] sm:$0xff] %v7520_v6 }
 0x1cb   : > { %v3978_v37 = vpop.eup %3977  ;;  %4003 = vtanh.f32 %v360_v17  ;;  %v371_v17 = vld [vmem:[%s4801_s5 + $0x610] sm:$0xff]  ;;  %2912 = vst [vmem:[%s6160_s27 + $0x578] sm:$0xff] %v7521_v22 }
 0x1cc   : > { %v3980_v32 = vpop.eup %3979  ;;  %2587 = vst [vmem:[%s4886_s19 + $0x550] sm:$0xff] %v3978_v37  ;;  %4005 = vtanh.f32 %v361_v47  ;;  %v372_v37 = vld [vmem:[%s4801_s5 + $0x618] sm:$0xff] }
 0x1cd   : > { %v3982_v27 = vpop.eup %3981  ;;  %2588 = vst [vmem:[%s4886_s19 + $0x558] sm:$0xff] %v3980_v32  ;;  %4007 = vtanh.f32 %v362_v7 }
 0x1ce   : > { %v3984_v54 = vpop.eup %3983  ;;  %2589 = vst [vmem:[%s4886_s19 + $0x560] sm:$0xff] %v3982_v27  ;;  %4009 = vtanh.f32 %v363_v42 }
 0x1cf   : > { %v3986_v2 = vpop.eup %3985  ;;  %2590 = vst [vmem:[%s4886_s19 + $0x568] sm:$0xff] %v3984_v54  ;;  %4011 = vtanh.f32 %v364_v56  ;;  %v373_v56 = vld [vmem:[%s4801_s5 + $0x620] sm:$0xff]  ;;  %v374_v54 = vld [vmem:[%s4801_s5 + $0x628] sm:$0xff] }
 0x1d0   : > { %v3988_v34 = vpop.eup %3987  ;;  %2591 = vst [vmem:[%s4886_s19 + $0x570] sm:$0xff] %v3986_v2  ;;  %4013 = vtanh.f32 %v365_v14 }
 0x1d1   : > { %v3990_v0 = vpop.eup %3989  ;;  %2592 = vst [vmem:[%s4886_s19 + $0x578] sm:$0xff] %v3988_v34  ;;  %4015 = vtanh.f32 %v366_v59 }
 0x1d2   : > { %v3992_v4 = vpop.eup %3991  ;;  %2593 = vst [vmem:[%s4886_s19 + $0x580] sm:$0xff] %v3990_v0  ;;  %4017 = vtanh.f32 %v367_v51  ;;  %v375_v51 = vld [vmem:[%s4801_s5 + $0x630] sm:$0xff] }
 0x1d3   : > { %v5721_v25 = vpop.eup %3993  ;;  %2594 = vst [vmem:[%s4886_s19 + $0x588] sm:$0xff] %v3992_v4  ;;  %4019 = vtanh.f32 %v368_v48 }
 0x1d4   : > { %7310 = vst [vmem:[#allocation151_spill] sm:$0xff] %v5721_v25  ;;  %v5725_v47 = vpop.eup %3995  ;;  %v997_v7 = vadd.f32 1.0, %v5721_v25  ;;  %4021 = vtanh.f32 %v369_v40  ;;  %v376_v40 = vld [vmem:[%s4801_s5 + $0x638] sm:$0xff] }
 0x1d5   : > { %7311 = vst [vmem:[#allocation152_spill] sm:$0xff] %v5725_v47  ;;  %v3998_v42 = vpop.eup %3997  ;;  %v998_v32 = vadd.f32 1.0, %v5725_v47  ;;  %4023 = vtanh.f32 %v370_v60 }
 0x1d6   : > { %v4000_v27 = vpop.eup %3999  ;;  %2595 = vst [vmem:[%s4886_s19 + $0x590] sm:$0xff] %v3998_v42  ;;  %v1317_v14 = vmul.f32 3.5, %v997_v7  ;;  %4025 = vtanh.f32 %v371_v17 }
 0x1d7   : > { %v5733_v59 = vpop.eup %4001  ;;  %2596 = vst [vmem:[%s4886_s19 + $0x598] sm:$0xff] %v4000_v27  ;;  %v1318_v2 = vmul.f32 3.5, %v998_v32  ;;  %4027 = vtanh.f32 %v372_v37 }
 0x1d8   : > { %7312 = vst [vmem:[#allocation153_spill] sm:$0xff] %v5733_v59  ;;  %v5737_v34 = vpop.eup %4003  ;;  %v1637_v48 = vadd.f32 -5.0, %v1317_v14  ;;  %v999_v0 = vadd.f32 1.0, %v5733_v59  ;;  %4029 = vtanh.f32 %v373_v56 }
 0x1d9   : > { %7313 = vst [vmem:[#allocation154_spill] sm:$0xff] %v5737_v34  ;;  %v5741_v4 = vpop.eup %4005  ;;  %v1638_v60 = vadd.f32 -5.0, %v1318_v2  ;;  %v1000_v7 = vadd.f32 1.0, %v5737_v34  ;;  %4031 = vtanh.f32 %v374_v54 }
 0x1da   : > { %7314 = vst [vmem:[#allocation155_spill] sm:$0xff] %v5741_v4  ;;  %v5744_v17 = vpop.eup %4007  ;;  %v2137_v42 = vmul.f32 1.442695, %v1637_v48  ;;  %v1319_v27 = vmul.f32 3.5, %v999_v0  ;;  %v1001_v37 = vadd.f32 1.0, %v5741_v4  ;;  %4033 = vtanh.f32 %v375_v51 }
 0x1db   : > { %7315 = vst [vmem:[#allocation156_spill] sm:$0xff] %v5744_v17  ;;  %v5747_v32 = vpop.eup %4009  ;;  %v2139_v14 = vmul.f32 1.442695, %v1638_v60  ;;  %v1320_v47 = vmul.f32 3.5, %v1000_v7  ;;  %v1002_v56 = vadd.f32 1.0, %v5744_v17  ;;  %4035 = vtanh.f32 %v376_v40 }
 0x1dc   : > { %7316 = vst [vmem:[#allocation157_spill] sm:$0xff] %v5747_v32  ;;  %v5750_v59 = vpop.eup %4011  ;;  %4037 = vpow2.f32 %v2137_v42  ;;  %v1639_v2 = vadd.f32 -5.0, %v1319_v27  ;;  %v1321_v34 = vmul.f32 3.5, %v1001_v37  ;;  %v1003_v54 = vadd.f32 1.0, %v5747_v32 }
 0x1dd   : > { %7317 = vst [vmem:[#allocation158_spill] sm:$0xff] %v5750_v59  ;;  %v5753_v25 = vpop.eup %4013  ;;  %4039 = vpow2.f32 %v2139_v14  ;;  %v1640_v48 = vadd.f32 -5.0, %v1320_v47  ;;  %v1322_v0 = vmul.f32 3.5, %v1002_v56  ;;  %v1004_v51 = vadd.f32 1.0, %v5750_v59 }
 0x1de   : > { %7318 = vst [vmem:[#allocation159_spill] sm:$0xff] %v5753_v25  ;;  %v5756_v4 = vpop.eup %4015  ;;  %v2141_v60 = vmul.f32 1.442695, %v1639_v2  ;;  %v1641_v7 = vadd.f32 -5.0, %v1321_v34  ;;  %v1323_v17 = vmul.f32 3.5, %v1003_v54  ;;  %v1005_v40 = vadd.f32 1.0, %v5753_v25 }
 0x1df   : > { %7319 = vst [vmem:[#allocation160_spill] sm:$0xff] %v5756_v4  ;;  %v5759_v12 = vpop.eup %4017  ;;  %v2143_v42 = vmul.f32 1.442695, %v1640_v48  ;;  %v1642_v27 = vadd.f32 -5.0, %v1322_v0  ;;  %v1324_v37 = vmul.f32 3.5, %v1004_v51  ;;  %v1006_v32 = vadd.f32 1.0, %v5756_v4 }
 0x1e0   : > { %7320 = vst [vmem:[#allocation161_spill] sm:$0xff] %v5759_v12  ;;  %v5762_v58 = vpop.eup %4019  ;;  %4041 = vpow2.f32 %v2141_v60  ;;  %v2145_v47 = vmul.f32 1.442695, %v1641_v7  ;;  %v1643_v14 = vadd.f32 -5.0, %v1323_v17  ;;  %v1325_v56 = vmul.f32 3.5, %v1005_v40 }
 0x1e1   : > { %7321 = vst [vmem:[#allocation162_spill] sm:$0xff] %v5762_v58  ;;  %v5764_v59 = vpop.eup %4021  ;;  %4043 = vpow2.f32 %v2143_v42  ;;  %v2147_v34 = vmul.f32 1.442695, %v1642_v27  ;;  %v1644_v2 = vadd.f32 -5.0, %v1324_v37  ;;  %v1326_v54 = vmul.f32 3.5, %v1006_v32  ;;  %v7530_v16 = vld [vmem:[#allocation155_spill] sm:$0xff] }
 0x1e2   : > { %7322 = vst [vmem:[#allocation163_spill] sm:$0xff] %v5764_v59  ;;  %v5766_v25 = vpop.eup %4023  ;;  %4045 = vpow2.f32 %v2145_v47  ;;  %v2149_v48 = vmul.f32 1.442695, %v1643_v14  ;;  %v1645_v0 = vadd.f32 -5.0, %v1325_v56  ;;  %v1007_v51 = vadd.f32 1.0, %v5759_v12  ;;  %2921 = vst [vmem:[%s6160_s27 + $0x5c0] sm:$0xff] %v7530_v16 }
 0x1e3   : > { %7323 = vst [vmem:[#allocation164_spill] sm:$0xff] %v5766_v25  ;;  %v5769_v4 = vpop.eup %4025  ;;  %4047 = vpow2.f32 %v2147_v34  ;;  %v2151_v60 = vmul.f32 1.442695, %v1644_v2  ;;  %v1646_v7 = vadd.f32 -5.0, %v1326_v54  ;;  %v1008_v17 = vadd.f32 1.0, %v5762_v58  ;;  %v7531_v18 = vld [vmem:[#allocation156_spill] sm:$0xff] }
 0x1e4   : > { %7324 = vst [vmem:[#allocation165_spill] sm:$0xff] %v5769_v4  ;;  %v5772_v40 = vpop.eup %4027  ;;  %4049 = vpow2.f32 %v2149_v48  ;;  %v2153_v42 = vmul.f32 1.442695, %v1645_v0  ;;  %v1327_v27 = vmul.f32 3.5, %v1007_v51  ;;  %v1009_v32 = vadd.f32 1.0, %v5764_v59  ;;  %2922 = vst [vmem:[%s6160_s27 + $0x5c8] sm:$0xff] %v7531_v18 }
 0x1e5   : > { %7325 = vst [vmem:[#allocation166_spill] sm:$0xff] %v5772_v40  ;;  %v5775_v37 = vpop.eup %4029  ;;  %4051 = vpow2.f32 %v2151_v60  ;;  %v2155_v47 = vmul.f32 1.442695, %v1646_v7  ;;  %v1328_v14 = vmul.f32 3.5, %v1008_v17  ;;  %v1010_v56 = vadd.f32 1.0, %v5766_v25  ;;  %v7532_v21 = vld [vmem:[#allocation157_spill] sm:$0xff] }
 0x1e6   : > { %7326 = vst [vmem:[#allocation167_spill] sm:$0xff] %v5775_v37  ;;  %v5778_v12 = vpop.eup %4031  ;;  %4053 = vpow2.f32 %v2153_v42  ;;  %v1647_v34 = vadd.f32 -5.0, %v1327_v27  ;;  %v1329_v2 = vmul.f32 3.5, %v1009_v32  ;;  %v1011_v54 = vadd.f32 1.0, %v5769_v4  ;;  %2923 = vst [vmem:[%s6160_s27 + $0x5d0] sm:$0xff] %v7532_v21  ;;  %v7533_v24 = vld [vmem:[#allocation158_spill] sm:$0xff] }
 0x1e7   : > { %7327 = vst [vmem:[#allocation168_spill] sm:$0xff] %v5778_v12  ;;  %v5781_v58 = vpop.eup %4033  ;;  %4055 = vpow2.f32 %v2155_v47  ;;  %v1648_v48 = vadd.f32 -5.0, %v1328_v14  ;;  %v1330_v0 = vmul.f32 3.5, %v1010_v56  ;;  %v1012_v51 = vadd.f32 1.0, %v5772_v40  ;;  %2924 = vst [vmem:[%s6160_s27 + $0x5d8] sm:$0xff] %v7533_v24  ;;  %v7534_v28 = vld [vmem:[#allocation159_spill] sm:$0xff] }
 0x1e8   : > { %7328 = vst [vmem:[#allocation169_spill] sm:$0xff] %v5781_v58  ;;  %v5784_v60 = vpop.eup %4035  ;;  %v2157_v7 = vmul.f32 1.442695, %v1647_v34  ;;  %v1649_v17 = vadd.f32 -5.0, %v1329_v2  ;;  %v1331_v25 = vmul.f32 3.5, %v1011_v54  ;;  %v1013_v42 = vadd.f32 1.0, %v5775_v37 }
 0x1e9   : > { %7329 = vst [vmem:[#allocation170_spill] sm:$0xff] %v5784_v60  ;;  %v4038_v27 = vpop.eup %4037  ;;  %v2159_v32 = vmul.f32 1.442695, %v1648_v48  ;;  %v1650_v59 = vadd.f32 -5.0, %v1330_v0  ;;  %v1332_v4 = vmul.f32 3.5, %v1012_v51  ;;  %v1014_v63 = vadd.f32 1.0, %v5778_v12 }
 0x1ea   : > { %v4040_v43 = vpop.eup %4039  ;;  %2597 = vst [vmem:[%s4886_s19 + $0x5a0] sm:$0xff] %v4038_v27  ;;  %4057 = vpow2.f32 %v2157_v7  ;;  %v2161_v47 = vmul.f32 1.442695, %v1649_v17  ;;  %v1651_v14 = vadd.f32 -5.0, %v1331_v25  ;;  %v1333_v56 = vmul.f32 3.5, %v1013_v42  ;;  %2925 = vst [vmem:[%s6160_s27 + $0x5e0] sm:$0xff] %v7534_v28 }
 0x1eb   : > { %2598 = vst [vmem:[%s4886_s19 + $0x5a8] sm:$0xff] %v4040_v43  ;;  %4059 = vpow2.f32 %v2159_v32  ;;  %v2163_v34 = vmul.f32 1.442695, %v1650_v59  ;;  %v1652_v2 = vadd.f32 -5.0, %v1332_v4  ;;  %v1334_v54 = vmul.f32 3.5, %v1014_v63  ;;  %v377_v32 = vld [vmem:[%s4801_s5 + $0x640] sm:$0xff] }
 0x1ec   : > { %4061 = vpow2.f32 %v2161_v47  ;;  %v2165_v37 = vmul.f32 1.442695, %v1651_v14  ;;  %v1653_v48 = vadd.f32 -5.0, %v1333_v56  ;;  %v1015_v0 = vadd.f32 1.0, %v5781_v58  ;;  %v378_v56 = vld [vmem:[%s4801_s5 + $0x648] sm:$0xff]  ;;  %v7536_v35 = vld [vmem:[#allocation161_spill] sm:$0xff] }
 0x1ed   : > { %v4042_v51 = vpop.eup %4041  ;;  %4063 = vpow2.f32 %v2163_v34  ;;  %v2167_v7 = vmul.f32 1.442695, %v1652_v2  ;;  %v1654_v17 = vadd.f32 -5.0, %v1334_v54  ;;  %v1016_v25 = vadd.f32 1.0, %v5784_v60  ;;  %v7535_v31 = vld [vmem:[#allocation160_spill] sm:$0xff]  ;;  %2927 = vst [vmem:[%s6160_s27 + $0x5f0] sm:$0xff] %v7536_v35 }
 0x1ee   : > { %v4044_v43 = vpop.eup %4043  ;;  %2599 = vst [vmem:[%s4886_s19 + $0x5b0] sm:$0xff] %v4042_v51  ;;  %4065 = vpow2.f32 %v2165_v37  ;;  %v2169_v63 = vmul.f32 1.442695, %v1653_v48  ;;  %v1335_v59 = vmul.f32 3.5, %v1015_v0  ;;  %v379_v51 = vld [vmem:[%s4801_s5 + $0x650] sm:$0xff]  ;;  %2926 = vst [vmem:[%s6160_s27 + $0x5e8] sm:$0xff] %v7535_v31 }
 0x1ef   : > { %v4046_v4 = vpop.eup %4045  ;;  %2600 = vst [vmem:[%s4886_s19 + $0x5b8] sm:$0xff] %v4044_v43  ;;  %4067 = vpow2.f32 %v2167_v7  ;;  %v2171_v42 = vmul.f32 1.442695, %v1654_v17  ;;  %v1336_v27 = vmul.f32 3.5, %v1016_v25  ;;  %v380_v17 = vld [vmem:[%s4801_s5 + $0x658] sm:$0xff]  ;;  %v381_v25 = vld [vmem:[%s4801_s5 + $0x660] sm:$0xff] }
 0x1f0   : > { %v4048_v47 = vpop.eup %4047  ;;  %2601 = vst [vmem:[%s4886_s19 + $0x5c0] sm:$0xff] %v4046_v4  ;;  %4069 = vpow2.f32 %v2169_v63  ;;  %v1655_v14 = vadd.f32 -5.0, %v1335_v59  ;;  %v382_v43 = vld [vmem:[%s4801_s5 + $0x668] sm:$0xff]  ;;  %v383_v59 = vld [vmem:[%s4801_s5 + $0x670] sm:$0xff]  ;;  %v7537_v39 = vld [vmem:[#allocation162_spill] sm:$0xff] }
 0x1f1   : > { %v4050_v34 = vpop.eup %4049  ;;  %2602 = vst [vmem:[%s4886_s19 + $0x5c8] sm:$0xff] %v4048_v47  ;;  %4071 = vpow2.f32 %v2171_v42  ;;  %v1656_v37 = vadd.f32 -5.0, %v1336_v27  ;;  %v384_v42 = vld [vmem:[%s4801_s5 + $0x678] sm:$0xff]  ;;  %2928 = vst [vmem:[%s6160_s27 + $0x5f8] sm:$0xff] %v7537_v39  ;;  %v7538_v44 = vld [vmem:[#allocation163_spill] sm:$0xff] }
 0x1f2   : > { %v4052_v2 = vpop.eup %4051  ;;  %2603 = vst [vmem:[%s4886_s19 + $0x5d0] sm:$0xff] %v4050_v34  ;;  %v2173_v54 = vmul.f32 1.442695, %v1655_v14  ;;  %4073 = vtanh.f32 %v377_v32  ;;  %v385_v32 = vld [vmem:[%s4801_s5 + $0x680] sm:$0xff]  ;;  %v386_v14 = vld [vmem:[%s4801_s5 + $0x688] sm:$0xff]  ;;  %v387_v34 = vld [vmem:[%s4801_s5 + $0x690] sm:$0xff] }
 0x1f3   : > { %v4054_v48 = vpop.eup %4053  ;;  %2604 = vst [vmem:[%s4886_s19 + $0x5d8] sm:$0xff] %v4052_v2  ;;  %v2175_v0 = vmul.f32 1.442695, %v1656_v37  ;;  %4075 = vtanh.f32 %v378_v56  ;;  %v388_v2 = vld [vmem:[%s4801_s5 + $0x698] sm:$0xff]  ;;  %2929 = vst [vmem:[%s6160_s27 + $0x600] sm:$0xff] %v7538_v44  ;;  %v7539_v49 = vld [vmem:[#allocation164_spill] sm:$0xff] }
 0x1f4   : > { %v4056_v7 = vpop.eup %4055  ;;  %2605 = vst [vmem:[%s4886_s19 + $0x5e0] sm:$0xff] %v4054_v48  ;;  %4077 = vpow2.f32 %v2173_v54  ;;  %v389_v48 = vld [vmem:[%s4801_s5 + $0x6a0] sm:$0xff]  ;;  %2930 = vst [vmem:[%s6160_s27 + $0x608] sm:$0xff] %v7539_v49  ;;  %v7540_v53 = vld [vmem:[#allocation165_spill] sm:$0xff] }
 0x1f5   : > { %2606 = vst [vmem:[%s4886_s19 + $0x5e8] sm:$0xff] %v4056_v7  ;;  %4079 = vpow2.f32 %v2175_v0  ;;  %2931 = vst [vmem:[%s6160_s27 + $0x610] sm:$0xff] %v7540_v53  ;;  %v7541_v57 = vld [vmem:[#allocation166_spill] sm:$0xff]  ;;  %v7542_v61 = vld [vmem:[#allocation167_spill] sm:$0xff] }
 0x1f6   : > { %4081 = vtanh.f32 %v379_v51  ;;  %v390_v51 = vld [vmem:[%s4801_s5 + $0x6a8] sm:$0xff]  ;;  %2932 = vst [vmem:[%s6160_s27 + $0x618] sm:$0xff] %v7541_v57  ;;  %2933 = vst [vmem:[%s6160_s27 + $0x620] sm:$0xff] %v7542_v61  ;;  %v7544_v5 = vld [vmem:[#allocation169_spill] sm:$0xff] }
 0x1f7   : > { %v4058_v63 = vpop.eup %4057  ;;  %4083 = vtanh.f32 %v380_v17  ;;  %v391_v17 = vld [vmem:[%s4801_s5 + $0x6b0] sm:$0xff]  ;;  %v7543_v1 = vld [vmem:[#allocation168_spill] sm:$0xff]  ;;  %2935 = vst [vmem:[%s6160_s27 + $0x630] sm:$0xff] %v7544_v5  ;;  %v7545_v9 = vld [vmem:[#allocation170_spill] sm:$0xff] }
 0x1f8   : > { %v4060_v4 = vpop.eup %4059  ;;  %2607 = vst [vmem:[%s4886_s19 + $0x5f0] sm:$0xff] %v4058_v63  ;;  %4085 = vtanh.f32 %v381_v25  ;;  %v392_v63 = vld [vmem:[%s4801_s5 + $0x6b8] sm:$0xff]  ;;  %2934 = vst [vmem:[%s6160_s27 + $0x628] sm:$0xff] %v7543_v1 }
 0x1f9   : > { %v4062_v27 = vpop.eup %4061  ;;  %2608 = vst [vmem:[%s4886_s19 + $0x5f8] sm:$0xff] %v4060_v4  ;;  %4087 = vtanh.f32 %v382_v43  ;;  %2936 = vst [vmem:[%s6160_s27 + $0x638] sm:$0xff] %v7545_v9 }
 0x1fa   : > { %v4064_v47 = vpop.eup %4063  ;;  %2609 = vst [vmem:[%s4886_s19 + $0x600] sm:$0xff] %v4062_v27  ;;  %4089 = vtanh.f32 %v383_v59 }
 0x1fb   : > { %v4066_v56 = vpop.eup %4065  ;;  %2610 = vst [vmem:[%s4886_s19 + $0x608] sm:$0xff] %v4064_v47  ;;  %4091 = vtanh.f32 %v384_v42  ;;  %v393_v42 = vld [vmem:[%s4801_s5 + $0x6c0] sm:$0xff]  ;;  %v394_v47 = vld [vmem:[%s4801_s5 + $0x6c8] sm:$0xff] }
 0x1fc   : > { %v4068_v37 = vpop.eup %4067  ;;  %2611 = vst [vmem:[%s4886_s19 + $0x610] sm:$0xff] %v4066_v56  ;;  %4093 = vtanh.f32 %v385_v32 }
 0x1fd   : > { %v4070_v54 = vpop.eup %4069  ;;  %2612 = vst [vmem:[%s4886_s19 + $0x618] sm:$0xff] %v4068_v37  ;;  %4095 = vtanh.f32 %v386_v14 }
 0x1fe   : > { %v4072_v0 = vpop.eup %4071  ;;  %2613 = vst [vmem:[%s4886_s19 + $0x620] sm:$0xff] %v4070_v54  ;;  %4097 = vtanh.f32 %v387_v34  ;;  %v395_v34 = vld [vmem:[%s4801_s5 + $0x6d0] sm:$0xff] }
 0x1ff   : > { %v5821_v7 = vpop.eup %4073  ;;  %2614 = vst [vmem:[%s4886_s19 + $0x628] sm:$0xff] %v4072_v0  ;;  %4099 = vtanh.f32 %v388_v2 }
 0x200   : > { %7330 = vst [vmem:[#allocation171_spill] sm:$0xff] %v5821_v7  ;;  %v5825_v25 = vpop.eup %4075  ;;  %v1017_v43 = vadd.f32 1.0, %v5821_v7  ;;  %4101 = vtanh.f32 %v389_v48  ;;  %v396_v48 = vld [vmem:[%s4801_s5 + $0x6d8] sm:$0xff] }
 0x201   : > { %7331 = vst [vmem:[#allocation172_spill] sm:$0xff] %v5825_v25  ;;  %v4078_v59 = vpop.eup %4077  ;;  %v1018_v4 = vadd.f32 1.0, %v5825_v25  ;;  %4103 = vtanh.f32 %v390_v51 }
 0x202   : > { %v4080_v27 = vpop.eup %4079  ;;  %2615 = vst [vmem:[%s4886_s19 + $0x630] sm:$0xff] %v4078_v59  ;;  %v1337_v32 = vmul.f32 3.5, %v1017_v43  ;;  %4105 = vtanh.f32 %v391_v17 }
 0x203   : > { %v5833_v14 = vpop.eup %4081  ;;  %2616 = vst [vmem:[%s4886_s19 + $0x638] sm:$0xff] %v4080_v27  ;;  %v1338_v56 = vmul.f32 3.5, %v1018_v4  ;;  %4107 = vtanh.f32 %v392_v63 }
 0x204   : > { %7332 = vst [vmem:[#allocation173_spill] sm:$0xff] %v5833_v14  ;;  %v5837_v37 = vpop.eup %4083  ;;  %v1657_v2 = vadd.f32 -5.0, %v1337_v32  ;;  %v1019_v54 = vadd.f32 1.0, %v5833_v14  ;;  %4109 = vtanh.f32 %v393_v42 }
 0x205   : > { %7333 = vst [vmem:[#allocation174_spill] sm:$0xff] %v5837_v37  ;;  %v5841_v0 = vpop.eup %4085  ;;  %v1658_v51 = vadd.f32 -5.0, %v1338_v56  ;;  %v1020_v43 = vadd.f32 1.0, %v5837_v37  ;;  %4111 = vtanh.f32 %v394_v47 }
 0x206   : > { %7334 = vst [vmem:[#allocation175_spill] sm:$0xff] %v5841_v0  ;;  %v5844_v17 = vpop.eup %4087  ;;  %v2177_v59 = vmul.f32 1.442695, %v1657_v2  ;;  %v1339_v27 = vmul.f32 3.5, %v1019_v54  ;;  %v1021_v63 = vadd.f32 1.0, %v5841_v0  ;;  %4113 = vtanh.f32 %v395_v34 }
 0x207   : > { %7335 = vst [vmem:[#allocation176_spill] sm:$0xff] %v5844_v17  ;;  %v5847_v4 = vpop.eup %4089  ;;  %v2179_v32 = vmul.f32 1.442695, %v1658_v51  ;;  %v1340_v25 = vmul.f32 3.5, %v1020_v43  ;;  %v1022_v42 = vadd.f32 1.0, %v5844_v17  ;;  %4115 = vtanh.f32 %v396_v48  ;;  %v7546_v13 = vld [vmem:[#allocation171_spill] sm:$0xff] }
 0x208   : > { %7336 = vst [vmem:[#allocation177_spill] sm:$0xff] %v5847_v4  ;;  %v5850_v14 = vpop.eup %4091  ;;  %4117 = vpow2.f32 %v2177_v59  ;;  %v1659_v56 = vadd.f32 -5.0, %v1339_v27  ;;  %v1341_v37 = vmul.f32 3.5, %v1021_v63  ;;  %v1023_v47 = vadd.f32 1.0, %v5847_v4  ;;  %2937 = vst [vmem:[%s6160_s27 + $0x640] sm:$0xff] %v7546_v13  ;;  %v7547_v19 = vld [vmem:[#allocation172_spill] sm:$0xff] }
 0x209   : > { %7337 = vst [vmem:[#allocation178_spill] sm:$0xff] %v5850_v14  ;;  %v5853_v7 = vpop.eup %4093  ;;  %4119 = vpow2.f32 %v2179_v32  ;;  %v1660_v2 = vadd.f32 -5.0, %v1340_v25  ;;  %v1342_v54 = vmul.f32 3.5, %v1022_v42  ;;  %v1024_v34 = vadd.f32 1.0, %v5850_v14  ;;  %2938 = vst [vmem:[%s6160_s27 + $0x648] sm:$0xff] %v7547_v19 }
 0x20a   : > { %7338 = vst [vmem:[#allocation179_spill] sm:$0xff] %v5853_v7  ;;  %v5856_v0 = vpop.eup %4095  ;;  %v2181_v51 = vmul.f32 1.442695, %v1659_v56  ;;  %v1661_v43 = vadd.f32 -5.0, %v1341_v37  ;;  %v1343_v17 = vmul.f32 3.5, %v1023_v47  ;;  %v1025_v48 = vadd.f32 1.0, %v5853_v7 }
 0x20b   : > { %7339 = vst [vmem:[#allocation180_spill] sm:$0xff] %v5856_v0  ;;  %v5859_v60 = vpop.eup %4097  ;;  %v2183_v59 = vmul.f32 1.442695, %v1660_v2  ;;  %v1662_v27 = vadd.f32 -5.0, %v1342_v54  ;;  %v1344_v63 = vmul.f32 3.5, %v1024_v34  ;;  %v1026_v4 = vadd.f32 1.0, %v5856_v0 }
 0x20c   : > { %7340 = vst [vmem:[#allocation181_spill] sm:$0xff] %v5859_v60  ;;  %v5862_v58 = vpop.eup %4099  ;;  %4121 = vpow2.f32 %v2181_v51  ;;  %v2185_v25 = vmul.f32 1.442695, %v1661_v43  ;;  %v1663_v32 = vadd.f32 -5.0, %v1343_v17  ;;  %v1345_v42 = vmul.f32 3.5, %v1025_v48  ;;  %v7548_v26 = vld [vmem:[#allocation173_spill] sm:$0xff] }
 0x20d   : > { %7341 = vst [vmem:[#allocation182_spill] sm:$0xff] %v5862_v58  ;;  %v5864_v14 = vpop.eup %4101  ;;  %4123 = vpow2.f32 %v2183_v59  ;;  %v2187_v37 = vmul.f32 1.442695, %v1662_v27  ;;  %v1664_v56 = vadd.f32 -5.0, %v1344_v63  ;;  %v1346_v47 = vmul.f32 3.5, %v1026_v4  ;;  %2939 = vst [vmem:[%s6160_s27 + $0x650] sm:$0xff] %v7548_v26 }
 0x20e   : > { %7342 = vst [vmem:[#allocation183_spill] sm:$0xff] %v5864_v14  ;;  %v5866_v7 = vpop.eup %4103  ;;  %4125 = vpow2.f32 %v2185_v25  ;;  %v2189_v2 = vmul.f32 1.442695, %v1663_v32  ;;  %v1665_v54 = vadd.f32 -5.0, %v1345_v42  ;;  %v1027_v34 = vadd.f32 1.0, %v5859_v60  ;;  %v7549_v33 = vld [vmem:[#allocation174_spill] sm:$0xff] }
 0x20f   : > { %7343 = vst [vmem:[#allocation184_spill] sm:$0xff] %v5866_v7  ;;  %v5869_v0 = vpop.eup %4105  ;;  %4127 = vpow2.f32 %v2187_v37  ;;  %v2191_v51 = vmul.f32 1.442695, %v1664_v56  ;;  %v1666_v43 = vadd.f32 -5.0, %v1346_v47  ;;  %v1028_v17 = vadd.f32 1.0, %v5862_v58  ;;  %2940 = vst [vmem:[%s6160_s27 + $0x658] sm:$0xff] %v7549_v33 }
 0x210   : > { %7344 = vst [vmem:[#allocation185_spill] sm:$0xff] %v5869_v0  ;;  %v5872_v48 = vpop.eup %4107  ;;  %4129 = vpow2.f32 %v2189_v2  ;;  %v2193_v59 = vmul.f32 1.442695, %v1665_v54  ;;  %v1347_v27 = vmul.f32 3.5, %v1027_v34  ;;  %v1029_v4 = vadd.f32 1.0, %v5864_v14  ;;  %v7550_v50 = vld [vmem:[#allocation175_spill] sm:$0xff] }
 0x211   : > { %7345 = vst [vmem:[#allocation186_spill] sm:$0xff] %v5872_v48  ;;  %v5875_v63 = vpop.eup %4109  ;;  %4131 = vpow2.f32 %v2191_v51  ;;  %v2195_v25 = vmul.f32 1.442695, %v1666_v43  ;;  %v1348_v32 = vmul.f32 3.5, %v1028_v17  ;;  %v1030_v42 = vadd.f32 1.0, %v5866_v7  ;;  %2941 = vst [vmem:[%s6160_s27 + $0x660] sm:$0xff] %v7550_v50 }
 0x212   : > { %7346 = vst [vmem:[#allocation187_spill] sm:$0xff] %v5875_v63  ;;  %v5878_v60 = vpop.eup %4111  ;;  %4133 = vpow2.f32 %v2193_v59  ;;  %v1667_v37 = vadd.f32 -5.0, %v1347_v27  ;;  %v1349_v56 = vmul.f32 3.5, %v1029_v4  ;;  %v1031_v47 = vadd.f32 1.0, %v5869_v0  ;;  %v7551_v52 = vld [vmem:[#allocation176_spill] sm:$0xff]  ;;  %v7552_v8 = vld [vmem:[#allocation177_spill] sm:$0xff] }
 0x213   : > { %7347 = vst [vmem:[#allocation188_spill] sm:$0xff] %v5878_v60  ;;  %v5881_v58 = vpop.eup %4113  ;;  %4135 = vpow2.f32 %v2195_v25  ;;  %v1668_v2 = vadd.f32 -5.0, %v1348_v32  ;;  %v1350_v54 = vmul.f32 3.5, %v1030_v42  ;;  %v1032_v34 = vadd.f32 1.0, %v5872_v48  ;;  %2942 = vst [vmem:[%s6160_s27 + $0x668] sm:$0xff] %v7551_v52  ;;  %v7553_v11 = vld [vmem:[#allocation178_spill] sm:$0xff] }
 0x214   : > { %7348 = vst [vmem:[#allocation189_spill] sm:$0xff] %v5881_v58  ;;  %v5884_v51 = vpop.eup %4115  ;;  %v2197_v43 = vmul.f32 1.442695, %v1667_v37  ;;  %v1669_v17 = vadd.f32 -5.0, %v1349_v56  ;;  %v1351_v7 = vmul.f32 3.5, %v1031_v47  ;;  %v1033_v59 = vadd.f32 1.0, %v5875_v63 }
 0x215   : > { %7349 = vst [vmem:[#allocation190_spill] sm:$0xff] %v5884_v51  ;;  %v4118_v27 = vpop.eup %4117  ;;  %v2199_v4 = vmul.f32 1.442695, %v1668_v2  ;;  %v1670_v14 = vadd.f32 -5.0, %v1350_v54  ;;  %v1352_v0 = vmul.f32 3.5, %v1032_v34  ;;  %v1034_v12 = vadd.f32 1.0, %v5878_v60 }
 0x216   : > { %v4120_v40 = vpop.eup %4119  ;;  %2617 = vst [vmem:[%s4886_s19 + $0x640] sm:$0xff] %v4118_v27  ;;  %4137 = vpow2.f32 %v2197_v43  ;;  %v2201_v25 = vmul.f32 1.442695, %v1669_v17  ;;  %v1671_v32 = vadd.f32 -5.0, %v1351_v7  ;;  %v1353_v42 = vmul.f32 3.5, %v1033_v59  ;;  %2943 = vst [vmem:[%s6160_s27 + $0x670] sm:$0xff] %v7552_v8 }
 0x217   : > { %2618 = vst [vmem:[%s4886_s19 + $0x648] sm:$0xff] %v4120_v40  ;;  %4139 = vpow2.f32 %v2199_v4  ;;  %v2203_v37 = vmul.f32 1.442695, %v1670_v14  ;;  %v1672_v56 = vadd.f32 -5.0, %v1352_v0  ;;  %v1354_v47 = vmul.f32 3.5, %v1034_v12  ;;  %v397_v4 = vld [vmem:[%s4801_s5 + $0x6e0] sm:$0xff] }
 0x218   : > { %4141 = vpow2.f32 %v2201_v25  ;;  %v2205_v63 = vmul.f32 1.442695, %v1671_v32  ;;  %v1673_v2 = vadd.f32 -5.0, %v1353_v42  ;;  %v1035_v54 = vadd.f32 1.0, %v5881_v58  ;;  %v398_v42 = vld [vmem:[%s4801_s5 + $0x6e8] sm:$0xff]  ;;  %2944 = vst [vmem:[%s6160_s27 + $0x678] sm:$0xff] %v7553_v11 }
 0x219   : > { %v4122_v34 = vpop.eup %4121  ;;  %4143 = vpow2.f32 %v2203_v37  ;;  %v2207_v43 = vmul.f32 1.442695, %v1672_v56  ;;  %v1674_v17 = vadd.f32 -5.0, %v1354_v47  ;;  %v1036_v7 = vadd.f32 1.0, %v5884_v51  ;;  %v7554_v15 = vld [vmem:[#allocation179_spill] sm:$0xff]  ;;  %v7555_v23 = vld [vmem:[#allocation180_spill] sm:$0xff] }
 0x21a   : > { %v4124_v40 = vpop.eup %4123  ;;  %2619 = vst [vmem:[%s4886_s19 + $0x650] sm:$0xff] %v4122_v34  ;;  %4145 = vpow2.f32 %v2205_v63  ;;  %v2209_v12 = vmul.f32 1.442695, %v1673_v2  ;;  %v1355_v14 = vmul.f32 3.5, %v1035_v54  ;;  %v399_v34 = vld [vmem:[%s4801_s5 + $0x6f0] sm:$0xff]  ;;  %2945 = vst [vmem:[%s6160_s27 + $0x680] sm:$0xff] %v7554_v15 }
 0x21b   : > { %v4126_v0 = vpop.eup %4125  ;;  %2620 = vst [vmem:[%s4886_s19 + $0x658] sm:$0xff] %v4124_v40  ;;  %4147 = vpow2.f32 %v2207_v43  ;;  %v2211_v59 = vmul.f32 1.442695, %v1674_v17  ;;  %v1356_v27 = vmul.f32 3.5, %v1036_v7  ;;  %v400_v17 = vld [vmem:[%s4801_s5 + $0x6f8] sm:$0xff]  ;;  %v401_v7 = vld [vmem:[%s4801_s5 + $0x700] sm:$0xff] }
 0x21c   : > { %v4128_v25 = vpop.eup %4127  ;;  %2621 = vst [vmem:[%s4886_s19 + $0x660] sm:$0xff] %v4126_v0  ;;  %4149 = vpow2.f32 %v2209_v12  ;;  %v1675_v32 = vadd.f32 -5.0, %v1355_v14  ;;  %v402_v40 = vld [vmem:[%s4801_s5 + $0x708] sm:$0xff]  ;;  %v403_v14 = vld [vmem:[%s4801_s5 + $0x710] sm:$0xff]  ;;  %2946 = vst [vmem:[%s6160_s27 + $0x688] sm:$0xff] %v7555_v23 }
 0x21d   : > { %v4130_v37 = vpop.eup %4129  ;;  %2622 = vst [vmem:[%s4886_s19 + $0x668] sm:$0xff] %v4128_v25  ;;  %4151 = vpow2.f32 %v2211_v59  ;;  %v1676_v63 = vadd.f32 -5.0, %v1356_v27  ;;  %v404_v59 = vld [vmem:[%s4801_s5 + $0x718] sm:$0xff]  ;;  %v7556_v30 = vld [vmem:[#allocation181_spill] sm:$0xff]  ;;  %v7558_v41 = vld [vmem:[#allocation183_spill] sm:$0xff] }
 0x21e   : > { %v4132_v56 = vpop.eup %4131  ;;  %2623 = vst [vmem:[%s4886_s19 + $0x670] sm:$0xff] %v4130_v37  ;;  %v2213_v47 = vmul.f32 1.442695, %v1675_v32  ;;  %4153 = vtanh.f32 %v397_v4  ;;  %v405_v4 = vld [vmem:[%s4801_s5 + $0x720] sm:$0xff]  ;;  %v406_v32 = vld [vmem:[%s4801_s5 + $0x728] sm:$0xff]  ;;  %v407_v37 = vld [vmem:[%s4801_s5 + $0x730] sm:$0xff] }
 0x21f   : > { %v4134_v2 = vpop.eup %4133  ;;  %2624 = vst [vmem:[%s4886_s19 + $0x678] sm:$0xff] %v4132_v56  ;;  %v2215_v54 = vmul.f32 1.442695, %v1676_v63  ;;  %4155 = vtanh.f32 %v398_v42  ;;  %v408_v56 = vld [vmem:[%s4801_s5 + $0x738] sm:$0xff]  ;;  %2947 = vst [vmem:[%s6160_s27 + $0x690] sm:$0xff] %v7556_v30  ;;  %v7559_v46 = vld [vmem:[#allocation184_spill] sm:$0xff] }
 0x220   : > { %v4136_v43 = vpop.eup %4135  ;;  %2625 = vst [vmem:[%s4886_s19 + $0x680] sm:$0xff] %v4134_v2  ;;  %4157 = vpow2.f32 %v2213_v47  ;;  %v409_v2 = vld [vmem:[%s4801_s5 + $0x740] sm:$0xff]  ;;  %v7557_v36 = vld [vmem:[#allocation182_spill] sm:$0xff]  ;;  %2949 = vst [vmem:[%s6160_s27 + $0x6a0] sm:$0xff] %v7558_v41 }
 0x221   : > { %2626 = vst [vmem:[%s4886_s19 + $0x688] sm:$0xff] %v4136_v43  ;;  %4159 = vpow2.f32 %v2215_v54  ;;  %2948 = vst [vmem:[%s6160_s27 + $0x698] sm:$0xff] %v7557_v36  ;;  %v7560_v55 = vld [vmem:[#allocation185_spill] sm:$0xff]  ;;  %v7561_v62 = vld [vmem:[#allocation186_spill] sm:$0xff] }
 0x222   : > { %4161 = vtanh.f32 %v399_v34  ;;  %v410_v34 = vld [vmem:[%s4801_s5 + $0x748] sm:$0xff]  ;;  %2950 = vst [vmem:[%s6160_s27 + $0x6a8] sm:$0xff] %v7559_v46  ;;  %2951 = vst [vmem:[%s6160_s27 + $0x6b0] sm:$0xff] %v7560_v55  ;;  %v7562_v3 = vld [vmem:[#allocation187_spill] sm:$0xff] }
 0x223   : > { %v4138_v12 = vpop.eup %4137  ;;  %4163 = vtanh.f32 %v400_v17  ;;  %v411_v17 = vld [vmem:[%s4801_s5 + $0x750] sm:$0xff]  ;;  %2952 = vst [vmem:[%s6160_s27 + $0x6b8] sm:$0xff] %v7561_v62  ;;  %2953 = vst [vmem:[%s6160_s27 + $0x6c0] sm:$0xff] %v7562_v3  ;;  %v7563_v10 = vld [vmem:[#allocation188_spill] sm:$0xff] }
 0x224   : > { %v4140_v0 = vpop.eup %4139  ;;  %2627 = vst [vmem:[%s4886_s19 + $0x690] sm:$0xff] %v4138_v12  ;;  %4165 = vtanh.f32 %v401_v7  ;;  %v412_v12 = vld [vmem:[%s4801_s5 + $0x758] sm:$0xff]  ;;  %2954 = vst [vmem:[%s6160_s27 + $0x6c8] sm:$0xff] %v7563_v10  ;;  %v7564_v20 = vld [vmem:[#allocation189_spill] sm:$0xff] }
 0x225   : > { %v4142_v27 = vpop.eup %4141  ;;  %2628 = vst [vmem:[%s4886_s19 + $0x698] sm:$0xff] %v4140_v0  ;;  %4167 = vtanh.f32 %v402_v40  ;;  %2955 = vst [vmem:[%s6160_s27 + $0x6d0] sm:$0xff] %v7564_v20  ;;  %v7565_v29 = vld [vmem:[#allocation190_spill] sm:$0xff] }
 0x226   : > { %v4144_v25 = vpop.eup %4143  ;;  %2629 = vst [vmem:[%s4886_s19 + $0x6a0] sm:$0xff] %v4142_v27  ;;  %4169 = vtanh.f32 %v403_v14  ;;  %2956 = vst [vmem:[%s6160_s27 + $0x6d8] sm:$0xff] %v7565_v29 }
 0x227   : > { %v4146_v42 = vpop.eup %4145  ;;  %2630 = vst [vmem:[%s4886_s19 + $0x6a8] sm:$0xff] %v4144_v25  ;;  %4171 = vtanh.f32 %v404_v59  ;;  %v413_v59 = vld [vmem:[%s4801_s5 + $0x760] sm:$0xff]  ;;  %v414_v25 = vld [vmem:[%s4801_s5 + $0x768] sm:$0xff] }
 0x228   : > { %v4148_v63 = vpop.eup %4147  ;;  %2631 = vst [vmem:[%s4886_s19 + $0x6b0] sm:$0xff] %v4146_v42  ;;  %4173 = vtanh.f32 %v405_v4 }
 0x229   : > { %v4150_v47 = vpop.eup %4149  ;;  %2632 = vst [vmem:[%s4886_s19 + $0x6b8] sm:$0xff] %v4148_v63  ;;  %4175 = vtanh.f32 %v406_v32 }
 0x22a   : > { %v4152_v54 = vpop.eup %4151  ;;  %2633 = vst [vmem:[%s4886_s19 + $0x6c0] sm:$0xff] %v4150_v47  ;;  %4177 = vtanh.f32 %v407_v37  ;;  %v415_v37 = vld [vmem:[%s4801_s5 + $0x770] sm:$0xff] }
 0x22b   : > { %v5921_v43 = vpop.eup %4153  ;;  %2634 = vst [vmem:[%s4886_s19 + $0x6c8] sm:$0xff] %v4152_v54  ;;  %4179 = vtanh.f32 %v408_v56 }
 0x22c   : > { %7350 = vst [vmem:[#allocation191_spill] sm:$0xff] %v5921_v43  ;;  %v5925_v7 = vpop.eup %4155  ;;  %v1037_v40 = vadd.f32 1.0, %v5921_v43  ;;  %4181 = vtanh.f32 %v409_v2  ;;  %v416_v2 = vld [vmem:[%s4801_s5 + $0x778] sm:$0xff] }
 0x22d   : > { %7351 = vst [vmem:[#allocation192_spill] sm:$0xff] %v5925_v7  ;;  %v4158_v14 = vpop.eup %4157  ;;  %v1038_v0 = vadd.f32 1.0, %v5925_v7  ;;  %4183 = vtanh.f32 %v410_v34 }
 0x22e   : > { %v4160_v27 = vpop.eup %4159  ;;  %2635 = vst [vmem:[%s4886_s19 + $0x6d0] sm:$0xff] %v4158_v14  ;;  %v1357_v4 = vmul.f32 3.5, %v1037_v40  ;;  %4185 = vtanh.f32 %v411_v17 }
 0x22f   : > { %v5933_v32 = vpop.eup %4161  ;;  %2636 = vst [vmem:[%s4886_s19 + $0x6d8] sm:$0xff] %v4160_v27  ;;  %v1358_v42 = vmul.f32 3.5, %v1038_v0  ;;  %4187 = vtanh.f32 %v412_v12 }
 0x230   : > { %7352 = vst [vmem:[#allocation193_spill] sm:$0xff] %v5933_v32  ;;  %v5937_v63 = vpop.eup %4163  ;;  %v1677_v56 = vadd.f32 -5.0, %v1357_v4  ;;  %v1039_v47 = vadd.f32 1.0, %v5933_v32  ;;  %4189 = vtanh.f32 %v413_v59 }
 0x231   : > { %7353 = vst [vmem:[#allocation194_spill] sm:$0xff] %v5937_v63  ;;  %v5941_v54 = vpop.eup %4165  ;;  %v1678_v34 = vadd.f32 -5.0, %v1358_v42  ;;  %v1040_v40 = vadd.f32 1.0, %v5937_v63  ;;  %4191 = vtanh.f32 %v414_v25 }
 0x232   : > { %7354 = vst [vmem:[#allocation195_spill] sm:$0xff] %v5941_v54  ;;  %v5944_v17 = vpop.eup %4167  ;;  %v2217_v14 = vmul.f32 1.442695, %v1677_v56  ;;  %v1359_v27 = vmul.f32 3.5, %v1039_v47  ;;  %v1041_v12 = vadd.f32 1.0, %v5941_v54  ;;  %4193 = vtanh.f32 %v415_v37 }
 0x233   : > { %7355 = vst [vmem:[#allocation196_spill] sm:$0xff] %v5944_v17  ;;  %v5947_v0 = vpop.eup %4169  ;;  %v2219_v4 = vmul.f32 1.442695, %v1678_v34  ;;  %v1360_v7 = vmul.f32 3.5, %v1040_v40  ;;  %v1042_v59 = vadd.f32 1.0, %v5944_v17  ;;  %4195 = vtanh.f32 %v416_v2  ;;  %v7566_v38 = vld [vmem:[#allocation191_spill] sm:$0xff] }
 0x234   : > { %7356 = vst [vmem:[#allocation197_spill] sm:$0xff] %v5947_v0  ;;  %v5950_v32 = vpop.eup %4171  ;;  %4197 = vpow2.f32 %v2217_v14  ;;  %v1679_v42 = vadd.f32 -5.0, %v1359_v27  ;;  %v1361_v63 = vmul.f32 3.5, %v1041_v12  ;;  %v1043_v25 = vadd.f32 1.0, %v5947_v0  ;;  %2957 = vst [vmem:[%s6160_s27 + $0x6e0] sm:$0xff] %v7566_v38  ;;  %v7567_v45 = vld [vmem:[#allocation192_spill] sm:$0xff] }
 0x235   : > { %7357 = vst [vmem:[#allocation198_spill] sm:$0xff] %v5950_v32  ;;  %v5953_v43 = vpop.eup %4173  ;;  %4199 = vpow2.f32 %v2219_v4  ;;  %v1680_v56 = vadd.f32 -5.0, %v1360_v7  ;;  %v1362_v47 = vmul.f32 3.5, %v1042_v59  ;;  %v1044_v37 = vadd.f32 1.0, %v5950_v32  ;;  %2958 = vst [vmem:[%s6160_s27 + $0x6e8] sm:$0xff] %v7567_v45 }
 0x236   : > { %7358 = vst [vmem:[#allocation199_spill] sm:$0xff] %v5953_v43  ;;  %v5956_v54 = vpop.eup %4175  ;;  %v2221_v34 = vmul.f32 1.442695, %v1679_v42  ;;  %v1681_v40 = vadd.f32 -5.0, %v1361_v63  ;;  %v1363_v17 = vmul.f32 3.5, %v1043_v25  ;;  %v1045_v2 = vadd.f32 1.0, %v5953_v43 }
 0x237   : > { %7359 = vst [vmem:[#allocation200_spill] sm:$0xff] %v5956_v54  ;;  %v5959_v51 = vpop.eup %4177  ;;  %v2223_v14 = vmul.f32 1.442695, %v1680_v56  ;;  %v1682_v27 = vadd.f32 -5.0, %v1362_v47  ;;  %v1364_v12 = vmul.f32 3.5, %v1044_v37  ;;  %v1046_v0 = vadd.f32 1.0, %v5956_v54 }
 0x238   : > { %7360 = vst [vmem:[#allocation201_spill] sm:$0xff] %v5959_v51  ;;  %v5962_v58 = vpop.eup %4179  ;;  %4201 = vpow2.f32 %v2221_v34  ;;  %v2225_v7 = vmul.f32 1.442695, %v1681_v40  ;;  %v1683_v4 = vadd.f32 -5.0, %v1363_v17  ;;  %v1365_v59 = vmul.f32 3.5, %v1045_v2  ;;  %v7568_v6 = vld [vmem:[#allocation193_spill] sm:$0xff] }
 0x239   : > { %7361 = vst [vmem:[#allocation202_spill] sm:$0xff] %v5962_v58  ;;  %v5964_v32 = vpop.eup %4181  ;;  %4203 = vpow2.f32 %v2223_v14  ;;  %v2227_v63 = vmul.f32 1.442695, %v1682_v27  ;;  %v1684_v42 = vadd.f32 -5.0, %v1364_v12  ;;  %v1366_v25 = vmul.f32 3.5, %v1046_v0  ;;  %2959 = vst [vmem:[%s6160_s27 + $0x6f0] sm:$0xff] %v7568_v6 }
 0x23a   : > { %7362 = vst [vmem:[#allocation203_spill] sm:$0xff] %v5964_v32  ;;  %v5966_v43 = vpop.eup %4183  ;;  %4205 = vpow2.f32 %v2225_v7  ;;  %v2229_v56 = vmul.f32 1.442695, %v1683_v4  ;;  %v1685_v47 = vadd.f32 -5.0, %v1365_v59  ;;  %v1047_v37 = vadd.f32 1.0, %v5959_v51  ;;  %v7569_v22 = vld [vmem:[#allocation194_spill] sm:$0xff] }
 0x23b   : > { %7363 = vst [vmem:[#allocation204_spill] sm:$0xff] %v5966_v43  ;;  %v5969_v54 = vpop.eup %4185  ;;  %4207 = vpow2.f32 %v2227_v63  ;;  %v2231_v34 = vmul.f32 1.442695, %v1684_v42  ;;  %v1686_v40 = vadd.f32 -5.0, %v1366_v25  ;;  %v1048_v17 = vadd.f32 1.0, %v5962_v58  ;;  %2960 = vst [vmem:[%s6160_s27 + $0x6f8] sm:$0xff] %v7569_v22 }
 0x23c   : > { %7364 = vst [vmem:[#allocation205_spill] sm:$0xff] %v5969_v54  ;;  %v5972_v2 = vpop.eup %4187  ;;  %4209 = vpow2.f32 %v2229_v56  ;;  %v2233_v14 = vmul.f32 1.442695, %v1685_v47  ;;  %v1367_v27 = vmul.f32 3.5, %v1047_v37  ;;  %v1049_v0 = vadd.f32 1.0, %v5964_v32 }
 0x23d   : > { %7365 = vst [vmem:[#allocation206_spill] sm:$0xff] %v5972_v2  ;;  %v5975_v12 = vpop.eup %4189  ;;  %4211 = vpow2.f32 %v2231_v34  ;;  %v2235_v7 = vmul.f32 1.442695, %v1686_v40  ;;  %v1368_v4 = vmul.f32 3.5, %v1048_v17  ;;  %v1050_v59 = vadd.f32 1.0, %v5966_v43 }
 0x23e   : > { %7366 = vst [vmem:[#allocation207_spill] sm:$0xff] %v5975_v12  ;;  %v5978_v51 = vpop.eup %4191  ;;  %4213 = vpow2.f32 %v2233_v14  ;;  %v1687_v63 = vadd.f32 -5.0, %v1367_v27  ;;  %v1369_v42 = vmul.f32 3.5, %v1049_v0  ;;  %v1051_v25 = vadd.f32 1.0, %v5969_v54 }
 0x23f   : > { %7367 = vst [vmem:[#allocation208_spill] sm:$0xff] %v5978_v51  ;;  %v5981_v58 = vpop.eup %4193  ;;  %4215 = vpow2.f32 %v2235_v7  ;;  %v1688_v56 = vadd.f32 -5.0, %v1368_v4  ;;  %v1370_v47 = vmul.f32 3.5, %v1050_v59  ;;  %v1052_v37 = vadd.f32 1.0, %v5972_v2 }
 0x240   : > { %7368 = vst [vmem:[#allocation209_spill] sm:$0xff] %v5981_v58  ;;  %v5984_v34 = vpop.eup %4195  ;;  %v2237_v40 = vmul.f32 1.442695, %v1687_v63  ;;  %v1689_v17 = vadd.f32 -5.0, %v1369_v42  ;;  %v1371_v43 = vmul.f32 3.5, %v1051_v25  ;;  %v1053_v14 = vadd.f32 1.0, %v5975_v12 }
 0x241   : > { %7369 = vst [vmem:[#allocation210_spill] sm:$0xff] %v5984_v34  ;;  %v4198_v27 = vpop.eup %4197  ;;  %v2239_v0 = vmul.f32 1.442695, %v1688_v56  ;;  %v1690_v32 = vadd.f32 -5.0, %v1370_v47  ;;  %v1372_v54 = vmul.f32 3.5, %v1052_v37  ;;  %v1054_v60 = vadd.f32 1.0, %v5978_v51 }
 0x242   : > { %v4200_v48 = vpop.eup %4199  ;;  %2637 = vst [vmem:[%s4886_s19 + $0x6e0] sm:$0xff] %v4198_v27  ;;  %4217 = vpow2.f32 %v2237_v40  ;;  %v2241_v7 = vmul.f32 1.442695, %v1689_v17  ;;  %v1691_v4 = vadd.f32 -5.0, %v1371_v43  ;;  %v1373_v59 = vmul.f32 3.5, %v1053_v14  ;;  %v7578_v16 = vld [vmem:[#allocation203_spill] sm:$0xff] }
 0x243   : > { %2638 = vst [vmem:[%s4886_s19 + $0x6e8] sm:$0xff] %v4200_v48  ;;  %4219 = vpow2.f32 %v2239_v0  ;;  %v2243_v63 = vmul.f32 1.442695, %v1690_v32  ;;  %v1692_v42 = vadd.f32 -5.0, %v1372_v54  ;;  %v1374_v25 = vmul.f32 3.5, %v1054_v60  ;;  %v417_v0 = vld [vmem:[%s4801_s5 + $0x780] sm:$0xff] }
 0x244   : > { %4221 = vpow2.f32 %v2241_v7  ;;  %v2245_v12 = vmul.f32 1.442695, %v1691_v4  ;;  %v1693_v56 = vadd.f32 -5.0, %v1373_v59  ;;  %v1055_v47 = vadd.f32 1.0, %v5981_v58  ;;  %v418_v59 = vld [vmem:[%s4801_s5 + $0x788] sm:$0xff]  ;;  %2969 = vst [vmem:[%s6160_s27 + $0x740] sm:$0xff] %v7578_v16 }
 0x245   : > { %v4202_v37 = vpop.eup %4201  ;;  %4223 = vpow2.f32 %v2243_v63  ;;  %v2247_v40 = vmul.f32 1.442695, %v1692_v42  ;;  %v1694_v17 = vadd.f32 -5.0, %v1374_v25  ;;  %v1056_v43 = vadd.f32 1.0, %v5984_v34  ;;  %v7579_v18 = vld [vmem:[#allocation204_spill] sm:$0xff]  ;;  %v7580_v21 = vld [vmem:[#allocation205_spill] sm:$0xff] }
 0x246   : > { %v4204_v48 = vpop.eup %4203  ;;  %2639 = vst [vmem:[%s4886_s19 + $0x6f0] sm:$0xff] %v4202_v37  ;;  %4225 = vpow2.f32 %v2245_v12  ;;  %v2249_v60 = vmul.f32 1.442695, %v1693_v56  ;;  %v1375_v32 = vmul.f32 3.5, %v1055_v47  ;;  %v419_v37 = vld [vmem:[%s4801_s5 + $0x790] sm:$0xff]  ;;  %2970 = vst [vmem:[%s6160_s27 + $0x748] sm:$0xff] %v7579_v18 }
 0x247   : > { %v4206_v54 = vpop.eup %4205  ;;  %2640 = vst [vmem:[%s4886_s19 + $0x6f8] sm:$0xff] %v4204_v48  ;;  %4227 = vpow2.f32 %v2247_v40  ;;  %v2251_v14 = vmul.f32 1.442695, %v1694_v17  ;;  %v1376_v27 = vmul.f32 3.5, %v1056_v43  ;;  %v420_v17 = vld [vmem:[%s4801_s5 + $0x798] sm:$0xff]  ;;  %v421_v43 = vld [vmem:[%s4801_s5 + $0x7a0] sm:$0xff] }
 0x248   : > { %v4208_v7 = vpop.eup %4207  ;;  %2641 = vst [vmem:[%s4886_s19 + $0x700] sm:$0xff] %v4206_v54  ;;  %4229 = vpow2.f32 %v2249_v60  ;;  %v1695_v4 = vadd.f32 -5.0, %v1375_v32  ;;  %v422_v48 = vld [vmem:[%s4801_s5 + $0x7a8] sm:$0xff]  ;;  %v423_v32 = vld [vmem:[%s4801_s5 + $0x7b0] sm:$0xff]  ;;  %2971 = vst [vmem:[%s6160_s27 + $0x750] sm:$0xff] %v7580_v21 }
 0x249   : > { %v4210_v63 = vpop.eup %4209  ;;  %2642 = vst [vmem:[%s4886_s19 + $0x708] sm:$0xff] %v4208_v7  ;;  %4231 = vpow2.f32 %v2251_v14  ;;  %v1696_v12 = vadd.f32 -5.0, %v1376_v27  ;;  %v424_v14 = vld [vmem:[%s4801_s5 + $0x7b8] sm:$0xff]  ;;  %v7582_v28 = vld [vmem:[#allocation207_spill] sm:$0xff]  ;;  %v7583_v31 = vld [vmem:[#allocation208_spill] sm:$0xff] }
 0x24a   : > { %v4212_v42 = vpop.eup %4211  ;;  %2643 = vst [vmem:[%s4886_s19 + $0x710] sm:$0xff] %v4210_v63  ;;  %v2253_v25 = vmul.f32 1.442695, %v1695_v4  ;;  %4233 = vtanh.f32 %v417_v0  ;;  %v425_v0 = vld [vmem:[%s4801_s5 + $0x7c0] sm:$0xff]  ;;  %v426_v4 = vld [vmem:[%s4801_s5 + $0x7c8] sm:$0xff]  ;;  %v427_v63 = vld [vmem:[%s4801_s5 + $0x7d0] sm:$0xff] }
 0x24b   : > { %v4214_v56 = vpop.eup %4213  ;;  %2644 = vst [vmem:[%s4886_s19 + $0x718] sm:$0xff] %v4212_v42  ;;  %v2255_v47 = vmul.f32 1.442695, %v1696_v12  ;;  %4235 = vtanh.f32 %v418_v59  ;;  %v428_v42 = vld [vmem:[%s4801_s5 + $0x7d8] sm:$0xff]  ;;  %2973 = vst [vmem:[%s6160_s27 + $0x760] sm:$0xff] %v7582_v28  ;;  %v7584_v35 = vld [vmem:[#allocation209_spill] sm:$0xff] }
 0x24c   : > { %v4216_v40 = vpop.eup %4215  ;;  %2645 = vst [vmem:[%s4886_s19 + $0x720] sm:$0xff] %v4214_v56  ;;  %4237 = vpow2.f32 %v2253_v25  ;;  %v429_v56 = vld [vmem:[%s4801_s5 + $0x7e0] sm:$0xff]  ;;  %v7581_v24 = vld [vmem:[#allocation206_spill] sm:$0xff]  ;;  %2974 = vst [vmem:[%s6160_s27 + $0x768] sm:$0xff] %v7583_v31 }
 0x24d   : > { %2646 = vst [vmem:[%s4886_s19 + $0x728] sm:$0xff] %v4216_v40  ;;  %4239 = vpow2.f32 %v2255_v47  ;;  %2972 = vst [vmem:[%s6160_s27 + $0x758] sm:$0xff] %v7581_v24  ;;  %v7585_v39 = vld [vmem:[#allocation210_spill] sm:$0xff] }
 0x24e   : > { %4241 = vtanh.f32 %v419_v37  ;;  %v430_v37 = vld [vmem:[%s4801_s5 + $0x7e8] sm:$0xff]  ;;  %2975 = vst [vmem:[%s6160_s27 + $0x770] sm:$0xff] %v7584_v35  ;;  %2976 = vst [vmem:[%s6160_s27 + $0x778] sm:$0xff] %v7585_v39 }
 0x24f   : > { %v4218_v60 = vpop.eup %4217  ;;  %4243 = vtanh.f32 %v420_v17  ;;  %v431_v17 = vld [vmem:[%s4801_s5 + $0x7f0] sm:$0xff] }
 0x250   : > { %v4220_v54 = vpop.eup %4219  ;;  %2647 = vst [vmem:[%s4886_s19 + $0x730] sm:$0xff] %v4218_v60  ;;  %4245 = vtanh.f32 %v421_v43  ;;  %v432_v60 = vld [vmem:[%s4801_s5 + $0x7f8] sm:$0xff] }
 0x251   : > { %v4222_v27 = vpop.eup %4221  ;;  %2648 = vst [vmem:[%s4886_s19 + $0x738] sm:$0xff] %v4220_v54  ;;  %4247 = vtanh.f32 %v422_v48 }
 0x252   : > { %v4224_v7 = vpop.eup %4223  ;;  %2649 = vst [vmem:[%s4886_s19 + $0x740] sm:$0xff] %v4222_v27  ;;  %4249 = vtanh.f32 %v423_v32 }
 0x253   : > { %v4226_v59 = vpop.eup %4225  ;;  %2650 = vst [vmem:[%s4886_s19 + $0x748] sm:$0xff] %v4224_v7  ;;  %4251 = vtanh.f32 %v424_v14  ;;  %v433_v14 = vld [vmem:[%s4801_s5 + $0x800] sm:$0xff]  ;;  %v434_v7 = vld [vmem:[%s4801_s5 + $0x808] sm:$0xff] }
 0x254   : > { %v4228_v12 = vpop.eup %4227  ;;  %2651 = vst [vmem:[%s4886_s19 + $0x750] sm:$0xff] %v4226_v59  ;;  %4253 = vtanh.f32 %v425_v0 }
 0x255   : > { %v4230_v25 = vpop.eup %4229  ;;  %2652 = vst [vmem:[%s4886_s19 + $0x758] sm:$0xff] %v4228_v12  ;;  %4255 = vtanh.f32 %v426_v4 }
 0x256   : > { %v4232_v47 = vpop.eup %4231  ;;  %2653 = vst [vmem:[%s4886_s19 + $0x760] sm:$0xff] %v4230_v25  ;;  %4257 = vtanh.f32 %v427_v63  ;;  %v435_v63 = vld [vmem:[%s4801_s5 + $0x810] sm:$0xff] }
 0x257   : > { %v6021_v40 = vpop.eup %4233  ;;  %2654 = vst [vmem:[%s4886_s19 + $0x768] sm:$0xff] %v4232_v47  ;;  %4259 = vtanh.f32 %v428_v42 }
 0x258   : > { %7370 = vst [vmem:[#allocation211_spill] sm:$0xff] %v6021_v40  ;;  %v6025_v43 = vpop.eup %4235  ;;  %v1057_v48 = vadd.f32 1.0, %v6021_v40  ;;  %4261 = vtanh.f32 %v429_v56  ;;  %v436_v56 = vld [vmem:[%s4801_s5 + $0x818] sm:$0xff] }
 0x259   : > { %7371 = vst [vmem:[#allocation212_spill] sm:$0xff] %v6025_v43  ;;  %v4238_v32 = vpop.eup %4237  ;;  %v1058_v54 = vadd.f32 1.0, %v6025_v43  ;;  %4263 = vtanh.f32 %v430_v37 }
 0x25a   : > { %v4240_v27 = vpop.eup %4239  ;;  %2655 = vst [vmem:[%s4886_s19 + $0x770] sm:$0xff] %v4238_v32  ;;  %v1377_v0 = vmul.f32 3.5, %v1057_v48  ;;  %4265 = vtanh.f32 %v431_v17 }
 0x25b   : > { %v6033_v4 = vpop.eup %4241  ;;  %2656 = vst [vmem:[%s4886_s19 + $0x778] sm:$0xff] %v4240_v27  ;;  %v1378_v59 = vmul.f32 3.5, %v1058_v54  ;;  %4267 = vtanh.f32 %v432_v60 }
 0x25c   : > { %7372 = vst [vmem:[#allocation213_spill] sm:$0xff] %v6033_v4  ;;  %v6037_v12 = vpop.eup %4243  ;;  %v1697_v42 = vadd.f32 -5.0, %v1377_v0  ;;  %v1059_v25 = vadd.f32 1.0, %v6033_v4  ;;  %4269 = vtanh.f32 %v433_v14 }
 0x25d   : > { %7373 = vst [vmem:[#allocation214_spill] sm:$0xff] %v6037_v12  ;;  %v6041_v47 = vpop.eup %4245  ;;  %v1698_v37 = vadd.f32 -5.0, %v1378_v59  ;;  %v1060_v48 = vadd.f32 1.0, %v6037_v12  ;;  %4271 = vtanh.f32 %v434_v7 }
 0x25e   : > { %7374 = vst [vmem:[#allocation215_spill] sm:$0xff] %v6041_v47  ;;  %v6044_v17 = vpop.eup %4247  ;;  %v2257_v32 = vmul.f32 1.442695, %v1697_v42  ;;  %v1379_v27 = vmul.f32 3.5, %v1059_v25  ;;  %v1061_v60 = vadd.f32 1.0, %v6041_v47  ;;  %4273 = vtanh.f32 %v435_v63 }
 0x25f   : > { %7375 = vst [vmem:[#allocation216_spill] sm:$0xff] %v6044_v17  ;;  %v6047_v54 = vpop.eup %4249  ;;  %v2259_v0 = vmul.f32 1.442695, %v1698_v37  ;;  %v1380_v43 = vmul.f32 3.5, %v1060_v48  ;;  %v1062_v14 = vadd.f32 1.0, %v6044_v17  ;;  %4275 = vtanh.f32 %v436_v56  ;;  %v7586_v44 = vld [vmem:[#allocation211_spill] sm:$0xff] }
 0x260   : > { %7376 = vst [vmem:[#allocation217_spill] sm:$0xff] %v6047_v54  ;;  %v6050_v4 = vpop.eup %4251  ;;  %4277 = vpow2.f32 %v2257_v32  ;;  %v1699_v59 = vadd.f32 -5.0, %v1379_v27  ;;  %v1381_v12 = vmul.f32 3.5, %v1061_v60  ;;  %v1063_v7 = vadd.f32 1.0, %v6047_v54  ;;  %2977 = vst [vmem:[%s6160_s27 + $0x780] sm:$0xff] %v7586_v44  ;;  %v7587_v49 = vld [vmem:[#allocation212_spill] sm:$0xff] }
 0x261   : > { %7377 = vst [vmem:[#allocation218_spill] sm:$0xff] %v6050_v4  ;;  %v6053_v40 = vpop.eup %4253  ;;  %4279 = vpow2.f32 %v2259_v0  ;;  %v1700_v42 = vadd.f32 -5.0, %v1380_v43  ;;  %v1382_v25 = vmul.f32 3.5, %v1062_v14  ;;  %v1064_v63 = vadd.f32 1.0, %v6050_v4  ;;  %2978 = vst [vmem:[%s6160_s27 + $0x788] sm:$0xff] %v7587_v49 }
 0x262   : > { %7378 = vst [vmem:[#allocation219_spill] sm:$0xff] %v6053_v40  ;;  %v6056_v47 = vpop.eup %4255  ;;  %v2261_v37 = vmul.f32 1.442695, %v1699_v59  ;;  %v1701_v48 = vadd.f32 -5.0, %v1381_v12  ;;  %v1383_v17 = vmul.f32 3.5, %v1063_v7  ;;  %v1065_v56 = vadd.f32 1.0, %v6053_v40 }
 0x263   : > { %7379 = vst [vmem:[#allocation220_spill] sm:$0xff] %v6056_v47  ;;  %v6059_v34 = vpop.eup %4257  ;;  %v2263_v32 = vmul.f32 1.442695, %v1700_v42  ;;  %v1702_v27 = vadd.f32 -5.0, %v1382_v25  ;;  %v1384_v60 = vmul.f32 3.5, %v1064_v63  ;;  %v1066_v54 = vadd.f32 1.0, %v6056_v47 }
 0x264   : > { %7380 = vst [vmem:[#allocation221_spill] sm:$0xff] %v6059_v34  ;;  %v6062_v58 = vpop.eup %4259  ;;  %4281 = vpow2.f32 %v2261_v37  ;;  %v2265_v43 = vmul.f32 1.442695, %v1701_v48  ;;  %v1703_v0 = vadd.f32 -5.0, %v1383_v17  ;;  %v1385_v14 = vmul.f32 3.5, %v1065_v56  ;;  %v7588_v53 = vld [vmem:[#allocation213_spill] sm:$0xff] }
 0x265   : > { %7381 = vst [vmem:[#allocation222_spill] sm:$0xff] %v6062_v58  ;;  %v6064_v4 = vpop.eup %4261  ;;  %4283 = vpow2.f32 %v2263_v32  ;;  %v2267_v12 = vmul.f32 1.442695, %v1702_v27  ;;  %v1704_v59 = vadd.f32 -5.0, %v1384_v60  ;;  %v1386_v7 = vmul.f32 3.5, %v1066_v54  ;;  %2979 = vst [vmem:[%s6160_s27 + $0x790] sm:$0xff] %v7588_v53 }
 0x266   : > { %7382 = vst [vmem:[#allocation223_spill] sm:$0xff] %v6064_v4  ;;  %v6066_v40 = vpop.eup %4263  ;;  %4285 = vpow2.f32 %v2265_v43  ;;  %v2269_v42 = vmul.f32 1.442695, %v1703_v0  ;;  %v1705_v25 = vadd.f32 -5.0, %v1385_v14  ;;  %v1067_v63 = vadd.f32 1.0, %v6059_v34  ;;  %v7589_v57 = vld [vmem:[#allocation214_spill] sm:$0xff] }
 0x267   : > { %7383 = vst [vmem:[#allocation224_spill] sm:$0xff] %v6066_v40  ;;  %v6069_v47 = vpop.eup %4265  ;;  %4287 = vpow2.f32 %v2267_v12  ;;  %v2271_v37 = vmul.f32 1.442695, %v1704_v59  ;;  %v1706_v48 = vadd.f32 -5.0, %v1386_v7  ;;  %v1068_v17 = vadd.f32 1.0, %v6062_v58  ;;  %2980 = vst [vmem:[%s6160_s27 + $0x798] sm:$0xff] %v7589_v57 }
 0x268   : > { %7384 = vst [vmem:[#allocation225_spill] sm:$0xff] %v6069_v47  ;;  %v6072_v56 = vpop.eup %4267  ;;  %4289 = vpow2.f32 %v2269_v42  ;;  %v2273_v32 = vmul.f32 1.442695, %v1705_v25  ;;  %v1387_v27 = vmul.f32 3.5, %v1067_v63  ;;  %v1069_v54 = vadd.f32 1.0, %v6064_v4  ;;  %v7590_v61 = vld [vmem:[#allocation215_spill] sm:$0xff] }
 0x269   : > { %v6075_v60 = vpop.eup %4269  ;;  %4291 = vpow2.f32 %v2271_v37  ;;  %v2275_v43 = vmul.f32 1.442695, %v1706_v48  ;;  %v1388_v0 = vmul.f32 3.5, %v1068_v17  ;;  %v1070_v14 = vadd.f32 1.0, %v6066_v40  ;;  %2981 = vst [vmem:[%s6160_s27 + $0x7a0] sm:$0xff] %v7590_v61  ;;  %v7591_v1 = vld [vmem:[#allocation216_spill] sm:$0xff] }
 0x26a   : > { %7385 = vst [vmem:[#allocation226_spill] sm:$0xff] %v6075_v60  ;;  %v6078_v34 = vpop.eup %4271  ;;  %4293 = vpow2.f32 %v2273_v32  ;;  %v1707_v12 = vadd.f32 -5.0, %v1387_v27  ;;  %v1389_v59 = vmul.f32 3.5, %v1069_v54  ;;  %v1071_v7 = vadd.f32 1.0, %v6069_v47  ;;  %2982 = vst [vmem:[%s6160_s27 + $0x7a8] sm:$0xff] %v7591_v1  ;;  %v7592_v5 = vld [vmem:[#allocation217_spill] sm:$0xff] }
 0x26b   : > { %v6081_v58 = vpop.eup %4273  ;;  %4295 = vpow2.f32 %v2275_v43  ;;  %v1708_v42 = vadd.f32 -5.0, %v1388_v0  ;;  %v1390_v25 = vmul.f32 3.5, %v1070_v14  ;;  %v1072_v63 = vadd.f32 1.0, %v6072_v56  ;;  %2983 = vst [vmem:[%s6160_s27 + $0x7b0] sm:$0xff] %v7592_v5  ;;  %v7593_v9 = vld [vmem:[#allocation218_spill] sm:$0xff]  ;;  %v7594_v13 = vld [vmem:[#allocation219_spill] sm:$0xff] }
 0x26c   : > { %v6084_v37 = vpop.eup %4275  ;;  %v2277_v48 = vmul.f32 1.442695, %v1707_v12  ;;  %v1709_v17 = vadd.f32 -5.0, %v1389_v59  ;;  %v1391_v40 = vmul.f32 3.5, %v1071_v7  ;;  %v1073_v32 = vadd.f32 1.0, %v6075_v60  ;;  %2984 = vst [vmem:[%s6160_s27 + $0x7b8] sm:$0xff] %v7593_v9 }
 0x26d   : > { %v4278_v27 = vpop.eup %4277  ;;  %v2279_v54 = vmul.f32 1.442695, %v1708_v42  ;;  %v1710_v4 = vadd.f32 -5.0, %v1390_v25  ;;  %v1392_v47 = vmul.f32 3.5, %v1072_v63  ;;  %v1074_v51 = vadd.f32 1.0, %v6078_v34  ;;  %2985 = vst [vmem:[%s6160_s27 + $0x7c0] sm:$0xff] %v7594_v13 }
 0x26e   : > { %v4280_v2 = vpop.eup %4279  ;;  %2657 = vst [vmem:[%s4886_s19 + $0x780] sm:$0xff] %v4278_v27  ;;  %4297 = vpow2.f32 %v2277_v48  ;;  %v2281_v43 = vmul.f32 1.442695, %v1709_v17  ;;  %v1711_v0 = vadd.f32 -5.0, %v1391_v40  ;;  %v1393_v14 = vmul.f32 3.5, %v1073_v32  ;;  %v7595_v19 = vld [vmem:[#allocation220_spill] sm:$0xff] }
 0x26f   : > { %2658 = vst [vmem:[%s4886_s19 + $0x788] sm:$0xff] %v4280_v2  ;;  %4299 = vpow2.f32 %v2279_v54  ;;  %v2283_v12 = vmul.f32 1.442695, %v1710_v4  ;;  %v1712_v59 = vadd.f32 -5.0, %v1392_v47  ;;  %v1394_v7 = vmul.f32 3.5, %v1074_v51  ;;  %v437_v54 = vld [vmem:[%s4801_s5 + $0x820] sm:$0xff] }
 0x270   : > { %4301 = vpow2.f32 %v2281_v43  ;;  %v2285_v60 = vmul.f32 1.442695, %v1711_v0  ;;  %v1713_v42 = vadd.f32 -5.0, %v1393_v14  ;;  %v1075_v25 = vadd.f32 1.0, %v6081_v58  ;;  %v438_v14 = vld [vmem:[%s4801_s5 + $0x828] sm:$0xff]  ;;  %2986 = vst [vmem:[%s6160_s27 + $0x7c8] sm:$0xff] %v7595_v19 }
 0x271   : > { %v4282_v63 = vpop.eup %4281  ;;  %4303 = vpow2.f32 %v2283_v12  ;;  %v2287_v48 = vmul.f32 1.442695, %v1712_v59  ;;  %v1714_v17 = vadd.f32 -5.0, %v1394_v7  ;;  %v1076_v40 = vadd.f32 1.0, %v6084_v37  ;;  %v7596_v26 = vld [vmem:[#allocation221_spill] sm:$0xff]  ;;  %v7597_v33 = vld [vmem:[#allocation222_spill] sm:$0xff] }
 0x272   : > { %v4284_v2 = vpop.eup %4283  ;;  %2659 = vst [vmem:[%s4886_s19 + $0x790] sm:$0xff] %v4282_v63  ;;  %4305 = vpow2.f32 %v2285_v60  ;;  %v2289_v51 = vmul.f32 1.442695, %v1713_v42  ;;  %v1395_v4 = vmul.f32 3.5, %v1075_v25  ;;  %v439_v63 = vld [vmem:[%s4801_s5 + $0x830] sm:$0xff]  ;;  %2987 = vst [vmem:[%s6160_s27 + $0x7d0] sm:$0xff] %v7596_v26 }
 0x273   : > { %v4286_v47 = vpop.eup %4285  ;;  %2660 = vst [vmem:[%s4886_s19 + $0x798] sm:$0xff] %v4284_v2  ;;  %4307 = vpow2.f32 %v2287_v48  ;;  %v2291_v32 = vmul.f32 1.442695, %v1714_v17  ;;  %v1396_v27 = vmul.f32 3.5, %v1076_v40  ;;  %v440_v17 = vld [vmem:[%s4801_s5 + $0x838] sm:$0xff]  ;;  %v441_v40 = vld [vmem:[%s4801_s5 + $0x840] sm:$0xff] }
 0x274   : > { %v4288_v43 = vpop.eup %4287  ;;  %2661 = vst [vmem:[%s4886_s19 + $0x7a0] sm:$0xff] %v4286_v47  ;;  %4309 = vpow2.f32 %v2289_v51  ;;  %v1715_v0 = vadd.f32 -5.0, %v1395_v4  ;;  %v442_v2 = vld [vmem:[%s4801_s5 + $0x848] sm:$0xff]  ;;  %v443_v4 = vld [vmem:[%s4801_s5 + $0x850] sm:$0xff]  ;;  %2988 = vst [vmem:[%s6160_s27 + $0x7d8] sm:$0xff] %v7597_v33 }
 0x275   : > { %v4290_v12 = vpop.eup %4289  ;;  %2662 = vst [vmem:[%s4886_s19 + $0x7a8] sm:$0xff] %v4288_v43  ;;  %4311 = vpow2.f32 %v2291_v32  ;;  %v1716_v60 = vadd.f32 -5.0, %v1396_v27  ;;  %v444_v32 = vld [vmem:[%s4801_s5 + $0x858] sm:$0xff]  ;;  %v7598_v50 = vld [vmem:[#allocation223_spill] sm:$0xff]  ;;  %v7599_v52 = vld [vmem:[#allocation224_spill] sm:$0xff] }
 0x276   : > { %v4292_v59 = vpop.eup %4291  ;;  %2663 = vst [vmem:[%s4886_s19 + $0x7b0] sm:$0xff] %v4290_v12  ;;  %v2293_v7 = vmul.f32 1.442695, %v1715_v0  ;;  %4313 = vtanh.f32 %v437_v54  ;;  %v445_v54 = vld [vmem:[%s4801_s5 + $0x860] sm:$0xff]  ;;  %v446_v0 = vld [vmem:[%s4801_s5 + $0x868] sm:$0xff]  ;;  %v447_v12 = vld [vmem:[%s4801_s5 + $0x870] sm:$0xff] }
 0x277   : > { %v4294_v42 = vpop.eup %4293  ;;  %2664 = vst [vmem:[%s4886_s19 + $0x7b8] sm:$0xff] %v4292_v59  ;;  %v2295_v25 = vmul.f32 1.442695, %v1716_v60  ;;  %4315 = vtanh.f32 %v438_v14  ;;  %v448_v59 = vld [vmem:[%s4801_s5 + $0x878] sm:$0xff]  ;;  %2989 = vst [vmem:[%s6160_s27 + $0x7e0] sm:$0xff] %v7598_v50  ;;  %v7600_v8 = vld [vmem:[#allocation225_spill] sm:$0xff] }
 0x278   : > { %v4296_v48 = vpop.eup %4295  ;;  %2665 = vst [vmem:[%s4886_s19 + $0x7c0] sm:$0xff] %v4294_v42  ;;  %4317 = vpow2.f32 %v2293_v7  ;;  %v449_v42 = vld [vmem:[%s4801_s5 + $0x880] sm:$0xff]  ;;  %2990 = vst [vmem:[%s6160_s27 + $0x7e8] sm:$0xff] %v7599_v52  ;;  %v7601_v11 = vld [vmem:[#allocation226_spill] sm:$0xff] }
 0x279   : > { %2666 = vst [vmem:[%s4886_s19 + $0x7c8] sm:$0xff] %v4296_v48  ;;  %4319 = vpow2.f32 %v2295_v25  ;;  %2991 = vst [vmem:[%s6160_s27 + $0x7f0] sm:$0xff] %v7600_v8 }
 0x27a   : > { %4321 = vtanh.f32 %v439_v63  ;;  %v450_v63 = vld [vmem:[%s4801_s5 + $0x888] sm:$0xff]  ;;  %2992 = vst [vmem:[%s6160_s27 + $0x7f8] sm:$0xff] %v6072_v56  ;;  %2993 = vst [vmem:[%s6160_s27 + $0x800] sm:$0xff] %v7601_v11 }
 0x27b   : > { %v4298_v51 = vpop.eup %4297  ;;  %4323 = vtanh.f32 %v440_v17  ;;  %v451_v17 = vld [vmem:[%s4801_s5 + $0x890] sm:$0xff]  ;;  %2994 = vst [vmem:[%s6160_s27 + $0x808] sm:$0xff] %v6078_v34  ;;  %2995 = vst [vmem:[%s6160_s27 + $0x810] sm:$0xff] %v6081_v58 }
 0x27c   : > { %v4300_v47 = vpop.eup %4299  ;;  %2667 = vst [vmem:[%s4886_s19 + $0x7d0] sm:$0xff] %v4298_v51  ;;  %4325 = vtanh.f32 %v441_v40  ;;  %v452_v51 = vld [vmem:[%s4801_s5 + $0x898] sm:$0xff]  ;;  %2996 = vst [vmem:[%s6160_s27 + $0x818] sm:$0xff] %v6084_v37 }
 0x27d   : > { %v4302_v27 = vpop.eup %4301  ;;  %2668 = vst [vmem:[%s4886_s19 + $0x7d8] sm:$0xff] %v4300_v47  ;;  %4327 = vtanh.f32 %v442_v2 }
 0x27e   : > { %v4304_v43 = vpop.eup %4303  ;;  %2669 = vst [vmem:[%s4886_s19 + $0x7e0] sm:$0xff] %v4302_v27  ;;  %4329 = vtanh.f32 %v443_v4 }
 0x27f   : > { %v4306_v14 = vpop.eup %4305  ;;  %2670 = vst [vmem:[%s4886_s19 + $0x7e8] sm:$0xff] %v4304_v43  ;;  %4331 = vtanh.f32 %v444_v32  ;;  %v453_v32 = vld [vmem:[%s4801_s5 + $0x8a0] sm:$0xff]  ;;  %v454_v43 = vld [vmem:[%s4801_s5 + $0x8a8] sm:$0xff] }
 0x280   : > { %v4308_v60 = vpop.eup %4307  ;;  %2671 = vst [vmem:[%s4886_s19 + $0x7f0] sm:$0xff] %v4306_v14  ;;  %4333 = vtanh.f32 %v445_v54 }
 0x281   : > { %v4310_v7 = vpop.eup %4309  ;;  %2672 = vst [vmem:[%s4886_s19 + $0x7f8] sm:$0xff] %v4308_v60  ;;  %4335 = vtanh.f32 %v446_v0 }
 0x282   : > { %v4312_v25 = vpop.eup %4311  ;;  %2673 = vst [vmem:[%s4886_s19 + $0x800] sm:$0xff] %v4310_v7  ;;  %4337 = vtanh.f32 %v447_v12  ;;  %v455_v12 = vld [vmem:[%s4801_s5 + $0x8b0] sm:$0xff] }
 0x283   : > { %v6121_v48 = vpop.eup %4313  ;;  %2674 = vst [vmem:[%s4886_s19 + $0x808] sm:$0xff] %v4312_v25  ;;  %4339 = vtanh.f32 %v448_v59 }
 0x284   : > { %v6125_v40 = vpop.eup %4315  ;;  %v1077_v2 = vadd.f32 1.0, %v6121_v48  ;;  %4341 = vtanh.f32 %v449_v42  ;;  %v6141_v42 = vld [vmem:[%s4801_s5 + $0x8b8] sm:$0xff]  ;;  %2997 = vst [vmem:[%s6160_s27 + $0x820] sm:$0xff] %v6121_v48 }
 0x285   : > { %v4318_v4 = vpop.eup %4317  ;;  %v1078_v47 = vadd.f32 1.0, %v6125_v40  ;;  %4343 = vtanh.f32 %v450_v63  ;;  %2998 = vst [vmem:[%s6160_s27 + $0x828] sm:$0xff] %v6125_v40 }
 0x286   : > { %v4320_v27 = vpop.eup %4319  ;;  %2675 = vst [vmem:[%s4886_s19 + $0x810] sm:$0xff] %v4318_v4  ;;  %v1397_v54 = vmul.f32 3.5, %v1077_v2  ;;  %4345 = vtanh.f32 %v451_v17 }
 0x287   : > { %v6133_v0 = vpop.eup %4321  ;;  %2676 = vst [vmem:[%s4886_s19 + $0x818] sm:$0xff] %v4320_v27  ;;  %v1398_v14 = vmul.f32 3.5, %v1078_v47  ;;  %4347 = vtanh.f32 %v452_v51  ;;  %v7427_v27 = vld [vmem:[#allocation52_spill] sm:$0xff] }
 0x288   : > { %v6137_v60 = vpop.eup %4323  ;;  %v1717_v59 = vadd.f32 -5.0, %v1397_v54  ;;  %v1079_v7 = vadd.f32 1.0, %v6133_v0  ;;  %4349 = vtanh.f32 %v453_v32  ;;  %v7426_v32 = vld [vmem:[#allocation51_spill] sm:$0xff]  ;;  %2818 = vst [vmem:[%s6160_s27 + $0x288] sm:$0xff] %v7427_v27  ;;  %v7428_v54 = vld [vmem:[#allocation53_spill] sm:$0xff]  ;;  %v7475_v27 = vld [vmem:[#allocation100_spill] sm:$0xff] }
 0x289   : > { %v6143_v25 = vpop.eup %4325  ;;  %v6145_v63 = vadd.f32 -5.0, %v1398_v14  ;;  %v6148_v17 = vadd.f32 1.0, %v6137_v60  ;;  %4351 = vtanh.f32 %v454_v43  ;;  %2817 = vst [vmem:[%s6160_s27 + $0x280] sm:$0xff] %v7426_v32  ;;  %2819 = vst [vmem:[%s6160_s27 + $0x290] sm:$0xff] %v7428_v54  ;;  %v7429_v43 = vld [vmem:[#allocation54_spill] sm:$0xff]  ;;  %v7430_v14 = vld [vmem:[#allocation55_spill] sm:$0xff] }
 0x28a   : > { %v6150_v2 = vpop.eup %4327  ;;  %v6152_v51 = vmul.f32 1.442695, %v1717_v59  ;;  %v6154_v4 = vmul.f32 3.5, %v1079_v7  ;;  %v6157_v47 = vadd.f32 1.0, %v6143_v25  ;;  %4353 = vtanh.f32 %v455_v12  ;;  %2820 = vst [vmem:[%s6160_s27 + $0x298] sm:$0xff] %v7429_v43  ;;  %2821 = vst [vmem:[%s6160_s27 + $0x2a0] sm:$0xff] %v7430_v14 }
 0x28b   : > { %v7431_v12 = vld [vmem:[#allocation56_spill] sm:$0xff]  ;;  %v7432_v59 = vld [vmem:[#allocation57_spill] sm:$0xff]  ;;  %v7433_v7 = vld [vmem:[#allocation58_spill] sm:$0xff]  ;;  %2866 = vst [vmem:[%s6160_s27 + $0x408] sm:$0xff] %v7475_v27  ;;  %v4330_v56 = vpop.eup %4329  ;;  %v2299_v15 = vmul.f32 1.442695, %v6145_v63  ;;  %4355 = vtanh.f32 %v6141_v42 }
 0x28c   : > { %2822 = vst [vmem:[%s6160_s27 + $0x2a8] sm:$0xff] %v7431_v12  ;;  %2823 = vst [vmem:[%s6160_s27 + $0x2b0] sm:$0xff] %v7432_v59  ;;  %v7474_v32 = vld [vmem:[#allocation99_spill] sm:$0xff]  ;;  %v7476_v54 = vld [vmem:[#allocation101_spill] sm:$0xff]  ;;  %v1400_v34 = vmul.f32 3.5, %v6148_v17  ;;  %v1082_v58 = vadd.f32 1.0, %v6150_v2  ;;  %v4332_v37 = vpop.eup %4331  ;;  %4357 = vpow2.f32 %v6152_v51 }
 0x28d   : > { %2824 = vst [vmem:[%s6160_s27 + $0x2b8] sm:$0xff] %v7433_v7  ;;  %2865 = vst [vmem:[%s6160_s27 + $0x400] sm:$0xff] %v7474_v32  ;;  %v7477_v43 = vld [vmem:[#allocation102_spill] sm:$0xff]  ;;  %v7478_v14 = vld [vmem:[#allocation103_spill] sm:$0xff]  ;;  %v1719_v48 = vadd.f32 -5.0, %v6154_v4  ;;  %v1401_v40 = vmul.f32 3.5, %v6157_v47  ;;  %4359 = vpow2.f32 %v2299_v15 }
 0x28e   : > { %2867 = vst [vmem:[%s6160_s27 + $0x410] sm:$0xff] %v7476_v54  ;;  %2868 = vst [vmem:[%s6160_s27 + $0x418] sm:$0xff] %v7477_v43  ;;  %v7479_v12 = vld [vmem:[#allocation104_spill] sm:$0xff]  ;;  %v7480_v59 = vld [vmem:[#allocation105_spill] sm:$0xff]  ;;  %v1402_v63 = vmul.f32 3.5, %v1082_v58  ;;  %v1084_v17 = vadd.f32 1.0, %v4332_v37 }
 0x28f   : > { %2869 = vst [vmem:[%s6160_s27 + $0x420] sm:$0xff] %v7478_v14  ;;  %2870 = vst [vmem:[%s6160_s27 + $0x428] sm:$0xff] %v7479_v12  ;;  %v7481_v7 = vld [vmem:[#allocation106_spill] sm:$0xff]  ;;  %v7522_v32 = vld [vmem:[#allocation147_spill] sm:$0xff]  ;;  %v2301_v23 = vmul.f32 1.442695, %v1719_v48 }
 0x290   : > { %2871 = vst [vmem:[%s6160_s27 + $0x430] sm:$0xff] %v7480_v59  ;;  %2872 = vst [vmem:[%s6160_s27 + $0x438] sm:$0xff] %v7481_v7  ;;  %v7523_v27 = vld [vmem:[#allocation148_spill] sm:$0xff]  ;;  %v7524_v54 = vld [vmem:[#allocation149_spill] sm:$0xff]  ;;  %v1722_v47 = vadd.f32 -5.0, %v1402_v63  ;;  %v1404_v41 = vmul.f32 3.5, %v1084_v17 }
 0x291   : > { %2913 = vst [vmem:[%s6160_s27 + $0x580] sm:$0xff] %v7522_v32  ;;  %2914 = vst [vmem:[%s6160_s27 + $0x588] sm:$0xff] %v7523_v27  ;;  %v7525_v43 = vld [vmem:[#allocation150_spill] sm:$0xff]  ;;  %v7526_v14 = vld [vmem:[#allocation151_spill] sm:$0xff]  ;;  %4361 = vpow2.f32 %v2301_v23 }
 0x292   : > { %2915 = vst [vmem:[%s6160_s27 + $0x590] sm:$0xff] %v7524_v54  ;;  %2916 = vst [vmem:[%s6160_s27 + $0x598] sm:$0xff] %v7525_v43  ;;  %v7527_v12 = vld [vmem:[#allocation152_spill] sm:$0xff]  ;;  %v7528_v59 = vld [vmem:[#allocation153_spill] sm:$0xff]  ;;  %v2307_v29 = vmul.f32 1.442695, %v1722_v47 }
 0x293   : > { %2917 = vst [vmem:[%s6160_s27 + $0x5a0] sm:$0xff] %v7526_v14  ;;  %2918 = vst [vmem:[%s6160_s27 + $0x5a8] sm:$0xff] %v7527_v12  ;;  %v7529_v7 = vld [vmem:[#allocation154_spill] sm:$0xff]  ;;  %v7570_v32 = vld [vmem:[#allocation195_spill] sm:$0xff]  ;;  %v1724_v38 = vadd.f32 -5.0, %v1404_v41 }
 0x294   : > { %2919 = vst [vmem:[%s6160_s27 + $0x5b0] sm:$0xff] %v7528_v59  ;;  %2920 = vst [vmem:[%s6160_s27 + $0x5b8] sm:$0xff] %v7529_v7  ;;  %v7571_v27 = vld [vmem:[#allocation196_spill] sm:$0xff]  ;;  %v7572_v54 = vld [vmem:[#allocation197_spill] sm:$0xff] }
 0x295   : > { %2961 = vst [vmem:[%s6160_s27 + $0x700] sm:$0xff] %v7570_v32  ;;  %2962 = vst [vmem:[%s6160_s27 + $0x708] sm:$0xff] %v7571_v27  ;;  %v7573_v43 = vld [vmem:[#allocation198_spill] sm:$0xff]  ;;  %v7574_v14 = vld [vmem:[#allocation199_spill] sm:$0xff] }
 0x296   : > { %2963 = vst [vmem:[%s6160_s27 + $0x710] sm:$0xff] %v7572_v54  ;;  %2964 = vst [vmem:[%s6160_s27 + $0x718] sm:$0xff] %v7573_v43  ;;  %v7575_v12 = vld [vmem:[#allocation200_spill] sm:$0xff]  ;;  %v7576_v59 = vld [vmem:[#allocation201_spill] sm:$0xff]  ;;  %v2311_v43 = vmul.f32 1.442695, %v1724_v38 }
 0x297   : > { %2965 = vst [vmem:[%s6160_s27 + $0x720] sm:$0xff] %v7574_v14  ;;  %2966 = vst [vmem:[%s6160_s27 + $0x728] sm:$0xff] %v7575_v12  ;;  %v7577_v7 = vld [vmem:[#allocation202_spill] sm:$0xff]  ;;  %v457_v41 = vld [vmem:[%s4801_s5 + $0x8c0] sm:$0xff] }
 0x298   : > { %2967 = vst [vmem:[%s6160_s27 + $0x730] sm:$0xff] %v7576_v59  ;;  %2968 = vst [vmem:[%s6160_s27 + $0x738] sm:$0xff] %v7577_v7 }
 0x299   : > { %2999 = vst [vmem:[%s6160_s27 + $0x830] sm:$0xff] %v6133_v0  ;;  %3000 = vst [vmem:[%s6160_s27 + $0x838] sm:$0xff] %v6137_v60  ;;  %v1083_v0 = vadd.f32 1.0, %v4330_v56  ;;  %v4334_v60 = vpop.eup %4333 }
 0x29a   : > { %3001 = vst [vmem:[%s6160_s27 + $0x840] sm:$0xff] %v6143_v25  ;;  %3002 = vst [vmem:[%s6160_s27 + $0x848] sm:$0xff] %v6150_v2  ;;  %v1720_v25 = vadd.f32 -5.0, %v1400_v34  ;;  %v4336_v42 = vpop.eup %4335  ;;  %v1721_v2 = vadd.f32 -5.0, %v1401_v40  ;;  %v1085_v51 = vadd.f32 1.0, %v4334_v60 }
 0x29b   : > { %3003 = vst [vmem:[%s6160_s27 + $0x850] sm:$0xff] %v4330_v56  ;;  %3004 = vst [vmem:[%s6160_s27 + $0x858] sm:$0xff] %v4332_v37  ;;  %v1403_v30 = vmul.f32 3.5, %v1083_v0  ;;  %v4338_v36 = vpop.eup %4337  ;;  %v1086_v46 = vadd.f32 1.0, %v4336_v42 }
 0x29c   : > { %3005 = vst [vmem:[%s6160_s27 + $0x860] sm:$0xff] %v4334_v60  ;;  %v2303_v4 = vmul.f32 1.442695, %v1720_v25  ;;  %3006 = vst [vmem:[%s6160_s27 + $0x868] sm:$0xff] %v4336_v42  ;;  %v4340_v55 = vpop.eup %4339  ;;  %v2305_v62 = vmul.f32 1.442695, %v1721_v2 }
 0x29d   : > { %v1723_v3 = vadd.f32 -5.0, %v1403_v30  ;;  %v1405_v10 = vmul.f32 3.5, %v1085_v51  ;;  %3007 = vst [vmem:[%s6160_s27 + $0x870] sm:$0xff] %v4338_v36  ;;  %v4342_v20 = vpop.eup %4341  ;;  %v1406_v45 = vmul.f32 3.5, %v1086_v46  ;;  %3008 = vst [vmem:[%s6160_s27 + $0x878] sm:$0xff] %v4340_v55  ;;  %v1087_v27 = vadd.f32 1.0, %v4338_v36 }
 0x29e   : > { %4363 = vpow2.f32 %v2303_v4  ;;  %v4344_v6 = vpop.eup %4343  ;;  %3009 = vst [vmem:[%s6160_s27 + $0x880] sm:$0xff] %v4342_v20  ;;  %v1088_v12 = vadd.f32 1.0, %v4340_v55  ;;  %v1089_v18 = vadd.f32 1.0, %v4342_v20 }
 0x29f   : > { %4365 = vpow2.f32 %v2305_v62  ;;  %v2309_v22 = vmul.f32 1.442695, %v1723_v3  ;;  %v1725_v32 = vadd.f32 -5.0, %v1405_v10  ;;  %v4346_v54 = vpop.eup %4345  ;;  %v1726_v14 = vadd.f32 -5.0, %v1406_v45  ;;  %3010 = vst [vmem:[%s6160_s27 + $0x888] sm:$0xff] %v4344_v6  ;;  %v458_v62 = vld [vmem:[%s4801_s5 + $0x8c8] sm:$0xff] }
 0x2a0   : > { %4367 = vpow2.f32 %v2307_v29  ;;  %v4348_v59 = vpop.eup %4347  ;;  %v1407_v16 = vmul.f32 3.5, %v1087_v27  ;;  %3011 = vst [vmem:[%s6160_s27 + $0x890] sm:$0xff] %v4346_v54  ;;  %v1408_v28 = vmul.f32 3.5, %v1088_v12  ;;  %v1090_v31 = vadd.f32 1.0, %v4344_v6  ;;  %v459_v6 = vld [vmem:[%s4801_s5 + $0x8d0] sm:$0xff]  ;;  %v461_v27 = vld [vmem:[%s4801_s5 + $0x8e0] sm:$0xff] }
 0x2a1   : > { %4369 = vpow2.f32 %v2309_v22  ;;  %v2313_v7 = vmul.f32 1.442695, %v1725_v32  ;;  %v4350_v21 = vpop.eup %4349  ;;  %v2315_v24 = vmul.f32 1.442695, %v1726_v14  ;;  %3012 = vst [vmem:[%s6160_s27 + $0x898] sm:$0xff] %v4348_v59  ;;  %v1409_v44 = vmul.f32 3.5, %v1089_v18 }
 0x2a2   : > { %4371 = vpow2.f32 %v2311_v43  ;;  %v4352_v35 = vpop.eup %4351  ;;  %v1727_v39 = vadd.f32 -5.0, %v1407_v16  ;;  %v1091_v49 = vadd.f32 1.0, %v4346_v54  ;;  %3013 = vst [vmem:[%s6160_s27 + $0x8a0] sm:$0xff] %v4350_v21  ;;  %v1728_v57 = vadd.f32 -5.0, %v1408_v28  ;;  %v460_v32 = vld [vmem:[%s4801_s5 + $0x8d8] sm:$0xff]  ;;  %v462_v54 = vld [vmem:[%s4801_s5 + $0x8e8] sm:$0xff] }
 0x2a3   : > { %4373 = vpow2.f32 %v2313_v7  ;;  %v4354_v53 = vpop.eup %4353  ;;  %v1410_v61 = vmul.f32 3.5, %v1090_v31  ;;  %v1092_v1 = vadd.f32 1.0, %v4348_v59  ;;  %3014 = vst [vmem:[%s6160_s27 + $0x8a8] sm:$0xff] %v4352_v35  ;;  %v1729_v13 = vadd.f32 -5.0, %v1409_v44  ;;  %v463_v14 = vld [vmem:[%s4801_s5 + $0x8f0] sm:$0xff]  ;;  %v464_v59 = vld [vmem:[%s4801_s5 + $0x8f8] sm:$0xff] }
 0x2a4   : > { %4375 = vpow2.f32 %v2315_v24  ;;  %v4356_v5 = vpop.eup %4355  ;;  %v2317_v9 = vmul.f32 1.442695, %v1727_v39  ;;  %v1411_v19 = vmul.f32 3.5, %v1091_v49  ;;  %v1093_v26 = vadd.f32 1.0, %v4350_v21  ;;  %3015 = vst [vmem:[%s6160_s27 + $0x8b0] sm:$0xff] %v4354_v53  ;;  %v465_v16 = vld [vmem:[%s4801_s5 + $0x900] sm:$0xff] }
 0x2a5   : > { %v4358_v33 = vpop.eup %4357  ;;  %v2319_v50 = vmul.f32 1.442695, %v1728_v57  ;;  %v1730_v52 = vadd.f32 -5.0, %v1410_v61  ;;  %v1412_v8 = vmul.f32 3.5, %v1092_v1  ;;  %v1094_v11 = vadd.f32 1.0, %v4352_v35  ;;  %3016 = vst [vmem:[%s6160_s27 + $0x8b8] sm:$0xff] %v4356_v5 }
 0x2a6   : > { %v4360_v56 = vpop.eup %4359  ;;  %2677 = vst [vmem:[%s4886_s19 + $0x820] sm:$0xff] %v4358_v33  ;;  %4377 = vpow2.f32 %v2317_v9  ;;  %v2321_v15 = vmul.f32 1.442695, %v1729_v13  ;;  %v1731_v34 = vadd.f32 -5.0, %v1411_v19  ;;  %v1413_v58 = vmul.f32 3.5, %v1093_v26  ;;  %v466_v21 = vld [vmem:[%s4801_s5 + $0x908] sm:$0xff] }
 0x2a7   : > { %2678 = vst [vmem:[%s4886_s19 + $0x828] sm:$0xff] %v4360_v56  ;;  %4379 = vpow2.f32 %v2319_v50  ;;  %v2323_v37 = vmul.f32 1.442695, %v1730_v52  ;;  %v1732_v48 = vadd.f32 -5.0, %v1412_v8  ;;  %v1414_v40 = vmul.f32 3.5, %v1094_v11  ;;  %v4362_v63 = vpop.eup %4361  ;;  %v467_v28 = vld [vmem:[%s4801_s5 + $0x910] sm:$0xff] }
 0x2a8   : > { %4381 = vpow2.f32 %v2321_v15  ;;  %v2325_v0 = vmul.f32 1.442695, %v1731_v34  ;;  %v1733_v60 = vadd.f32 -5.0, %v1413_v58  ;;  %v1095_v25 = vadd.f32 1.0, %v4354_v53  ;;  %2679 = vst [vmem:[%s4886_s19 + $0x830] sm:$0xff] %v4362_v63  ;;  %v468_v35 = vld [vmem:[%s4801_s5 + $0x918] sm:$0xff] }
 0x2a9   : > { %4383 = vpow2.f32 %v2323_v37  ;;  %v2327_v17 = vmul.f32 1.442695, %v1732_v48  ;;  %v1734_v42 = vadd.f32 -5.0, %v1414_v40  ;;  %v1096_v23 = vadd.f32 1.0, %v4356_v5  ;;  %v469_v44 = vld [vmem:[%s4801_s5 + $0x920] sm:$0xff]  ;;  %v470_v53 = vld [vmem:[%s4801_s5 + $0x928] sm:$0xff] }
 0x2aa   : > { %4385 = vpow2.f32 %v2325_v0  ;;  %v2329_v30 = vmul.f32 1.442695, %v1733_v60  ;;  %v1415_v51 = vmul.f32 3.5, %v1095_v25  ;;  %v471_v61 = vld [vmem:[%s4801_s5 + $0x930] sm:$0xff]  ;;  %v472_v9 = vld [vmem:[%s4801_s5 + $0x938] sm:$0xff]  ;;  %v473_v26 = vld [vmem:[%s4801_s5 + $0x940] sm:$0xff] }
 0x2ab   : > { %v4364_v2 = vpop.eup %4363  ;;  %4387 = vpow2.f32 %v2327_v17  ;;  %v2331_v4 = vmul.f32 1.442695, %v1734_v42  ;;  %v1416_v47 = vmul.f32 3.5, %v1096_v23  ;;  %v474_v52 = vld [vmem:[%s4801_s5 + $0x948] sm:$0xff]  ;;  %v475_v56 = vld [vmem:[%s4801_s5 + $0x950] sm:$0xff]  ;;  %v476_v37 = vld [vmem:[%s4801_s5 + $0x958] sm:$0xff] }
 0x2ac   : > { %v4366_v36 = vpop.eup %4365  ;;  %2680 = vst [vmem:[%s4886_s19 + $0x838] sm:$0xff] %v4364_v2  ;;  %4389 = vpow2.f32 %v2329_v30  ;;  %v1735_v55 = vadd.f32 -5.0, %v1415_v51 }
 0x2ad   : > { %v4368_v46 = vpop.eup %4367  ;;  %2681 = vst [vmem:[%s4886_s19 + $0x840] sm:$0xff] %v4366_v36  ;;  %4391 = vpow2.f32 %v2331_v4  ;;  %v1736_v10 = vadd.f32 -5.0, %v1416_v47 }
 0x2ae   : > { %v4370_v3 = vpop.eup %4369  ;;  %2682 = vst [vmem:[%s4886_s19 + $0x848] sm:$0xff] %v4368_v46  ;;  %v2333_v29 = vmul.f32 1.442695, %v1735_v55  ;;  %4393 = vtanh.f32 %v457_v41 }
 0x2af   : > { %v4372_v20 = vpop.eup %4371  ;;  %2683 = vst [vmem:[%s4886_s19 + $0x850] sm:$0xff] %v4370_v3  ;;  %v2335_v45 = vmul.f32 1.442695, %v1736_v10  ;;  %4395 = vtanh.f32 %v458_v62 }
 0x2b0   : > { %v4374_v38 = vpop.eup %4373  ;;  %2684 = vst [vmem:[%s4886_s19 + $0x858] sm:$0xff] %v4372_v20  ;;  %4397 = vpow2.f32 %v2333_v29 }
 0x2b1   : > { %v4376_v22 = vpop.eup %4375  ;;  %2685 = vst [vmem:[%s4886_s19 + $0x860] sm:$0xff] %v4374_v38  ;;  %4399 = vpow2.f32 %v2335_v45 }
 0x2b2   : > { %2686 = vst [vmem:[%s4886_s19 + $0x868] sm:$0xff] %v4376_v22  ;;  %4401 = vtanh.f32 %v459_v6 }
 0x2b3   : > { %v4378_v43 = vpop.eup %4377  ;;  %4403 = vtanh.f32 %v460_v32 }
 0x2b4   : > { %v4380_v12 = vpop.eup %4379  ;;  %2687 = vst [vmem:[%s4886_s19 + $0x870] sm:$0xff] %v4378_v43  ;;  %4405 = vtanh.f32 %v461_v27 }
 0x2b5   : > { %v4382_v7 = vpop.eup %4381  ;;  %2688 = vst [vmem:[%s4886_s19 + $0x878] sm:$0xff] %v4380_v12  ;;  %4407 = vtanh.f32 %v462_v54 }
 0x2b6   : > { %v4384_v18 = vpop.eup %4383  ;;  %2689 = vst [vmem:[%s4886_s19 + $0x880] sm:$0xff] %v4382_v7  ;;  %4409 = vtanh.f32 %v463_v14 }
 0x2b7   : > { %v4386_v24 = vpop.eup %4385  ;;  %2690 = vst [vmem:[%s4886_s19 + $0x888] sm:$0xff] %v4384_v18  ;;  %4411 = vtanh.f32 %v464_v59 }
 0x2b8   : > { %v4388_v31 = vpop.eup %4387  ;;  %2691 = vst [vmem:[%s4886_s19 + $0x890] sm:$0xff] %v4386_v24  ;;  %4413 = vtanh.f32 %v465_v16 }
 0x2b9   : > { %v4390_v39 = vpop.eup %4389  ;;  %2692 = vst [vmem:[%s4886_s19 + $0x898] sm:$0xff] %v4388_v31  ;;  %4415 = vtanh.f32 %v466_v21 }
 0x2ba   : > { %v4392_v49 = vpop.eup %4391  ;;  %2693 = vst [vmem:[%s4886_s19 + $0x8a0] sm:$0xff] %v4390_v39  ;;  %4417 = vtanh.f32 %v467_v28 }
 0x2bb   : > { %v4394_v57 = vpop.eup %4393  ;;  %2694 = vst [vmem:[%s4886_s19 + $0x8a8] sm:$0xff] %v4392_v49  ;;  %4419 = vtanh.f32 %v468_v35 }
 0x2bc   : > { %v4396_v1 = vpop.eup %4395  ;;  %v1097_v5 = vadd.f32 1.0, %v4394_v57  ;;  %4421 = vtanh.f32 %v469_v44  ;;  %3017 = vst [vmem:[%s6160_s27 + $0x8c0] sm:$0xff] %v4394_v57 }
 0x2bd   : > { %v4398_v13 = vpop.eup %4397  ;;  %v1098_v19 = vadd.f32 1.0, %v4396_v1  ;;  %4423 = vtanh.f32 %v470_v53  ;;  %3018 = vst [vmem:[%s6160_s27 + $0x8c8] sm:$0xff] %v4396_v1 }
 0x2be   : > { %v4400_v33 = vpop.eup %4399  ;;  %2695 = vst [vmem:[%s4886_s19 + $0x8b0] sm:$0xff] %v4398_v13  ;;  %v1417_v50 = vmul.f32 3.5, %v1097_v5  ;;  %4425 = vtanh.f32 %v471_v61 }
 0x2bf   : > { %v4402_v8 = vpop.eup %4401  ;;  %2696 = vst [vmem:[%s4886_s19 + $0x8b8] sm:$0xff] %v4400_v33  ;;  %v1418_v11 = vmul.f32 3.5, %v1098_v19  ;;  %4427 = vtanh.f32 %v472_v9 }
 0x2c0   : > { %v4404_v15 = vpop.eup %4403  ;;  %v1737_v34 = vadd.f32 -5.0, %v1417_v50  ;;  %v1099_v58 = vadd.f32 1.0, %v4402_v8  ;;  %4429 = vtanh.f32 %v473_v26  ;;  %3019 = vst [vmem:[%s6160_s27 + $0x8d0] sm:$0xff] %v4402_v8 }
 0x2c1   : > { %v4406_v48 = vpop.eup %4405  ;;  %v1738_v40 = vadd.f32 -5.0, %v1418_v11  ;;  %v1100_v0 = vadd.f32 1.0, %v4404_v15  ;;  %4431 = vtanh.f32 %v474_v52  ;;  %3020 = vst [vmem:[%s6160_s27 + $0x8d8] sm:$0xff] %v4404_v15 }
 0x2c2   : > { %v4408_v60 = vpop.eup %4407  ;;  %v2337_v25 = vmul.f32 1.442695, %v1737_v34  ;;  %v1419_v63 = vmul.f32 3.5, %v1099_v58  ;;  %v1101_v17 = vadd.f32 1.0, %v4406_v48  ;;  %4433 = vtanh.f32 %v475_v56  ;;  %3021 = vst [vmem:[%s6160_s27 + $0x8e0] sm:$0xff] %v4406_v48 }
 0x2c3   : > { %v4410_v42 = vpop.eup %4409  ;;  %v2339_v23 = vmul.f32 1.442695, %v1738_v40  ;;  %v1420_v2 = vmul.f32 3.5, %v1100_v0  ;;  %v1102_v30 = vadd.f32 1.0, %v4408_v60  ;;  %4435 = vtanh.f32 %v476_v37  ;;  %3022 = vst [vmem:[%s6160_s27 + $0x8e8] sm:$0xff] %v4408_v60 }
 0x2c4   : > { %v4412_v51 = vpop.eup %4411  ;;  %4437 = vpow2.f32 %v2337_v25  ;;  %v1739_v36 = vadd.f32 -5.0, %v1419_v63  ;;  %v1421_v4 = vmul.f32 3.5, %v1101_v17  ;;  %v1103_v47 = vadd.f32 1.0, %v4410_v42  ;;  %3023 = vst [vmem:[%s6160_s27 + $0x8f0] sm:$0xff] %v4410_v42 }
 0x2c5   : > { %v4414_v41 = vpop.eup %4413  ;;  %4439 = vpow2.f32 %v2339_v23  ;;  %v1740_v46 = vadd.f32 -5.0, %v1420_v2  ;;  %v1422_v55 = vmul.f32 3.5, %v1102_v30  ;;  %v1104_v62 = vadd.f32 1.0, %v4412_v51  ;;  %3024 = vst [vmem:[%s6160_s27 + $0x8f8] sm:$0xff] %v4412_v51 }
 0x2c6   : > { %v4416_v3 = vpop.eup %4415  ;;  %v2341_v10 = vmul.f32 1.442695, %v1739_v36  ;;  %v1741_v20 = vadd.f32 -5.0, %v1421_v4  ;;  %v1423_v29 = vmul.f32 3.5, %v1103_v47  ;;  %v1105_v38 = vadd.f32 1.0, %v4414_v41  ;;  %3025 = vst [vmem:[%s6160_s27 + $0x900] sm:$0xff] %v4414_v41 }
 0x2c7   : > { %v4418_v45 = vpop.eup %4417  ;;  %v2343_v6 = vmul.f32 1.442695, %v1740_v46  ;;  %v1742_v22 = vadd.f32 -5.0, %v1422_v55  ;;  %v1424_v32 = vmul.f32 3.5, %v1104_v62  ;;  %v1106_v27 = vadd.f32 1.0, %v4416_v3  ;;  %3026 = vst [vmem:[%s6160_s27 + $0x908] sm:$0xff] %v4416_v3 }
 0x2c8   : > { %v4420_v54 = vpop.eup %4419  ;;  %4441 = vpow2.f32 %v2341_v10  ;;  %v2345_v43 = vmul.f32 1.442695, %v1741_v20  ;;  %v1743_v14 = vadd.f32 -5.0, %v1423_v29  ;;  %v1425_v12 = vmul.f32 3.5, %v1105_v38  ;;  %3027 = vst [vmem:[%s6160_s27 + $0x910] sm:$0xff] %v4418_v45 }
 0x2c9   : > { %v4422_v59 = vpop.eup %4421  ;;  %4443 = vpow2.f32 %v2343_v6  ;;  %v2347_v7 = vmul.f32 1.442695, %v1742_v22  ;;  %v1744_v16 = vadd.f32 -5.0, %v1424_v32  ;;  %v1426_v18 = vmul.f32 3.5, %v1106_v27  ;;  %3028 = vst [vmem:[%s6160_s27 + $0x918] sm:$0xff] %v4420_v54  ;;  %v477_v32 = vld [vmem:[%s4801_s5 + $0x960] sm:$0xff] }
 0x2ca   : > { %v4424_v21 = vpop.eup %4423  ;;  %4445 = vpow2.f32 %v2345_v43  ;;  %v2349_v24 = vmul.f32 1.442695, %v1743_v14  ;;  %v1745_v28 = vadd.f32 -5.0, %v1425_v12  ;;  %v1107_v31 = vadd.f32 1.0, %v4418_v45  ;;  %3029 = vst [vmem:[%s6160_s27 + $0x920] sm:$0xff] %v4422_v59  ;;  %v478_v43 = vld [vmem:[%s4801_s5 + $0x968] sm:$0xff] }
 0x2cb   : > { %v4426_v35 = vpop.eup %4425  ;;  %4447 = vpow2.f32 %v2347_v7  ;;  %v2351_v39 = vmul.f32 1.442695, %v1744_v16  ;;  %v1746_v44 = vadd.f32 -5.0, %v1426_v18  ;;  %v1108_v49 = vadd.f32 1.0, %v4420_v54  ;;  %3030 = vst [vmem:[%s6160_s27 + $0x928] sm:$0xff] %v4424_v21 }
 0x2cc   : > { %v4428_v53 = vpop.eup %4427  ;;  %4449 = vpow2.f32 %v2349_v24  ;;  %v2353_v57 = vmul.f32 1.442695, %v1745_v28  ;;  %v1427_v61 = vmul.f32 3.5, %v1107_v31  ;;  %v1109_v1 = vadd.f32 1.0, %v4422_v59  ;;  %3031 = vst [vmem:[%s6160_s27 + $0x930] sm:$0xff] %v4426_v35  ;;  %v480_v28 = vld [vmem:[%s4801_s5 + $0x978] sm:$0xff] }
 0x2cd   : > { %v4430_v5 = vpop.eup %4429  ;;  %4451 = vpow2.f32 %v2351_v39  ;;  %v2355_v9 = vmul.f32 1.442695, %v1746_v44  ;;  %v1428_v13 = vmul.f32 3.5, %v1108_v49  ;;  %v1110_v19 = vadd.f32 1.0, %v4424_v21  ;;  %3032 = vst [vmem:[%s6160_s27 + $0x938] sm:$0xff] %v4428_v53  ;;  %v479_v21 = vld [vmem:[%s4801_s5 + $0x970] sm:$0xff] }
 0x2ce   : > { %v4432_v26 = vpop.eup %4431  ;;  %4453 = vpow2.f32 %v2353_v57  ;;  %v1747_v33 = vadd.f32 -5.0, %v1427_v61  ;;  %v1429_v50 = vmul.f32 3.5, %v1109_v1  ;;  %v1111_v52 = vadd.f32 1.0, %v4426_v35  ;;  %3033 = vst [vmem:[%s6160_s27 + $0x940] sm:$0xff] %v4430_v5  ;;  %v481_v31 = vld [vmem:[%s4801_s5 + $0x980] sm:$0xff]  ;;  %v482_v35 = vld [vmem:[%s4801_s5 + $0x988] sm:$0xff] }
 0x2cf   : > { %v4434_v8 = vpop.eup %4433  ;;  %4455 = vpow2.f32 %v2355_v9  ;;  %v1748_v11 = vadd.f32 -5.0, %v1428_v13  ;;  %v1430_v56 = vmul.f32 3.5, %v1110_v19  ;;  %v1112_v15 = vadd.f32 1.0, %v4428_v53  ;;  %3034 = vst [vmem:[%s6160_s27 + $0x948] sm:$0xff] %v4432_v26  ;;  %v483_v44 = vld [vmem:[%s4801_s5 + $0x990] sm:$0xff]  ;;  %v484_v53 = vld [vmem:[%s4801_s5 + $0x998] sm:$0xff] }
 0x2d0   : > { %v4436_v34 = vpop.eup %4435  ;;  %v2357_v58 = vmul.f32 1.442695, %v1747_v33  ;;  %v1749_v37 = vadd.f32 -5.0, %v1429_v50  ;;  %v1431_v48 = vmul.f32 3.5, %v1111_v52  ;;  %v1113_v40 = vadd.f32 1.0, %v4430_v5  ;;  %3035 = vst [vmem:[%s6160_s27 + $0x950] sm:$0xff] %v4434_v8 }
 0x2d1   : > { %v4438_v0 = vpop.eup %4437  ;;  %v2359_v60 = vmul.f32 1.442695, %v1748_v11  ;;  %v1750_v25 = vadd.f32 -5.0, %v1430_v56  ;;  %v1432_v63 = vmul.f32 3.5, %v1112_v15  ;;  %v1114_v17 = vadd.f32 1.0, %v4432_v26  ;;  %3036 = vst [vmem:[%s6160_s27 + $0x958] sm:$0xff] %v4436_v34 }
 0x2d2   : > { %v4440_v42 = vpop.eup %4439  ;;  %2697 = vst [vmem:[%s4886_s19 + $0x8c0] sm:$0xff] %v4438_v0  ;;  %4457 = vpow2.f32 %v2357_v58  ;;  %v2361_v23 = vmul.f32 1.442695, %v1749_v37  ;;  %v1751_v2 = vadd.f32 -5.0, %v1431_v48  ;;  %v1433_v30 = vmul.f32 3.5, %v1113_v40  ;;  %v485_v61 = vld [vmem:[%s4801_s5 + $0x9a0] sm:$0xff] }
 0x2d3   : > { %2698 = vst [vmem:[%s4886_s19 + $0x8c8] sm:$0xff] %v4440_v42  ;;  %4459 = vpow2.f32 %v2359_v60  ;;  %v2363_v51 = vmul.f32 1.442695, %v1750_v25  ;;  %v1752_v36 = vadd.f32 -5.0, %v1432_v63  ;;  %v1434_v4 = vmul.f32 3.5, %v1114_v17  ;;  %v486_v5 = vld [vmem:[%s4801_s5 + $0x9a8] sm:$0xff] }
 0x2d4   : > { %4461 = vpow2.f32 %v2361_v23  ;;  %v2365_v47 = vmul.f32 1.442695, %v1751_v2  ;;  %v1753_v41 = vadd.f32 -5.0, %v1433_v30  ;;  %v1115_v46 = vadd.f32 1.0, %v4434_v8  ;;  %v487_v13 = vld [vmem:[%s4801_s5 + $0x9b0] sm:$0xff]  ;;  %v488_v26 = vld [vmem:[%s4801_s5 + $0x9b8] sm:$0xff] }
 0x2d5   : > { %v4442_v55 = vpop.eup %4441  ;;  %4463 = vpow2.f32 %v2363_v51  ;;  %v2367_v62 = vmul.f32 1.442695, %v1752_v36  ;;  %v1754_v3 = vadd.f32 -5.0, %v1434_v4  ;;  %v1116_v10 = vadd.f32 1.0, %v4436_v34  ;;  %v489_v50 = vld [vmem:[%s4801_s5 + $0x9c0] sm:$0xff]  ;;  %v490_v8 = vld [vmem:[%s4801_s5 + $0x9c8] sm:$0xff] }
 0x2d6   : > { %v4444_v20 = vpop.eup %4443  ;;  %2699 = vst [vmem:[%s4886_s19 + $0x8d0] sm:$0xff] %v4442_v55  ;;  %4465 = vpow2.f32 %v2365_v47  ;;  %v2369_v29 = vmul.f32 1.442695, %v1753_v41  ;;  %v1435_v38 = vmul.f32 3.5, %v1115_v46  ;;  %v491_v56 = vld [vmem:[%s4801_s5 + $0x9d0] sm:$0xff]  ;;  %v492_v58 = vld [vmem:[%s4801_s5 + $0x9d8] sm:$0xff] }
 0x2d7   : > { %v4446_v45 = vpop.eup %4445  ;;  %2700 = vst [vmem:[%s4886_s19 + $0x8d8] sm:$0xff] %v4444_v20  ;;  %4467 = vpow2.f32 %v2367_v62  ;;  %v2371_v6 = vmul.f32 1.442695, %v1754_v3  ;;  %v1436_v22 = vmul.f32 3.5, %v1116_v10  ;;  %v493_v40 = vld [vmem:[%s4801_s5 + $0x9e0] sm:$0xff]  ;;  %v494_v25 = vld [vmem:[%s4801_s5 + $0x9e8] sm:$0xff] }
 0x2d8   : > { %v4448_v27 = vpop.eup %4447  ;;  %2701 = vst [vmem:[%s4886_s19 + $0x8e0] sm:$0xff] %v4446_v45  ;;  %4469 = vpow2.f32 %v2369_v29  ;;  %v1755_v54 = vadd.f32 -5.0, %v1435_v38  ;;  %v495_v42 = vld [vmem:[%s4801_s5 + $0x9f0] sm:$0xff]  ;;  %v496_v51 = vld [vmem:[%s4801_s5 + $0x9f8] sm:$0xff] }
 0x2d9   : > { %v4450_v14 = vpop.eup %4449  ;;  %2702 = vst [vmem:[%s4886_s19 + $0x8e8] sm:$0xff] %v4448_v27  ;;  %4471 = vpow2.f32 %v2371_v6  ;;  %v1756_v12 = vadd.f32 -5.0, %v1436_v22 }
 0x2da   : > { %v4452_v59 = vpop.eup %4451  ;;  %2703 = vst [vmem:[%s4886_s19 + $0x8f0] sm:$0xff] %v4450_v14  ;;  %v2373_v7 = vmul.f32 1.442695, %v1755_v54  ;;  %4473 = vtanh.f32 %v477_v32 }
 0x2db   : > { %v4454_v16 = vpop.eup %4453  ;;  %2704 = vst [vmem:[%s4886_s19 + $0x8f8] sm:$0xff] %v4452_v59  ;;  %v2375_v18 = vmul.f32 1.442695, %v1756_v12  ;;  %4475 = vtanh.f32 %v478_v43 }
 0x2dc   : > { %v4456_v24 = vpop.eup %4455  ;;  %2705 = vst [vmem:[%s4886_s19 + $0x900] sm:$0xff] %v4454_v16  ;;  %4477 = vpow2.f32 %v2373_v7 }
 0x2dd   : > { %2706 = vst [vmem:[%s4886_s19 + $0x908] sm:$0xff] %v4456_v24  ;;  %4479 = vpow2.f32 %v2375_v18 }
 0x2de   : > { %4481 = vtanh.f32 %v479_v21 }
 0x2df   : > { %v4458_v39 = vpop.eup %4457  ;;  %4483 = vtanh.f32 %v480_v28 }
 0x2e0   : > { %v4460_v49 = vpop.eup %4459  ;;  %2707 = vst [vmem:[%s4886_s19 + $0x910] sm:$0xff] %v4458_v39  ;;  %4485 = vtanh.f32 %v481_v31 }
 0x2e1   : > { %v4462_v57 = vpop.eup %4461  ;;  %2708 = vst [vmem:[%s4886_s19 + $0x918] sm:$0xff] %v4460_v49  ;;  %4487 = vtanh.f32 %v482_v35 }
 0x2e2   : > { %v4464_v1 = vpop.eup %4463  ;;  %2709 = vst [vmem:[%s4886_s19 + $0x920] sm:$0xff] %v4462_v57  ;;  %4489 = vtanh.f32 %v483_v44 }
 0x2e3   : > { %v4466_v9 = vpop.eup %4465  ;;  %2710 = vst [vmem:[%s4886_s19 + $0x928] sm:$0xff] %v4464_v1  ;;  %4491 = vtanh.f32 %v484_v53 }
 0x2e4   : > { %v4468_v19 = vpop.eup %4467  ;;  %2711 = vst [vmem:[%s4886_s19 + $0x930] sm:$0xff] %v4466_v9  ;;  %4493 = vtanh.f32 %v485_v61 }
 0x2e5   : > { %v4470_v33 = vpop.eup %4469  ;;  %2712 = vst [vmem:[%s4886_s19 + $0x938] sm:$0xff] %v4468_v19  ;;  %4495 = vtanh.f32 %v486_v5 }
 0x2e6   : > { %v4472_v52 = vpop.eup %4471  ;;  %2713 = vst [vmem:[%s4886_s19 + $0x940] sm:$0xff] %v4470_v33  ;;  %4497 = vtanh.f32 %v487_v13 }
 0x2e7   : > { %v4474_v11 = vpop.eup %4473  ;;  %2714 = vst [vmem:[%s4886_s19 + $0x948] sm:$0xff] %v4472_v52  ;;  %4499 = vtanh.f32 %v488_v26 }
 0x2e8   : > { %v4476_v15 = vpop.eup %4475  ;;  %v1117_v34 = vadd.f32 1.0, %v4474_v11  ;;  %4501 = vtanh.f32 %v489_v50  ;;  %3037 = vst [vmem:[%s6160_s27 + $0x960] sm:$0xff] %v4474_v11 }
 0x2e9   : > { %v4478_v37 = vpop.eup %4477  ;;  %v1118_v48 = vadd.f32 1.0, %v4476_v15  ;;  %4503 = vtanh.f32 %v490_v8  ;;  %3038 = vst [vmem:[%s6160_s27 + $0x968] sm:$0xff] %v4476_v15 }
 0x2ea   : > { %v4480_v0 = vpop.eup %4479  ;;  %2715 = vst [vmem:[%s4886_s19 + $0x950] sm:$0xff] %v4478_v37  ;;  %v1437_v60 = vmul.f32 3.5, %v1117_v34  ;;  %4505 = vtanh.f32 %v491_v56 }
 0x2eb   : > { %v4482_v63 = vpop.eup %4481  ;;  %2716 = vst [vmem:[%s4886_s19 + $0x958] sm:$0xff] %v4480_v0  ;;  %v1438_v17 = vmul.f32 3.5, %v1118_v48  ;;  %4507 = vtanh.f32 %v492_v58 }
 0x2ec   : > { %v4484_v23 = vpop.eup %4483  ;;  %v1757_v2 = vadd.f32 -5.0, %v1437_v60  ;;  %v1119_v30 = vadd.f32 1.0, %v4482_v63  ;;  %4509 = vtanh.f32 %v493_v40  ;;  %3039 = vst [vmem:[%s6160_s27 + $0x970] sm:$0xff] %v4482_v63 }
 0x2ed   : > { %v4486_v36 = vpop.eup %4485  ;;  %v1758_v4 = vadd.f32 -5.0, %v1438_v17  ;;  %v1120_v47 = vadd.f32 1.0, %v4484_v23  ;;  %4511 = vtanh.f32 %v494_v25  ;;  %3040 = vst [vmem:[%s6160_s27 + $0x978] sm:$0xff] %v4484_v23 }
 0x2ee   : > { %v4488_v41 = vpop.eup %4487  ;;  %v2377_v46 = vmul.f32 1.442695, %v1757_v2  ;;  %v1439_v55 = vmul.f32 3.5, %v1119_v30  ;;  %v1121_v62 = vadd.f32 1.0, %v4486_v36  ;;  %4513 = vtanh.f32 %v495_v42  ;;  %3041 = vst [vmem:[%s6160_s27 + $0x980] sm:$0xff] %v4486_v36 }
 0x2ef   : > { %v4490_v3 = vpop.eup %4489  ;;  %v2379_v10 = vmul.f32 1.442695, %v1758_v4  ;;  %v1440_v20 = vmul.f32 3.5, %v1120_v47  ;;  %v1122_v29 = vadd.f32 1.0, %v4488_v41  ;;  %4515 = vtanh.f32 %v496_v51  ;;  %3042 = vst [vmem:[%s6160_s27 + $0x988] sm:$0xff] %v4488_v41 }
 0x2f0   : > { %v4492_v38 = vpop.eup %4491  ;;  %4517 = vpow2.f32 %v2377_v46  ;;  %v1759_v45 = vadd.f32 -5.0, %v1439_v55  ;;  %v1441_v6 = vmul.f32 3.5, %v1121_v62  ;;  %v1123_v22 = vadd.f32 1.0, %v4490_v3  ;;  %3043 = vst [vmem:[%s6160_s27 + $0x990] sm:$0xff] %v4490_v3 }
 0x2f1   : > { %v4494_v32 = vpop.eup %4493  ;;  %4519 = vpow2.f32 %v2379_v10  ;;  %v1760_v27 = vadd.f32 -5.0, %v1440_v20  ;;  %v1442_v54 = vmul.f32 3.5, %v1122_v29  ;;  %v1124_v43 = vadd.f32 1.0, %v4492_v38  ;;  %3044 = vst [vmem:[%s6160_s27 + $0x998] sm:$0xff] %v4492_v38 }
 0x2f2   : > { %v4496_v14 = vpop.eup %4495  ;;  %v2381_v12 = vmul.f32 1.442695, %v1759_v45  ;;  %v1761_v59 = vadd.f32 -5.0, %v1441_v6  ;;  %v1443_v7 = vmul.f32 3.5, %v1123_v22  ;;  %v1125_v16 = vadd.f32 1.0, %v4494_v32  ;;  %3045 = vst [vmem:[%s6160_s27 + $0x9a0] sm:$0xff] %v4494_v32 }
 0x2f3   : > { %v4498_v18 = vpop.eup %4497  ;;  %v2383_v21 = vmul.f32 1.442695, %v1760_v27  ;;  %v1762_v24 = vadd.f32 -5.0, %v1442_v54  ;;  %v1444_v28 = vmul.f32 3.5, %v1124_v43  ;;  %v1126_v31 = vadd.f32 1.0, %v4496_v14  ;;  %3046 = vst [vmem:[%s6160_s27 + $0x9a8] sm:$0xff] %v4496_v14 }
 0x2f4   : > { %v4500_v35 = vpop.eup %4499  ;;  %4521 = vpow2.f32 %v2381_v12  ;;  %v2385_v39 = vmul.f32 1.442695, %v1761_v59  ;;  %v1763_v44 = vadd.f32 -5.0, %v1443_v7  ;;  %v1445_v49 = vmul.f32 3.5, %v1125_v16  ;;  %3047 = vst [vmem:[%s6160_s27 + $0x9b0] sm:$0xff] %v4498_v18 }
 0x2f5   : > { %v4502_v53 = vpop.eup %4501  ;;  %4523 = vpow2.f32 %v2383_v21  ;;  %v2387_v57 = vmul.f32 1.442695, %v1762_v24  ;;  %v1764_v61 = vadd.f32 -5.0, %v1444_v28  ;;  %v1446_v1 = vmul.f32 3.5, %v1126_v31  ;;  %3048 = vst [vmem:[%s6160_s27 + $0x9b8] sm:$0xff] %v4500_v35 }
 0x2f6   : > { %v4504_v5 = vpop.eup %4503  ;;  %4525 = vpow2.f32 %v2385_v39  ;;  %v2389_v9 = vmul.f32 1.442695, %v1763_v44  ;;  %v1765_v13 = vadd.f32 -5.0, %v1445_v49  ;;  %v1127_v19 = vadd.f32 1.0, %v4498_v18  ;;  %3049 = vst [vmem:[%s6160_s27 + $0x9c0] sm:$0xff] %v4502_v53 }
 0x2f7   : > { %v4506_v26 = vpop.eup %4505  ;;  %4527 = vpow2.f32 %v2387_v57  ;;  %v2391_v33 = vmul.f32 1.442695, %v1764_v61  ;;  %v1766_v50 = vadd.f32 -5.0, %v1446_v1  ;;  %v1128_v52 = vadd.f32 1.0, %v4500_v35  ;;  %3050 = vst [vmem:[%s6160_s27 + $0x9c8] sm:$0xff] %v4504_v5 }
 0x2f8   : > { %v4508_v8 = vpop.eup %4507  ;;  %4529 = vpow2.f32 %v2389_v9  ;;  %v2393_v11 = vmul.f32 1.442695, %v1765_v13  ;;  %v1447_v56 = vmul.f32 3.5, %v1127_v19  ;;  %v1129_v15 = vadd.f32 1.0, %v4502_v53  ;;  %3051 = vst [vmem:[%s6160_s27 + $0x9d0] sm:$0xff] %v4506_v26 }
 0x2f9   : > { %v4510_v34 = vpop.eup %4509  ;;  %4531 = vpow2.f32 %v2391_v33  ;;  %v2395_v58 = vmul.f32 1.442695, %v1766_v50  ;;  %v1448_v37 = vmul.f32 3.5, %v1128_v52  ;;  %v1130_v48 = vadd.f32 1.0, %v4504_v5  ;;  %3052 = vst [vmem:[%s6160_s27 + $0x9d8] sm:$0xff] %v4508_v8 }
 0x2fa   : > { %v4512_v40 = vpop.eup %4511  ;;  %4533 = vpow2.f32 %v2393_v11  ;;  %v1767_v0 = vadd.f32 -5.0, %v1447_v56  ;;  %v1449_v60 = vmul.f32 3.5, %v1129_v15  ;;  %v1131_v25 = vadd.f32 1.0, %v4506_v26  ;;  %3053 = vst [vmem:[%s6160_s27 + $0x9e0] sm:$0xff] %v4510_v34 }
 0x2fb   : > { %v4514_v63 = vpop.eup %4513  ;;  %4535 = vpow2.f32 %v2395_v58  ;;  %v1768_v17 = vadd.f32 -5.0, %v1448_v37  ;;  %v1450_v42 = vmul.f32 3.5, %v1130_v48  ;;  %v1132_v23 = vadd.f32 1.0, %v4508_v8  ;;  %3054 = vst [vmem:[%s6160_s27 + $0x9e8] sm:$0xff] %v4512_v40 }
 0x2fc   : > { %v4516_v2 = vpop.eup %4515  ;;  %v2397_v30 = vmul.f32 1.442695, %v1767_v0  ;;  %v1769_v51 = vadd.f32 -5.0, %v1449_v60  ;;  %v1451_v36 = vmul.f32 3.5, %v1131_v25  ;;  %v1133_v4 = vadd.f32 1.0, %v4510_v34  ;;  %3055 = vst [vmem:[%s6160_s27 + $0x9f0] sm:$0xff] %v4514_v63 }
 0x2fd   : > { %v4518_v47 = vpop.eup %4517  ;;  %v2399_v41 = vmul.f32 1.442695, %v1768_v17  ;;  %v1770_v46 = vadd.f32 -5.0, %v1450_v42  ;;  %v1452_v55 = vmul.f32 3.5, %v1132_v23  ;;  %v1134_v62 = vadd.f32 1.0, %v4512_v40  ;;  %3056 = vst [vmem:[%s6160_s27 + $0x9f8] sm:$0xff] %v4516_v2 }
 0x2fe   : > { %v4520_v3 = vpop.eup %4519  ;;  %2717 = vst [vmem:[%s4886_s19 + $0x960] sm:$0xff] %v4518_v47  ;;  %4537 = vpow2.f32 %v2397_v30  ;;  %v2401_v10 = vmul.f32 1.442695, %v1769_v51  ;;  %v1771_v20 = vadd.f32 -5.0, %v1451_v36  ;;  %v1453_v29 = vmul.f32 3.5, %v1133_v4 }
 0x2ff   : > { %4598 = shalt.err (!%p4595_p10)
}
 0x300   : > { %s4599_s23 = scalar_lea.hbm %s6840_s7, 40960  ;;  %s4603_s29 = scalar_lea.hbm %s6946_s2, 81920 }
 0x301   : > { %p4600_p0 = scmp.ne.s32.totalorder %s6840_s7, %s4599_s23  ;;  %p4604_p1 = scmp.lt.s32.totalorder %s6840_s7, %s6946_s2 }
 0x302   : > { %p4605_p3 = scmp.lt.s32.totalorder %s4603_s29, %s4599_s23 }
 0x303   : > { %p4601_p2 = pnand %p4600_p0, %p7602_p12 }
 0x304   : > { %p4606_p6 = por %p4605_p3, %p4604_p1 }
 0x305   : > { %p4602_p9 = pneg %p4601_p2 }
 0x307   : > { %p4607_p11 = pnand %p4606_p6, %p4602_p9 }
 0x309   : > { %4610 = shalt.err (!%p4607_p11)
}
 0x30a   : > { %s4685_s27 = smov 1024   ;;  %s4686_s3 = smov 64   ;;  %2718 = vst [vmem:[%s4886_s19 + $0x968] sm:$0xff] %v4520_v3  ;;  %4539 = vpow2.f32 %v2399_v41  ;;  %v2403_v38 = vmul.f32 1.442695, %v1770_v46  ;;  %v1772_v45 = vadd.f32 -5.0, %v1452_v55  ;;  %v4522_v54 = vpop.eup %4521 }
 0x30b   : > { %3225 = dma.vmem_to_hbm [thread:$0]  (%p7602_p12), %s6842_s30, 40960, %s6840_s7, %s3063_s8, %s4685_s27, %s4685_s27, %s4686_s3   ;;  %v1454_v6 = vmul.f32 3.5, %v1134_v62  ;;  %4541 = vpow2.f32 %v2401_v10  ;;  %v2405_v22 = vmul.f32 1.442695, %v1771_v20  ;;  %v1773_v32 = vadd.f32 -5.0, %v1453_v29  ;;  %v4524_v59 = vpop.eup %4523 }
 0x30c   : > { %v1135_v27 = vadd.f32 1.0, %v4514_v63  ;;  %4543 = vpow2.f32 %v2403_v38  ;;  %v2407_v43 = vmul.f32 1.442695, %v1772_v45  ;;  %v1136_v12 = vadd.f32 1.0, %v4516_v2  ;;  %2719 = vst [vmem:[%s4886_s19 + $0x970] sm:$0xff] %v4522_v54  ;;  %v4526_v18 = vpop.eup %4525  ;;  %2720 = vst [vmem:[%s4886_s19 + $0x978] sm:$0xff] %v4524_v59  ;;  %s6896_s8 = scalar_lea.hbm %s6945_s1, %s3218_s28 }
 0x30d   : > { %v1774_v14 = vadd.f32 -5.0, %v1454_v6  ;;  %4545 = vpow2.f32 %v2405_v22  ;;  %v2409_v7 = vmul.f32 1.442695, %v1773_v32  ;;  %v4528_v28 = vpop.eup %4527  ;;  %2721 = vst [vmem:[%s4886_s19 + $0x980] sm:$0xff] %v4526_v18  ;;  %s3077_s30 = sshll.u32 %s4886_s19, 4  ;;  %s3058_s14 = scalar_lea.sflag [#allocation4], %s4794_s26  ;;  %s6898_s30 = int_to_ptr.vmem [resolvable:$true] %s3077_s30 }
 0x30e   : > { %v1455_v16 = vmul.f32 3.5, %v1135_v27  ;;  %4547 = vpow2.f32 %v2407_v43  ;;  %v1456_v24 = vmul.f32 3.5, %v1136_v12  ;;  %v4530_v35 = vpop.eup %4529  ;;  %2722 = vst [vmem:[%s4886_s19 + $0x988] sm:$0xff] %v4528_v28  ;;  %s4611_s16 = scalar_lea.vmem %s6898_s30, 40960  ;;  %s4687_s13 = smov [#allocation5]  }
 0x30f   : > { %v2411_v21 = vmul.f32 1.442695, %v1774_v14  ;;  %4549 = vpow2.f32 %v2409_v7  ;;  %v4532_v44 = vpop.eup %4531  ;;  %2723 = vst [vmem:[%s4886_s19 + $0x990] sm:$0xff] %v4530_v35  ;;  %p4612_p13 = scmp.ne.s32.totalorder %s6898_s30, %s4611_s16  ;;  %s4615_s17 = sshll.u32 %s4687_s13, 4  ;;  %s4616_s17 = int_to_ptr.vmem [resolvable:$false] %s4615_s17 }
 0x310   : > { %v1775_v31 = vadd.f32 -5.0, %v1455_v16  ;;  %v1776_v39 = vadd.f32 -5.0, %v1456_v24  ;;  %v4534_v53 = vpop.eup %4533  ;;  %2724 = vst [vmem:[%s4886_s19 + $0x998] sm:$0xff] %v4532_v44  ;;  %s4617_s22 = scalar_lea.vmem %s4616_s17, 81920  ;;  %p4618_p7 = scmp.lt.s32.totalorder %s6898_s30, %s4616_s17 }
 0x311   : > { %4551 = vpow2.f32 %v2411_v21  ;;  %v4536_v61 = vpop.eup %4535  ;;  %2725 = vst [vmem:[%s4886_s19 + $0x9a0] sm:$0xff] %v4534_v53  ;;  %p4613_p4 = pnand %p4612_p13, %p7602_p12  ;;  %p4619_p8 = scmp.lt.s32.totalorder %s4617_s22, %s4611_s16 }
 0x312   : > { %v2413_v49 = vmul.f32 1.442695, %v1775_v31  ;;  %v2415_v57 = vmul.f32 1.442695, %v1776_v39  ;;  %2726 = vst [vmem:[%s4886_s19 + $0x9a8] sm:$0xff] %v4536_v61  ;;  %v4538_v1 = vpop.eup %4537 }
 0x313   : > { %2727 = vst [vmem:[%s4886_s19 + $0x9b0] sm:$0xff] %v4538_v1  ;;  %p4614_p5 = pneg %p4613_p4  ;;  %p4620_p10 = por %p4619_p8, %p4618_p7 }
 0x314   : > { %4553 = vpow2.f32 %v2413_v49 }
 0x315   : > { %4555 = vpow2.f32 %v2415_v57  ;;  %p4621_p0 = pnand %p4620_p10, %p4614_p5 }
 0x317   : > { %v4540_v5 = vpop.eup %4539 }
 0x318   : > { %v4542_v9 = vpop.eup %4541  ;;  %2728 = vst [vmem:[%s4886_s19 + $0x9b8] sm:$0xff] %v4540_v5 }
 0x319   : > { %v4544_v13 = vpop.eup %4543  ;;  %2729 = vst [vmem:[%s4886_s19 + $0x9c0] sm:$0xff] %v4542_v9 }
 0x31a   : > { %v4546_v19 = vpop.eup %4545  ;;  %2730 = vst [vmem:[%s4886_s19 + $0x9c8] sm:$0xff] %v4544_v13 }
 0x31b   : > { %v4548_v26 = vpop.eup %4547  ;;  %2731 = vst [vmem:[%s4886_s19 + $0x9d0] sm:$0xff] %v4546_v19 }
 0x31c   : > { %v4550_v33 = vpop.eup %4549  ;;  %2732 = vst [vmem:[%s4886_s19 + $0x9d8] sm:$0xff] %v4548_v26 }
 0x31d   : > { %2733 = vst [vmem:[%s4886_s19 + $0x9e0] sm:$0xff] %v4550_v33 }
 0x31e   : > { %v4552_v50 = vpop.eup %4551 }
 0x31f   : > { %2734 = vst [vmem:[%s4886_s19 + $0x9e8] sm:$0xff] %v4552_v50 }
 0x321   : > { %v4554_v52 = vpop.eup %4553 }
 0x322   : > { %v4556_v8 = vpop.eup %4555  ;;  %2735 = vst [vmem:[%s4886_s19 + $0x9f0] sm:$0xff] %v4554_v52 }
 0x323   : > { %2736 = vst [vmem:[%s4886_s19 + $0x9f8] sm:$0xff] %v4556_v8 }
 0x324   : > { %4624 = shalt.err (!%p4621_p0)
}
 0x325   : > { %s4625_s19 = scalar_lea.hbm %s6896_s8, 40960  ;;  %s4629_s23 = scalar_lea.hbm %s6945_s1, 81920 }
 0x326   : > { %p4626_p2 = scmp.ne.s32.totalorder %s6896_s8, %s4625_s19  ;;  %p4630_p3 = scmp.lt.s32.totalorder %s6896_s8, %s6945_s1 }
 0x327   : > { %p4631_p6 = scmp.lt.s32.totalorder %s4629_s23, %s4625_s19 }
 0x328   : > { %p4627_p9 = pnand %p4626_p2, %p7602_p12 }
 0x329   : > { %p4632_p11 = por %p4631_p6, %p4630_p3 }
 0x32a   : > { %p4628_p1 = pneg %p4627_p9 }
 0x32c   : > { %p4633_p13 = pnand %p4632_p11, %p4628_p1 }
 0x32e   : > { %4636 = shalt.err (!%p4633_p13)
}
 0x32f   : > { %3224 = dma.vmem_to_hbm [thread:$0]  (%p7602_p12), %s6898_s30, 40960, %s6896_s8, %s3058_s14, %s4685_s27, %s4685_s27, %s4686_s3  }
 0x330 PF: > { %s3109_s29 = sand.u32 1, %s4667_s9   ;;  %p7603_p4 = scmp.ne.s32.totalorder %s7167_s21, 0 }
 0x331   : > { %p7604_p5 = scmp.ge.s32.totalorder %s4679_s12, 2  ;;  %s3110_s4 = scalar_lea.sflag [#allocation4], %s3109_s29 }
 0x333   : > { %p3233_p7 = pnand %p7604_p5, %p7603_p4 }
 0x335   : > { %p3234_p8 = pneg %p3233_p7 }
 0x337   : > { %4658 = dma.done.wait (%p3234_p8), %s3110_s4, 40960  }
 0x338   : > { %4660 = vsyncadd (%p3234_p8), %s3110_s4, 4294926336  ;;  %s3119_s5 = scalar_lea.sflag [#allocation7], %s3109_s29 }
 0x339   : > { %4662 = dma.done.wait (%p3234_p8), %s3119_s5, 40960  }
 0x33a   : > { %4664 = vsyncadd (%p3234_p8), %s3119_s5, 4294926336  ;;  %p19_p12 = scmp.ge.s32.totalorder %s4728_s15, 4   ;;  %s7605_s9 = smov %s4671_s10 }
 0x33b   : > { %s7606_s10 = smov %s4675_s11  ;;  %s7607_s11 = smov %s4740_s18 }
 0x33c   : > { %s7608_s12 = smov %s4728_s15  ;;  %21 = sbr.rel (!%p19_p12) target bundleno = 7 (0x7), region = 86 }
 0x341   :  { %3124 = vsyncpa [#allocation3], 1 }
 0x342   :  { %3126 = vsyncpa [#allocation3 + $0x1], 1 }
 0x343   :  { %3127 = vsyncpa [#allocation4], 1 }
 0x344   :  { %3129 = vsyncpa [#allocation4 + $0x1], 1 }
 0x345   :  { %3130 = vsyncpa [#allocation7], 1 }
 0x346   :  { %3132 = vsyncpa [#allocation7 + $0x1], 1 }

</bundles_post_ra>
